<compile_context>
chip_gen: v7x
topology: tpu7x:2x2x1
jax: 0.10.0
libtpu: 0.0.40
codegen_flags: <defaults>
</compile_context>

<pallas_src>
import functools

import jax
import jax.numpy as jnp
from jax.experimental import pallas as pl
from jax.experimental.pallas import tpu as pltpu

_PAD = 8  # interior of the padded scratch starts at a sublane-aligned column


def _residual_stack_kernel(x_ref, w1_ref, w2_ref, o_ref,
                           act_ref, xpad_ref, patch_ref, *, n_res_layers):
    """Full residual stack for one batch element, entirely in VMEM.

    x_ref     : (1, H, W, C)            input block (NHWC)
    w1_ref    : (9*C, R)      bf16      3x3 conv weights, K ordered (ky, kx, C)
    w2_ref    : (R, C)        bf16      1x1 conv weights
    o_ref     : (1, H, W, C)            output block
    act_ref   : (H, W, C)     f32 VMEM  running residual activation
    xpad_ref  : (H+2, W+16, C) f32 VMEM zero-padded ReLU(act); interior columns
                                        live at [_PAD, _PAD + W)
    patch_ref : (H*W, 9*C)    bf16 VMEM im2col patch (single fat-K MXU LHS)
    """
    _, H, W, C = x_ref.shape
    HW = H * W
    P = _PAD
    Wp = W + 2 * P

    # Halo-only zeroing (review): zero just the cells the 3x3 windows can read
    # outside the interior -- rows 0 and H+1 plus the two side column bands.  All
    # stores are sublane-aligned.  The interior is rewritten every layer; the halo
    # is never written again, and we re-zero it every grid step (cheap) so each
    # megacore's private scratch instance is initialized.
    zrow = jnp.zeros((Wp, C), jnp.float32)
    xpad_ref[0] = zrow
    xpad_ref[H + 1] = zrow
    zside = jnp.zeros((H + 2, P, C), jnp.float32)
    xpad_ref[:, pl.ds(0, P), :] = zside
    xpad_ref[:, pl.ds(P + W, P), :] = zside

    # Residual activation kept in f32 in a VMEM scratch (bounded register pressure).
    act_ref[...] = x_ref[0].astype(jnp.float32)

    for _ in range(n_res_layers):
        # ReLU(act) -> padded scratch interior (column offset P=8: aligned stores).
        xpad_ref[pl.ds(1, H), pl.ds(P, W), :] = jnp.maximum(act_ref[...], 0.0)

        # Build the whole (H*W, 9C) im2col patch ONCE per layer (hoisted out of any
        # per-ky loop), sliced directly from the ref and stored lane-aligned in bf16.
        # Column-block order is (ky, kx, C), matching the wrapper's weight reshape.
        for ky in range(3):
            for kx in range(3):
                win = xpad_ref[pl.ds(ky, H), pl.ds(P - 1 + kx, W), :]   # (H, W, C) f32
                c0 = (ky * 3 + kx) * C
                patch_ref[:, pl.ds(c0, C)] = win.reshape(HW, C).astype(jnp.bfloat16)

        # 3x3 conv as a single fat-K bf16 MXU matmul (K = 9C), f32 accumulation.
        h = jnp.dot(patch_ref[...], w1_ref[...],
                    preferred_element_type=jnp.float32)                 # (HW, R) f32
        h = jnp.maximum(h, 0.0).astype(jnp.bfloat16)
        # 1x1 conv (channel matmul) + residual add (residual kept in f32).
        y = jnp.dot(h, w2_ref[...], preferred_element_type=jnp.float32)  # (HW, C) f32
        act_ref[...] = act_ref[...] + y.reshape(H, W, C)

    # Final stack ReLU (applied even when n_res_layers == 0, matching PyTorch).
    o_ref[0] = jnp.maximum(act_ref[...], 0.0).astype(o_ref.dtype)


@functools.partial(jax.jit, static_argnames="n_res_layers")
def residual_stack_nchw(x_nchw, w1_oihw, w2_oihw, n_res_layers):
    """Pallas version of ResidualStack.forward. Input/output are NCHW (PyTorch layout).

    x_nchw  : (B, C, H, W)
    w1_oihw : (R, C, 3, 3)   Conv2d(in_dim=C, res_h_dim=R, k=3, bias=False) weight
    w2_oihw : (C, R, 1, 1)   Conv2d(res_h_dim=R, h_dim=C, k=1, bias=False) weight
    """
    B, C, H, W = x_nchw.shape
    R = w1_oihw.shape[0]

    # TODO(synk): if the surrounding model keeps activations NHWC, drop these
    # boundary transposes (they cost HBM traffic comparable to the kernel itself).
    x = jnp.transpose(x_nchw, (0, 2, 3, 1))                           # NHWC
    # OIHW -> (ky, kx, C, R) -> (9C, R): K order (ky, kx, C) matches the in-kernel
    # patch column-block order.  bf16 weights: MXU-native rate on all generations.
    w1f = (jnp.transpose(w1_oihw, (2, 3, 1, 0))
           .reshape(9 * C, R).astype(jnp.bfloat16))
    w2 = jnp.transpose(w2_oihw[:, :, 0, 0], (1, 0)).astype(jnp.bfloat16)  # (R, C)

    kernel = functools.partial(_residual_stack_kernel, n_res_layers=n_res_layers)
    out = pl.pallas_call(
        kernel,
        out_shape=jax.ShapeDtypeStruct((B, H, W, C), x.dtype),
        grid=(B,),
        in_specs=[
            pl.BlockSpec((1, H, W, C), lambda b: (b, 0, 0, 0)),
            pl.BlockSpec((9 * C, R), lambda b: (0, 0)),               # resident weight
            pl.BlockSpec((R, C), lambda b: (0, 0)),                   # resident weight
        ],
        out_specs=pl.BlockSpec((1, H, W, C), lambda b: (b, 0, 0, 0)),
        scratch_shapes=[
            pltpu.VMEM((H, W, C), jnp.float32),                       # act (residual)
            pltpu.VMEM((H + 2, W + 2 * _PAD, C), jnp.float32),        # padded ReLU(act)
            pltpu.VMEM((H * W, 9 * C), jnp.bfloat16),                 # im2col patch
        ],
        compiler_params=pltpu.CompilerParams(
            dimension_semantics=("parallel",),                        # 2 TCs on v7x
            vmem_limit_bytes=32 * 1024 * 1024),
    )(x, w1f, w2)
    return jnp.transpose(out, (0, 3, 1, 2))                           # back to NCHW


def _reference_nchw(x_nchw, w1_oihw, w2_oihw, n_res_layers):
    """Pure-JAX reference (mirrors the PyTorch forward) for correctness checking."""
    x = jnp.transpose(x_nchw, (0, 2, 3, 1))                           # NHWC
    w1 = jnp.transpose(w1_oihw, (2, 3, 1, 0))                         # HWIO
    w2 = jnp.transpose(w2_oihw[:, :, 0, 0], (1, 0))                   # (R, C)
    dn = ('NHWC', 'HWIO', 'NHWC')
    for _ in range(n_res_layers):
        a = jax.nn.relu(x)
        h = jax.lax.conv_general_dilated(a, w1, (1, 1), 'SAME', dimension_numbers=dn,
                                         precision=jax.lax.Precision.HIGHEST)
        h = jax.nn.relu(h)
        x = x + jnp.einsum('bhwr,rc->bhwc', h, w2,
                           precision=jax.lax.Precision.HIGHEST)
    x = jax.nn.relu(x)
    return jnp.transpose(x, (0, 3, 1, 2))


if __name__ == "__main__":
    # Small shapes consistent with the module (residual add requires h_dim == in_dim).
    # C=128 keeps the channel (lane) dimension dense; typical VQ-VAE res_h_dim=32.
    B, H, W = 2, 16, 16
    C = 128            # in_dim == h_dim
    R = 32             # res_h_dim
    n_res_layers = 2

    key = jax.random.PRNGKey(0)
    kx, k1, k2 = jax.random.split(key, 3)
    x = jax.random.normal(kx, (B, C, H, W), dtype=jnp.float32)
    # PyTorch conv weight layouts: (O, I, kH, kW).
    w1 = jax.random.normal(k1, (R, C, 3, 3), dtype=jnp.float32) * (1.0 / (9 * C)) ** 0.5
    w2 = jax.random.normal(k2, (C, R, 1, 1), dtype=jnp.float32) * (1.0 / R) ** 0.5

    out = residual_stack_nchw(x, w1, w2, n_res_layers)
    out = jax.block_until_ready(out)

    ref = _reference_nchw(x, w1, w2, n_res_layers)
    err = jnp.max(jnp.abs(out - ref))
    # Tolerance reflects bf16 MXU operands (f32 accumulation) vs. a HIGHEST-precision
    # f32 reference; expected max error at these shapes is ~1e-2.
    if not jnp.allclose(out, ref, atol=5e-2, rtol=5e-2):
        raise AssertionError(f"Pallas ResidualStack mismatch, max abs err = {err}")

    print("KERNEL_OK")
</pallas_src>

<mosaic_0001>
module attributes {stable_mosaic.version = 11 : i64} {
  func.func @_residual_stack_kernel(%arg0: i32, %arg1: memref<1x16x16x128xf32, #tpu.memory_space<vmem>>, %arg2: memref<1152x32xbf16, #tpu.memory_space<vmem>>, %arg3: memref<32x128xbf16, #tpu.memory_space<vmem>>, %arg4: memref<1x16x16x128xf32, #tpu.memory_space<vmem>>, %arg5: memref<16x16x128xf32, #tpu.memory_space<vmem>>, %arg6: memref<18x32x128xf32, #tpu.memory_space<vmem>>, %arg7: memref<256x1152xbf16, #tpu.memory_space<vmem>>) attributes {dimension_semantics = [#tpu.dimension_semantics<parallel>], iteration_bounds = array<i64: 2>, scalar_prefetch = 0 : i64, scratch_operands = 3 : i64, tpu.core_type = #tpu.core_type<tc>, window_params = [{transform_indices = @transform_0, window_bounds = array<i64: 1, 16, 16, 128>}, {pipeline_mode = #tpu.pipeline_mode<synchronous>, transform_indices = @transform_1, window_bounds = array<i64: 1152, 32>}, {pipeline_mode = #tpu.pipeline_mode<synchronous>, transform_indices = @transform_2, window_bounds = array<i64: 32, 128>}, {transform_indices = @transform_3, window_bounds = array<i64: 1, 16, 16, 128>}]} {
    %cst = arith.constant 0.000000e+00 : f32
    %0 = vector.broadcast %cst : f32 to vector<32x128xf32>
    %c0 = arith.constant 0 : index
    %c0_0 = arith.constant 0 : index
    %c0_1 = arith.constant 0 : index
    %1 = vector.load %arg6[%c0, %c0_0, %c0_1] : memref<18x32x128xf32, #tpu.memory_space<vmem>>, vector<1x32x128xf32>
    %2 = vector.shape_cast %1 : vector<1x32x128xf32> to vector<32x128xf32>
    %3 = vector.shape_cast %0 : vector<32x128xf32> to vector<1x32x128xf32>
    tpu.vector_store %arg6[%c0, %c0_0, %c0_1], %3 {strides = array<i32>} : memref<18x32x128xf32, #tpu.memory_space<vmem>>, vector<1x32x128xf32>,
    %c17 = arith.constant 17 : index
    %c0_2 = arith.constant 0 : index
    %c0_3 = arith.constant 0 : index
    %4 = vector.load %arg6[%c17, %c0_2, %c0_3] : memref<18x32x128xf32, #tpu.memory_space<vmem>>, vector<1x32x128xf32>
    %5 = vector.shape_cast %4 : vector<1x32x128xf32> to vector<32x128xf32>
    %6 = vector.shape_cast %0 : vector<32x128xf32> to vector<1x32x128xf32>
    tpu.vector_store %arg6[%c17, %c0_2, %c0_3], %6 {strides = array<i32>} : memref<18x32x128xf32, #tpu.memory_space<vmem>>, vector<1x32x128xf32>,
    %cst_4 = arith.constant 0.000000e+00 : f32
    %7 = vector.broadcast %cst_4 : f32 to vector<18x8x128xf32>
    %c0_5 = arith.constant 0 : index
    %c0_6 = arith.constant 0 : index
    %c0_7 = arith.constant 0 : index
    %8 = vector.load %arg6[%c0_5, %c0_6, %c0_7] : memref<18x32x128xf32, #tpu.memory_space<vmem>>, vector<18x8x128xf32>
    tpu.vector_store %arg6[%c0_5, %c0_6, %c0_7], %7 {strides = array<i32>} : memref<18x32x128xf32, #tpu.memory_space<vmem>>, vector<18x8x128xf32>,
    %c0_8 = arith.constant 0 : index
    %c24 = arith.constant 24 : index
    %c0_9 = arith.constant 0 : index
    %9 = vector.load %arg6[%c0_8, %c24, %c0_9] : memref<18x32x128xf32, #tpu.memory_space<vmem>>, vector<18x8x128xf32>
    tpu.vector_store %arg6[%c0_8, %c24, %c0_9], %7 {strides = array<i32>} : memref<18x32x128xf32, #tpu.memory_space<vmem>>, vector<18x8x128xf32>,
    %c0_10 = arith.constant 0 : index
    %c0_11 = arith.constant 0 : index
    %c0_12 = arith.constant 0 : index
    %c0_13 = arith.constant 0 : index
    %10 = vector.load %arg1[%c0_10, %c0_11, %c0_12, %c0_13] : memref<1x16x16x128xf32, #tpu.memory_space<vmem>>, vector<1x16x16x128xf32>
    %11 = vector.shape_cast %10 : vector<1x16x16x128xf32> to vector<16x16x128xf32>
    %c0_14 = arith.constant 0 : index
    %c0_15 = arith.constant 0 : index
    %c0_16 = arith.constant 0 : index
    %12 = vector.load %arg5[%c0_14, %c0_15, %c0_16] : memref<16x16x128xf32, #tpu.memory_space<vmem>>, vector<16x16x128xf32>
    tpu.vector_store %arg5[%c0_14, %c0_15, %c0_16], %11 {strides = array<i32>} : memref<16x16x128xf32, #tpu.memory_space<vmem>>, vector<16x16x128xf32>,
    %c0_17 = arith.constant 0 : index
    %c0_18 = arith.constant 0 : index
    %c0_19 = arith.constant 0 : index
    %13 = vector.load %arg5[%c0_17, %c0_18, %c0_19] : memref<16x16x128xf32, #tpu.memory_space<vmem>>, vector<16x16x128xf32>
    %cst_20 = arith.constant 0.000000e+00 : f32
    %14 = vector.broadcast %cst_20 : f32 to vector<16x16x128xf32>
    %15 = arith.maximumf %13, %14 : vector<16x16x128xf32>
    %c1 = arith.constant 1 : index
    %c8 = arith.constant 8 : index
    %c0_21 = arith.constant 0 : index
    %16 = vector.load %arg6[%c1, %c8, %c0_21] : memref<18x32x128xf32, #tpu.memory_space<vmem>>, vector<16x16x128xf32>
    tpu.vector_store %arg6[%c1, %c8, %c0_21], %15 {strides = array<i32>} : memref<18x32x128xf32, #tpu.memory_space<vmem>>, vector<16x16x128xf32>,
    %c0_22 = arith.constant 0 : index
    %c7 = arith.constant 7 : index
    %c0_23 = arith.constant 0 : index
    %17 = vector.load %arg6[%c0_22, %c7, %c0_23] : memref<18x32x128xf32, #tpu.memory_space<vmem>>, vector<16x16x128xf32>
    %18 = vector.shape_cast %17 : vector<16x16x128xf32> to vector<256x128xf32>
    %19 = arith.truncf %18 : vector<256x128xf32> to vector<256x128xbf16>
    %c0_24 = arith.constant 0 : index
    %c0_25 = arith.constant 0 : index
    %20 = vector.load %arg7[%c0_24, %c0_25] : memref<256x1152xbf16, #tpu.memory_space<vmem>>, vector<256x128xbf16>
    tpu.vector_store %arg7[%c0_24, %c0_25], %19 {strides = array<i32>} : memref<256x1152xbf16, #tpu.memory_space<vmem>>, vector<256x128xbf16>,
    %c0_26 = arith.constant 0 : index
    %c8_27 = arith.constant 8 : index
    %c0_28 = arith.constant 0 : index
    %21 = vector.load %arg6[%c0_26, %c8_27, %c0_28] : memref<18x32x128xf32, #tpu.memory_space<vmem>>, vector<16x16x128xf32>
    %22 = vector.shape_cast %21 : vector<16x16x128xf32> to vector<256x128xf32>
    %23 = arith.truncf %22 : vector<256x128xf32> to vector<256x128xbf16>
    %c0_29 = arith.constant 0 : index
    %c128 = arith.constant 128 : index
    %24 = vector.load %arg7[%c0_29, %c128] : memref<256x1152xbf16, #tpu.memory_space<vmem>>, vector<256x128xbf16>
    tpu.vector_store %arg7[%c0_29, %c128], %23 {strides = array<i32>} : memref<256x1152xbf16, #tpu.memory_space<vmem>>, vector<256x128xbf16>,
    %c0_30 = arith.constant 0 : index
    %c9 = arith.constant 9 : index
    %c0_31 = arith.constant 0 : index
    %25 = vector.load %arg6[%c0_30, %c9, %c0_31] : memref<18x32x128xf32, #tpu.memory_space<vmem>>, vector<16x16x128xf32>
    %26 = vector.shape_cast %25 : vector<16x16x128xf32> to vector<256x128xf32>
    %27 = arith.truncf %26 : vector<256x128xf32> to vector<256x128xbf16>
    %c0_32 = arith.constant 0 : index
    %c256 = arith.constant 256 : index
    %28 = vector.load %arg7[%c0_32, %c256] : memref<256x1152xbf16, #tpu.memory_space<vmem>>, vector<256x128xbf16>
    tpu.vector_store %arg7[%c0_32, %c256], %27 {strides = array<i32>} : memref<256x1152xbf16, #tpu.memory_space<vmem>>, vector<256x128xbf16>,
    %c1_33 = arith.constant 1 : index
    %c7_34 = arith.constant 7 : index
    %c0_35 = arith.constant 0 : index
    %29 = vector.load %arg6[%c1_33, %c7_34, %c0_35] : memref<18x32x128xf32, #tpu.memory_space<vmem>>, vector<16x16x128xf32>
    %30 = vector.shape_cast %29 : vector<16x16x128xf32> to vector<256x128xf32>
    %31 = arith.truncf %30 : vector<256x128xf32> to vector<256x128xbf16>
    %c0_36 = arith.constant 0 : index
    %c384 = arith.constant 384 : index
    %32 = vector.load %arg7[%c0_36, %c384] : memref<256x1152xbf16, #tpu.memory_space<vmem>>, vector<256x128xbf16>
    tpu.vector_store %arg7[%c0_36, %c384], %31 {strides = array<i32>} : memref<256x1152xbf16, #tpu.memory_space<vmem>>, vector<256x128xbf16>,
    %c1_37 = arith.constant 1 : index
    %c8_38 = arith.constant 8 : index
    %c0_39 = arith.constant 0 : index
    %33 = vector.load %arg6[%c1_37, %c8_38, %c0_39] : memref<18x32x128xf32, #tpu.memory_space<vmem>>, vector<16x16x128xf32>
    %34 = vector.shape_cast %33 : vector<16x16x128xf32> to vector<256x128xf32>
    %35 = arith.truncf %34 : vector<256x128xf32> to vector<256x128xbf16>
    %c0_40 = arith.constant 0 : index
    %c512 = arith.constant 512 : index
    %36 = vector.load %arg7[%c0_40, %c512] : memref<256x1152xbf16, #tpu.memory_space<vmem>>, vector<256x128xbf16>
    tpu.vector_store %arg7[%c0_40, %c512], %35 {strides = array<i32>} : memref<256x1152xbf16, #tpu.memory_space<vmem>>, vector<256x128xbf16>,
    %c1_41 = arith.constant 1 : index
    %c9_42 = arith.constant 9 : index
    %c0_43 = arith.constant 0 : index
    %37 = vector.load %arg6[%c1_41, %c9_42, %c0_43] : memref<18x32x128xf32, #tpu.memory_space<vmem>>, vector<16x16x128xf32>
    %38 = vector.shape_cast %37 : vector<16x16x128xf32> to vector<256x128xf32>
    %39 = arith.truncf %38 : vector<256x128xf32> to vector<256x128xbf16>
    %c0_44 = arith.constant 0 : index
    %c640 = arith.constant 640 : index
    %40 = vector.load %arg7[%c0_44, %c640] : memref<256x1152xbf16, #tpu.memory_space<vmem>>, vector<256x128xbf16>
    tpu.vector_store %arg7[%c0_44, %c640], %39 {strides = array<i32>} : memref<256x1152xbf16, #tpu.memory_space<vmem>>, vector<256x128xbf16>,
    %c2 = arith.constant 2 : index
    %c7_45 = arith.constant 7 : index
    %c0_46 = arith.constant 0 : index
    %41 = vector.load %arg6[%c2, %c7_45, %c0_46] : memref<18x32x128xf32, #tpu.memory_space<vmem>>, vector<16x16x128xf32>
    %42 = vector.shape_cast %41 : vector<16x16x128xf32> to vector<256x128xf32>
    %43 = arith.truncf %42 : vector<256x128xf32> to vector<256x128xbf16>
    %c0_47 = arith.constant 0 : index
    %c768 = arith.constant 768 : index
    %44 = vector.load %arg7[%c0_47, %c768] : memref<256x1152xbf16, #tpu.memory_space<vmem>>, vector<256x128xbf16>
    tpu.vector_store %arg7[%c0_47, %c768], %43 {strides = array<i32>} : memref<256x1152xbf16, #tpu.memory_space<vmem>>, vector<256x128xbf16>,
    %c2_48 = arith.constant 2 : index
    %c8_49 = arith.constant 8 : index
    %c0_50 = arith.constant 0 : index
    %45 = vector.load %arg6[%c2_48, %c8_49, %c0_50] : memref<18x32x128xf32, #tpu.memory_space<vmem>>, vector<16x16x128xf32>
    %46 = vector.shape_cast %45 : vector<16x16x128xf32> to vector<256x128xf32>
    %47 = arith.truncf %46 : vector<256x128xf32> to vector<256x128xbf16>
    %c0_51 = arith.constant 0 : index
    %c896 = arith.constant 896 : index
    %48 = vector.load %arg7[%c0_51, %c896] : memref<256x1152xbf16, #tpu.memory_space<vmem>>, vector<256x128xbf16>
    tpu.vector_store %arg7[%c0_51, %c896], %47 {strides = array<i32>} : memref<256x1152xbf16, #tpu.memory_space<vmem>>, vector<256x128xbf16>,
    %c2_52 = arith.constant 2 : index
    %c9_53 = arith.constant 9 : index
    %c0_54 = arith.constant 0 : index
    %49 = vector.load %arg6[%c2_52, %c9_53, %c0_54] : memref<18x32x128xf32, #tpu.memory_space<vmem>>, vector<16x16x128xf32>
    %50 = vector.shape_cast %49 : vector<16x16x128xf32> to vector<256x128xf32>
    %51 = arith.truncf %50 : vector<256x128xf32> to vector<256x128xbf16>
    %c0_55 = arith.constant 0 : index
    %c1024 = arith.constant 1024 : index
    %52 = vector.load %arg7[%c0_55, %c1024] : memref<256x1152xbf16, #tpu.memory_space<vmem>>, vector<256x128xbf16>
    tpu.vector_store %arg7[%c0_55, %c1024], %51 {strides = array<i32>} : memref<256x1152xbf16, #tpu.memory_space<vmem>>, vector<256x128xbf16>,
    %c0_56 = arith.constant 0 : index
    %c0_57 = arith.constant 0 : index
    %53 = vector.load %arg7[%c0_56, %c0_57] : memref<256x1152xbf16, #tpu.memory_space<vmem>>, vector<256x1152xbf16>
    %c0_58 = arith.constant 0 : index
    %c0_59 = arith.constant 0 : index
    %54 = vector.load %arg2[%c0_58, %c0_59] : memref<1152x32xbf16, #tpu.memory_space<vmem>>, vector<1152x32xbf16>
    %cst_60 = arith.constant dense<0.000000e+00> : vector<256x32xf32>
    %55 = tpu.matmul %53, %54, %cst_60 {dimension_numbers = #tpu.dot_dimension_numbers<[1], [0], [0], [1], [0, 0, 1, 1], [], []>} : vector<256x1152xbf16>, vector<1152x32xbf16>, vector<256x32xf32> -> vector<256x32xf32>
    %cst_61 = arith.constant 0.000000e+00 : f32
    %56 = vector.broadcast %cst_61 : f32 to vector<256x32xf32>
    %57 = arith.maximumf %55, %56 : vector<256x32xf32>
    %58 = arith.truncf %57 : vector<256x32xf32> to vector<256x32xbf16>
    %c0_62 = arith.constant 0 : index
    %c0_63 = arith.constant 0 : index
    %59 = vector.load %arg3[%c0_62, %c0_63] : memref<32x128xbf16, #tpu.memory_space<vmem>>, vector<32x128xbf16>
    %cst_64 = arith.constant dense<0.000000e+00> : vector<256x128xf32>
    %60 = tpu.matmul %58, %59, %cst_64 {dimension_numbers = #tpu.dot_dimension_numbers<[1], [0], [0], [1], [0, 0, 1, 1], [], []>} : vector<256x32xbf16>, vector<32x128xbf16>, vector<256x128xf32> -> vector<256x128xf32>
    %c0_65 = arith.constant 0 : index
    %c0_66 = arith.constant 0 : index
    %c0_67 = arith.constant 0 : index
    %61 = vector.load %arg5[%c0_65, %c0_66, %c0_67] : memref<16x16x128xf32, #tpu.memory_space<vmem>>, vector<16x16x128xf32>
    %62 = vector.shape_cast %60 : vector<256x128xf32> to vector<16x16x128xf32>
    %63 = arith.addf %61, %62 : vector<16x16x128xf32>
    %c0_68 = arith.constant 0 : index
    %c0_69 = arith.constant 0 : index
    %c0_70 = arith.constant 0 : index
    %64 = vector.load %arg5[%c0_68, %c0_69, %c0_70] : memref<16x16x128xf32, #tpu.memory_space<vmem>>, vector<16x16x128xf32>
    tpu.vector_store %arg5[%c0_68, %c0_69, %c0_70], %63 {strides = array<i32>} : memref<16x16x128xf32, #tpu.memory_space<vmem>>, vector<16x16x128xf32>,
    %c0_71 = arith.constant 0 : index
    %c0_72 = arith.constant 0 : index
    %c0_73 = arith.constant 0 : index
    %65 = vector.load %arg5[%c0_71, %c0_72, %c0_73] : memref<16x16x128xf32, #tpu.memory_space<vmem>>, vector<16x16x128xf32>
    %cst_74 = arith.constant 0.000000e+00 : f32
    %66 = vector.broadcast %cst_74 : f32 to vector<16x16x128xf32>
    %67 = arith.maximumf %65, %66 : vector<16x16x128xf32>
    %c1_75 = arith.constant 1 : index
    %c8_76 = arith.constant 8 : index
    %c0_77 = arith.constant 0 : index
    %68 = vector.load %arg6[%c1_75, %c8_76, %c0_77] : memref<18x32x128xf32, #tpu.memory_space<vmem>>, vector<16x16x128xf32>
    tpu.vector_store %arg6[%c1_75, %c8_76, %c0_77], %67 {strides = array<i32>} : memref<18x32x128xf32, #tpu.memory_space<vmem>>, vector<16x16x128xf32>,
    %c0_78 = arith.constant 0 : index
    %c7_79 = arith.constant 7 : index
    %c0_80 = arith.constant 0 : index
    %69 = vector.load %arg6[%c0_78, %c7_79, %c0_80] : memref<18x32x128xf32, #tpu.memory_space<vmem>>, vector<16x16x128xf32>
    %70 = vector.shape_cast %69 : vector<16x16x128xf32> to vector<256x128xf32>
    %71 = arith.truncf %70 : vector<256x128xf32> to vector<256x128xbf16>
    %c0_81 = arith.constant 0 : index
    %c0_82 = arith.constant 0 : index
    %72 = vector.load %arg7[%c0_81, %c0_82] : memref<256x1152xbf16, #tpu.memory_space<vmem>>, vector<256x128xbf16>
    tpu.vector_store %arg7[%c0_81, %c0_82], %71 {strides = array<i32>} : memref<256x1152xbf16, #tpu.memory_space<vmem>>, vector<256x128xbf16>,
    %c0_83 = arith.constant 0 : index
    %c8_84 = arith.constant 8 : index
    %c0_85 = arith.constant 0 : index
    %73 = vector.load %arg6[%c0_83, %c8_84, %c0_85] : memref<18x32x128xf32, #tpu.memory_space<vmem>>, vector<16x16x128xf32>
    %74 = vector.shape_cast %73 : vector<16x16x128xf32> to vector<256x128xf32>
    %75 = arith.truncf %74 : vector<256x128xf32> to vector<256x128xbf16>
    %c0_86 = arith.constant 0 : index
    %c128_87 = arith.constant 128 : index
    %76 = vector.load %arg7[%c0_86, %c128_87] : memref<256x1152xbf16, #tpu.memory_space<vmem>>, vector<256x128xbf16>
    tpu.vector_store %arg7[%c0_86, %c128_87], %75 {strides = array<i32>} : memref<256x1152xbf16, #tpu.memory_space<vmem>>, vector<256x128xbf16>,
    %c0_88 = arith.constant 0 : index
    %c9_89 = arith.constant 9 : index
    %c0_90 = arith.constant 0 : index
    %77 = vector.load %arg6[%c0_88, %c9_89, %c0_90] : memref<18x32x128xf32, #tpu.memory_space<vmem>>, vector<16x16x128xf32>
    %78 = vector.shape_cast %77 : vector<16x16x128xf32> to vector<256x128xf32>
    %79 = arith.truncf %78 : vector<256x128xf32> to vector<256x128xbf16>
    %c0_91 = arith.constant 0 : index
    %c256_92 = arith.constant 256 : index
    %80 = vector.load %arg7[%c0_91, %c256_92] : memref<256x1152xbf16, #tpu.memory_space<vmem>>, vector<256x128xbf16>
    tpu.vector_store %arg7[%c0_91, %c256_92], %79 {strides = array<i32>} : memref<256x1152xbf16, #tpu.memory_space<vmem>>, vector<256x128xbf16>,
    %c1_93 = arith.constant 1 : index
    %c7_94 = arith.constant 7 : index
    %c0_95 = arith.constant 0 : index
    %81 = vector.load %arg6[%c1_93, %c7_94, %c0_95] : memref<18x32x128xf32, #tpu.memory_space<vmem>>, vector<16x16x128xf32>
    %82 = vector.shape_cast %81 : vector<16x16x128xf32> to vector<256x128xf32>
    %83 = arith.truncf %82 : vector<256x128xf32> to vector<256x128xbf16>
    %c0_96 = arith.constant 0 : index
    %c384_97 = arith.constant 384 : index
    %84 = vector.load %arg7[%c0_96, %c384_97] : memref<256x1152xbf16, #tpu.memory_space<vmem>>, vector<256x128xbf16>
    tpu.vector_store %arg7[%c0_96, %c384_97], %83 {strides = array<i32>} : memref<256x1152xbf16, #tpu.memory_space<vmem>>, vector<256x128xbf16>,
    %c1_98 = arith.constant 1 : index
    %c8_99 = arith.constant 8 : index
    %c0_100 = arith.constant 0 : index
    %85 = vector.load %arg6[%c1_98, %c8_99, %c0_100] : memref<18x32x128xf32, #tpu.memory_space<vmem>>, vector<16x16x128xf32>
    %86 = vector.shape_cast %85 : vector<16x16x128xf32> to vector<256x128xf32>
    %87 = arith.truncf %86 : vector<256x128xf32> to vector<256x128xbf16>
    %c0_101 = arith.constant 0 : index
    %c512_102 = arith.constant 512 : index
    %88 = vector.load %arg7[%c0_101, %c512_102] : memref<256x1152xbf16, #tpu.memory_space<vmem>>, vector<256x128xbf16>
    tpu.vector_store %arg7[%c0_101, %c512_102], %87 {strides = array<i32>} : memref<256x1152xbf16, #tpu.memory_space<vmem>>, vector<256x128xbf16>,
    %c1_103 = arith.constant 1 : index
    %c9_104 = arith.constant 9 : index
    %c0_105 = arith.constant 0 : index
    %89 = vector.load %arg6[%c1_103, %c9_104, %c0_105] : memref<18x32x128xf32, #tpu.memory_space<vmem>>, vector<16x16x128xf32>
    %90 = vector.shape_cast %89 : vector<16x16x128xf32> to vector<256x128xf32>
    %91 = arith.truncf %90 : vector<256x128xf32> to vector<256x128xbf16>
    %c0_106 = arith.constant 0 : index
    %c640_107 = arith.constant 640 : index
    %92 = vector.load %arg7[%c0_106, %c640_107] : memref<256x1152xbf16, #tpu.memory_space<vmem>>, vector<256x128xbf16>
    tpu.vector_store %arg7[%c0_106, %c640_107], %91 {strides = array<i32>} : memref<256x1152xbf16, #tpu.memory_space<vmem>>, vector<256x128xbf16>,
    %c2_108 = arith.constant 2 : index
    %c7_109 = arith.constant 7 : index
    %c0_110 = arith.constant 0 : index
    %93 = vector.load %arg6[%c2_108, %c7_109, %c0_110] : memref<18x32x128xf32, #tpu.memory_space<vmem>>, vector<16x16x128xf32>
    %94 = vector.shape_cast %93 : vector<16x16x128xf32> to vector<256x128xf32>
    %95 = arith.truncf %94 : vector<256x128xf32> to vector<256x128xbf16>
    %c0_111 = arith.constant 0 : index
    %c768_112 = arith.constant 768 : index
    %96 = vector.load %arg7[%c0_111, %c768_112] : memref<256x1152xbf16, #tpu.memory_space<vmem>>, vector<256x128xbf16>
    tpu.vector_store %arg7[%c0_111, %c768_112], %95 {strides = array<i32>} : memref<256x1152xbf16, #tpu.memory_space<vmem>>, vector<256x128xbf16>,
    %c2_113 = arith.constant 2 : index
    %c8_114 = arith.constant 8 : index
    %c0_115 = arith.constant 0 : index
    %97 = vector.load %arg6[%c2_113, %c8_114, %c0_115] : memref<18x32x128xf32, #tpu.memory_space<vmem>>, vector<16x16x128xf32>
    %98 = vector.shape_cast %97 : vector<16x16x128xf32> to vector<256x128xf32>
    %99 = arith.truncf %98 : vector<256x128xf32> to vector<256x128xbf16>
    %c0_116 = arith.constant 0 : index
    %c896_117 = arith.constant 896 : index
    %100 = vector.load %arg7[%c0_116, %c896_117] : memref<256x1152xbf16, #tpu.memory_space<vmem>>, vector<256x128xbf16>
    tpu.vector_store %arg7[%c0_116, %c896_117], %99 {strides = array<i32>} : memref<256x1152xbf16, #tpu.memory_space<vmem>>, vector<256x128xbf16>,
    %c2_118 = arith.constant 2 : index
    %c9_119 = arith.constant 9 : index
    %c0_120 = arith.constant 0 : index
    %101 = vector.load %arg6[%c2_118, %c9_119, %c0_120] : memref<18x32x128xf32, #tpu.memory_space<vmem>>, vector<16x16x128xf32>
    %102 = vector.shape_cast %101 : vector<16x16x128xf32> to vector<256x128xf32>
    %103 = arith.truncf %102 : vector<256x128xf32> to vector<256x128xbf16>
    %c0_121 = arith.constant 0 : index
    %c1024_122 = arith.constant 1024 : index
    %104 = vector.load %arg7[%c0_121, %c1024_122] : memref<256x1152xbf16, #tpu.memory_space<vmem>>, vector<256x128xbf16>
    tpu.vector_store %arg7[%c0_121, %c1024_122], %103 {strides = array<i32>} : memref<256x1152xbf16, #tpu.memory_space<vmem>>, vector<256x128xbf16>,
    %c0_123 = arith.constant 0 : index
    %c0_124 = arith.constant 0 : index
    %105 = vector.load %arg7[%c0_123, %c0_124] : memref<256x1152xbf16, #tpu.memory_space<vmem>>, vector<256x1152xbf16>
    %c0_125 = arith.constant 0 : index
    %c0_126 = arith.constant 0 : index
    %106 = vector.load %arg2[%c0_125, %c0_126] : memref<1152x32xbf16, #tpu.memory_space<vmem>>, vector<1152x32xbf16>
    %cst_127 = arith.constant dense<0.000000e+00> : vector<256x32xf32>
    %107 = tpu.matmul %105, %106, %cst_127 {dimension_numbers = #tpu.dot_dimension_numbers<[1], [0], [0], [1], [0, 0, 1, 1], [], []>} : vector<256x1152xbf16>, vector<1152x32xbf16>, vector<256x32xf32> -> vector<256x32xf32>
    %cst_128 = arith.constant 0.000000e+00 : f32
    %108 = vector.broadcast %cst_128 : f32 to vector<256x32xf32>
    %109 = arith.maximumf %107, %108 : vector<256x32xf32>
    %110 = arith.truncf %109 : vector<256x32xf32> to vector<256x32xbf16>
    %c0_129 = arith.constant 0 : index
    %c0_130 = arith.constant 0 : index
    %111 = vector.load %arg3[%c0_129, %c0_130] : memref<32x128xbf16, #tpu.memory_space<vmem>>, vector<32x128xbf16>
    %cst_131 = arith.constant dense<0.000000e+00> : vector<256x128xf32>
    %112 = tpu.matmul %110, %111, %cst_131 {dimension_numbers = #tpu.dot_dimension_numbers<[1], [0], [0], [1], [0, 0, 1, 1], [], []>} : vector<256x32xbf16>, vector<32x128xbf16>, vector<256x128xf32> -> vector<256x128xf32>
    %c0_132 = arith.constant 0 : index
    %c0_133 = arith.constant 0 : index
    %c0_134 = arith.constant 0 : index
    %113 = vector.load %arg5[%c0_132, %c0_133, %c0_134] : memref<16x16x128xf32, #tpu.memory_space<vmem>>, vector<16x16x128xf32>
    %114 = vector.shape_cast %112 : vector<256x128xf32> to vector<16x16x128xf32>
    %115 = arith.addf %113, %114 : vector<16x16x128xf32>
    %c0_135 = arith.constant 0 : index
    %c0_136 = arith.constant 0 : index
    %c0_137 = arith.constant 0 : index
    %116 = vector.load %arg5[%c0_135, %c0_136, %c0_137] : memref<16x16x128xf32, #tpu.memory_space<vmem>>, vector<16x16x128xf32>
    tpu.vector_store %arg5[%c0_135, %c0_136, %c0_137], %115 {strides = array<i32>} : memref<16x16x128xf32, #tpu.memory_space<vmem>>, vector<16x16x128xf32>,
    %c0_138 = arith.constant 0 : index
    %c0_139 = arith.constant 0 : index
    %c0_140 = arith.constant 0 : index
    %117 = vector.load %arg5[%c0_138, %c0_139, %c0_140] : memref<16x16x128xf32, #tpu.memory_space<vmem>>, vector<16x16x128xf32>
    %cst_141 = arith.constant 0.000000e+00 : f32
    %118 = vector.broadcast %cst_141 : f32 to vector<16x16x128xf32>
    %119 = arith.maximumf %117, %118 : vector<16x16x128xf32>
    %c0_142 = arith.constant 0 : index
    %c0_143 = arith.constant 0 : index
    %c0_144 = arith.constant 0 : index
    %c0_145 = arith.constant 0 : index
    %120 = vector.load %arg4[%c0_142, %c0_143, %c0_144, %c0_145] : memref<1x16x16x128xf32, #tpu.memory_space<vmem>>, vector<1x16x16x128xf32>
    %121 = vector.shape_cast %120 : vector<1x16x16x128xf32> to vector<16x16x128xf32>
    %122 = vector.shape_cast %119 : vector<16x16x128xf32> to vector<1x16x16x128xf32>
    tpu.vector_store %arg4[%c0_142, %c0_143, %c0_144, %c0_145], %122 {strides = array<i32>} : memref<1x16x16x128xf32, #tpu.memory_space<vmem>>, vector<1x16x16x128xf32>,
    return
  }
  func.func @transform_0(%arg0: i32) -> (i32, i32, i32, i32) {
    %c0_i32 = arith.constant 0 : i32
    %c0_i32_0 = arith.constant 0 : i32
    %c0_i32_1 = arith.constant 0 : i32
    %c0_i32_2 = arith.constant 0 : i32
    return %arg0, %c0_i32, %c0_i32_0, %c0_i32_1 : i32, i32, i32, i32
  }
  func.func @transform_1(%arg0: i32) -> (i32, i32) {
    %c0_i32 = arith.constant 0 : i32
    %c0_i32_0 = arith.constant 0 : i32
    %c0_i32_1 = arith.constant 0 : i32
    return %c0_i32, %c0_i32_0 : i32, i32
  }
  func.func @transform_2(%arg0: i32) -> (i32, i32) {
    %c0_i32 = arith.constant 0 : i32
    %c0_i32_0 = arith.constant 0 : i32
    %c0_i32_1 = arith.constant 0 : i32
    return %c0_i32, %c0_i32_0 : i32, i32
  }
  func.func @transform_3(%arg0: i32) -> (i32, i32, i32, i32) {
    %c0_i32 = arith.constant 0 : i32
    %c0_i32_0 = arith.constant 0 : i32
    %c0_i32_1 = arith.constant 0 : i32
    %c0_i32_2 = arith.constant 0 : i32
    return %arg0, %c0_i32, %c0_i32_0, %c0_i32_1 : i32, i32, i32, i32
  }
}

</mosaic_0001>

<bundles_post_ra>
// kernel: residual_stack_nchw.1
= control target key start
LH: loop header
LB: loop body
LE: loop exit
PB: predicated region body
PF: predicated region fallthrough
CT: control target
= control target key end

     0   :  { %8 = vsyncpa [#allocation6], 0  ;;  %s9057_s0 = inlined_call_operand.vmem [shape: f32[2,16,16,128], index: 0, kind: input, shape index: {}]   ;;  %s9058_s1 = inlined_call_operand.vmem [shape: bf16[1152,32], index: 1, kind: input, shape index: {}]   ;;  %s9059_s2 = inlined_call_operand.vmem [shape: bf16[32,128], index: 2, kind: input, shape index: {}]   ;;  %s9060_s3 = inlined_call_operand.hbm [shape: f32[2,16,16,128], index: 3, kind: output, shape index: {}]  }
   0x1   :  { %10 = vsyncpa [#allocation6 + $0x1], 0  ;;  %s7242_s12 = smov 0   ;;  %s7244_s13 = smov 0  }
   0x2   :  { %s7246_s14 = smov 0   ;;  %s7248_s15 = smov 0  }
   0x3 LB: > { %s7263_s16 = sadd.s32 4294967295, %s7215_s15   ;;  %s5586_s17 = sadd.s32 4294967294, %s7215_s15   ;;  %s7215_s15 = sphi %s7248_s15, %s9145_s15   ;;  %s7211_s14 = sphi %s7246_s14, %s9144_s14   ;;  %s7207_s13 = sphi %s7244_s13, %s9143_s13   ;;  %s7203_s12 = sphi %s7242_s12, %s9142_s12  }
   0x4   : > { %s7267_s18 = sadd.s32 1, %s7215_s15   ;;  %s91_s19 = sadd.s32 1, %s7211_s14 }
   0x5   : > { %s88_s20 = ssub.s32 %s7215_s15, %s7267_s18  ;;  %p101_p0 = scmp.ne.s32.totalorder %s7211_s14, %s7207_s13 }
   0x6   : > { %p89_p1 = scmp.eq.s32.totalorder %s88_s20, 0  ;;  %p102_p2 = scmp.eq.s32.totalorder %s7263_s16, 1 }
   0x7   : > { %p107_p3 = scmp.ne.s32.totalorder %s7207_s13, %s7203_s12  ;;  %p108_p4 = scmp.eq.s32.totalorder %s5586_s17, 1 }
   0x8   : > { %s7278_s21 = scalar_select %p89_p1, %s7211_s14, %s91_s19  }
   0x9   : > { %p7280_p5 = por %p102_p2, %p101_p0  ;;  %p7284_p6 = por %p108_p4, %p107_p3 }
   0xa   : > { %p5589_p7 = scmp.ge.s32.totalorder %s7215_s15, 1  ;;  %p140_p8 = scmp.lt.s32.totalorder %s7215_s15, 3 }
   0xc   : > { %p141_p9 = pnand %p5589_p7, %p140_p8 }
   0xe   : > { %144 = sbr.rel (%p141_p9) target bundleno = 1522 (0x5f2), region = 32 }
  0x15   : > { %v6970_v0 = vld [vmem:[%s9058_s1 + $0x40] sm:$0xff]   ;;  %v7217_v2 = vmov 0.0   ;;  %v7218_v5 = vmov 0.0|0.0   ;;  %v6974_v6 = vld [vmem:[%s9058_s1 + $0x48] sm:$0xff]   ;;  %v6978_v10 = vld [vmem:[%s9058_s1 + $0x50] sm:$0xff]   ;;  %p164_p10 = scmp.lt.s32.totalorder %s7263_s16, 1 }
  0x16   : > { %v6971_v1 = vld [vmem:[%s9058_s1 + $0xc0] sm:$0xff]   ;;  %171 = vst [vmem:[#allocation3 + $0x8] sm:$0xff] %v7217_v2  ;;  %172 = vst [vmem:[#allocation3 + $0x10] sm:$0xff] %v7217_v2  ;;  %5780 = vmatprep.subr.bf16.mxu0 %v6970_v0  ;;  %1705 = vmatprep.mubr.bf16.mxu0 %v7218_v5  ;;  %v6975_v7 = vld [vmem:[%s9058_s1 + $0xc8] sm:$0xff]   ;;  %vm2542_vm0 = vcmask 261120   ;;  %s5779_s6 = sshll.u32 %s7263_s16, 12 }
  0x17   : > { %176 = vst [vmem:[#allocation3 + $0x228] sm:$0xff] %v7217_v2  ;;  %177 = vst [vmem:[#allocation3 + $0x230] sm:$0xff] %v7217_v2  ;;  %v6972_v3 = vld [vmem:[%s9058_s1] sm:$0xff]   ;;  %5892 = vmatprep.subr.bf16.mxu1 %v6971_v1  ;;  %v6976_v8 = vld [vmem:[%s9058_s1 + $0x8] sm:$0xff]   ;;  %s165_s7 = scalar_select %p164_p10, %s7263_s16, 1 }
  0x18   : > { %180 = vst [vmem:[#allocation3 + $0x20] sm:$0xff] %v7217_v2  ;;  %181 = vst [vmem:[#allocation3 + $0x40] sm:$0xff] %v7217_v2  ;;  %v6973_v4 = vld [vmem:[%s9058_s1 + $0x80] sm:$0xff]   ;;  %5781 = vmatpush3.bf16.msra.mxu0 %v6972_v3  ;;  %v6977_v9 = vld [vmem:[%s9058_s1 + $0x88] sm:$0xff]   ;;  %s9007_s11 = scalar_lea.hbm %s9060_s3, %s5779_s6  ;;  %s7219_s19 = smov [#allocation5]  }
  0x19   : > { %182 = vst [vmem:[#allocation3 + $0x60] sm:$0xff] %v7217_v2  ;;  %183 = vst [vmem:[#allocation3 + $0x80] sm:$0xff] %v7217_v2  ;;  %5893 = vmatpush3.bf16.msra.mxu1 %v6973_v4  ;;  %5782 = vmatprep.subr.bf16.mxu0 %v6974_v6  ;;  %v6979_v11 = vld [vmem:[%s9058_s1 + $0xd0] sm:$0xff]   ;;  %v6982_v14 = vld [vmem:[%s9058_s1 + $0x58] sm:$0xff]   ;;  %s5778_s25 = sshll.u32 %s165_s7, 8  ;;  %s7157_s20 = sshll.u32 %s7219_s19, 4  ;;  %s7158_s20 = int_to_ptr.vmem [resolvable:$false] %s7157_s20 }
  0x1a   : > { %184 = vst [vmem:[#allocation3 + $0xa0] sm:$0xff] %v7217_v2  ;;  %185 = vst [vmem:[#allocation3 + $0xc0] sm:$0xff] %v7217_v2  ;;  %5894 = vmatprep.subr.bf16.mxu1 %v6975_v7  ;;  %v6980_v12 = vld [vmem:[%s9058_s1 + $0x10] sm:$0xff]   ;;  %v6983_v15 = vld [vmem:[%s9058_s1 + $0xd8] sm:$0xff]   ;;  %s7385_s8 = scalar_lea.vmem %s9057_s0, %s5778_s25  ;;  %s7159_s24 = scalar_lea.vmem %s7158_s20, 8192 }
  0x1b   : > { %186 = vst [vmem:[#allocation3 + $0xe0] sm:$0xff] %v7217_v2  ;;  %187 = vst [vmem:[#allocation3 + $0x100] sm:$0xff] %v7217_v2  ;;  %v6981_v13 = vld [vmem:[%s9058_s1 + $0x90] sm:$0xff]   ;;  %v6984_v16 = vld [vmem:[%s9058_s1 + $0x18] sm:$0xff]  }
  0x1c   : > { %188 = vst [vmem:[#allocation3 + $0x120] sm:$0xff] %v7217_v2  ;;  %189 = vst [vmem:[#allocation3 + $0x140] sm:$0xff] %v7217_v2  ;;  %5783 = vmatpush3.bf16.msra.mxu0 %v6976_v8  ;;  %v6985_v17 = vld [vmem:[%s9058_s1 + $0x98] sm:$0xff]   ;;  %v6986_v18 = vld [vmem:[%s9058_s1 + $0x60] sm:$0xff]  }
  0x1d   : > { %190 = vst [vmem:[#allocation3 + $0x160] sm:$0xff] %v7217_v2  ;;  %191 = vst [vmem:[#allocation3 + $0x180] sm:$0xff] %v7217_v2  ;;  %5895 = vmatpush3.bf16.msra.mxu1 %v6977_v9  ;;  %5784 = vmatprep.subr.bf16.mxu0 %v6978_v10  ;;  %v6987_v19 = vld [vmem:[%s9058_s1 + $0xe0] sm:$0xff]   ;;  %v6990_v22 = vld [vmem:[%s9058_s1 + $0x68] sm:$0xff]  }
  0x1e   : > { %192 = vst [vmem:[#allocation3 + $0x1a0] sm:$0xff] %v7217_v2  ;;  %193 = vst [vmem:[#allocation3 + $0x1c0] sm:$0xff] %v7217_v2  ;;  %5896 = vmatprep.subr.bf16.mxu1 %v6979_v11  ;;  %v6988_v20 = vld [vmem:[%s9058_s1 + $0x20] sm:$0xff]   ;;  %v6991_v23 = vld [vmem:[%s9058_s1 + $0xe8] sm:$0xff]  }
  0x1f   : > { %194 = vst [vmem:[#allocation3 + $0x1e0] sm:$0xff] %v7217_v2  ;;  %195 = vst [vmem:[#allocation3 + $0x200] sm:$0xff] %v7217_v2  ;;  %v6989_v21 = vld [vmem:[%s9058_s1 + $0xa0] sm:$0xff]   ;;  %v6992_v24 = vld [vmem:[%s9058_s1 + $0x28] sm:$0xff]  }
  0x20   : > { %198 = vst [vmem:[#allocation3 + $0x38] sm:$0xff] %v7217_v2  ;;  %199 = vst [vmem:[#allocation3 + $0x58] sm:$0xff] %v7217_v2  ;;  %5785 = vmatpush3.bf16.msra.mxu0 %v6980_v12  ;;  %v6993_v25 = vld [vmem:[%s9058_s1 + $0xa8] sm:$0xff]   ;;  %v6994_v26 = vld [vmem:[%s9058_s1 + $0x70] sm:$0xff]  }
  0x21   : > { %200 = vst [vmem:[#allocation3 + $0x78] sm:$0xff] %v7217_v2  ;;  %201 = vst [vmem:[#allocation3 + $0x98] sm:$0xff] %v7217_v2  ;;  %5897 = vmatpush3.bf16.msra.mxu1 %v6981_v13  ;;  %5786 = vmatprep.subr.bf16.mxu0 %v6982_v14  ;;  %v6995_v27 = vld [vmem:[%s9058_s1 + $0xf0] sm:$0xff]   ;;  %v6998_v30 = vld [vmem:[%s9058_s1 + $0x78] sm:$0xff]  }
  0x22   : > { %202 = vst [vmem:[#allocation3 + $0xb8] sm:$0xff] %v7217_v2  ;;  %203 = vst [vmem:[#allocation3 + $0xd8] sm:$0xff] %v7217_v2  ;;  %5898 = vmatprep.subr.bf16.mxu1 %v6983_v15  ;;  %v6996_v28 = vld [vmem:[%s9058_s1 + $0x30] sm:$0xff]   ;;  %v6999_v31 = vld [vmem:[%s9058_s1 + $0xf8] sm:$0xff]  }
  0x23   : > { %204 = vst [vmem:[#allocation3 + $0xf8] sm:$0xff] %v7217_v2  ;;  %205 = vst [vmem:[#allocation3 + $0x118] sm:$0xff] %v7217_v2  ;;  %v6997_v29 = vld [vmem:[%s9058_s1 + $0xb0] sm:$0xff]   ;;  %v7000_v32 = vld [vmem:[%s9058_s1 + $0x38] sm:$0xff]  }
  0x24   : > { %206 = vst [vmem:[#allocation3 + $0x138] sm:$0xff] %v7217_v2  ;;  %207 = vst [vmem:[#allocation3 + $0x158] sm:$0xff] %v7217_v2  ;;  %5787 = vmatpush3.bf16.msra.mxu0 %v6984_v16  ;;  %v7001_v33 = vld [vmem:[%s9058_s1 + $0xb8] sm:$0xff]   ;;  %v215_v34 = vld [vmem:[%s7385_s8] sm:$0xff] }
  0x25   : > { %208 = vst [vmem:[#allocation3 + $0x178] sm:$0xff] %v7217_v2  ;;  %209 = vst [vmem:[#allocation3 + $0x198] sm:$0xff] %v7217_v2  ;;  %5899 = vmatpush3.bf16.msra.mxu1 %v6985_v17  ;;  %5788 = vmatprep.subr.bf16.mxu0 %v6986_v18  ;;  %v216_v35 = vld [vmem:[%s7385_s8 + $0x8] sm:$0xff]  ;;  %v311_v37 = vmax.f32 %v215_v34, 0.0  ;;  %v7002_v41 = vld [vmem:[%s9058_s1 + $0x140] sm:$0xff]  }
  0x26   : > { %210 = vst [vmem:[#allocation3 + $0x1b8] sm:$0xff] %v7217_v2  ;;  %211 = vst [vmem:[#allocation3 + $0x1d8] sm:$0xff] %v7217_v2  ;;  %5900 = vmatprep.subr.bf16.mxu1 %v6987_v19  ;;  %v312_v38 = vmax.f32 %v216_v35, 0.0  ;;  %v377_v39 = vld [vmem:[#allocation3 + $0xf] sm:$0xff]  ;;  %v7003_v42 = vld [vmem:[%s9058_s1 + $0x100] sm:$0xff]  }
  0x27   : > { %212 = vst [vmem:[#allocation3 + $0x1f8] sm:$0xff] %v7217_v2  ;;  %213 = vst [vmem:[#allocation3 + $0x218] sm:$0xff] %v7217_v2  ;;  %v217_v44 = vld [vmem:[%s7385_s8 + $0x10] sm:$0xff]  ;;  %v218_v45 = vld [vmem:[%s7385_s8 + $0x18] sm:$0xff] }
  0x28   : > { %179 = vst [vmem:[#allocation3] sm:$0xff] %v7217_v2  ;;  %196 = vst [vmem:[#allocation3 + $0x220] sm:$0xff] %v7217_v2  ;;  %5789 = vmatpush3.bf16.msra.mxu0 %v6988_v20  ;;  %v7401_v43 = vpack.c.bf16 %v312_v38, %v311_v37  ;;  %v7406_v46 = vld [vmem:[%s7385_s8 + $0x20] sm:$0xff]  ;;  %v504_v47 = vld [vmem:[#allocation3 + $0x9] sm:$0xff]  ;;  %v313_v49 = vmax.f32 %v217_v44, 0.0  ;;  %v314_v50 = vmax.f32 %v218_v45, 0.0 }
  0x29   : > { %197 = vst [vmem:[#allocation3 + $0x18] sm:$0xff] %v7217_v2  ;;  %214 = vst [vmem:[#allocation3 + $0x238] sm:$0xff] %v7217_v2  ;;  %5901 = vmatpush3.bf16.msra.mxu1 %v6989_v21  ;;  %5790 = vmatprep.subr.bf16.mxu0 %v6990_v22  ;;  %v220_v51 = vld [vmem:[%s7385_s8 + $0x28] sm:$0xff]  ;;  %v315_v52 = vmax.f32 %v7406_v46, 0.0  ;;  %v7418_v56 = vld [vmem:[%s7385_s8 + $0x30] sm:$0xff] }
  0x2a   : > { %5902 = vmatprep.subr.bf16.mxu1 %v6991_v23  ;;  %344 = vst [vmem:[#allocation3 + $0x28] sm:$0xff] %v311_v37  ;;  %345 = vst [vmem:[#allocation3 + $0x30] sm:$0xff] %v312_v38  ;;  %v316_v53 = vmax.f32 %v220_v51, 0.0  ;;  %v7004_v54 = vld [vmem:[%s9058_s1 + $0x148] sm:$0xff]   ;;  %v7421_v57 = vld [vmem:[%s7385_s8 + $0x38] sm:$0xff]  ;;  %v317_v58 = vmax.f32 %v7418_v56, 0.0  ;;  %v7436_v4 = vpack.c.bf16 %v314_v50, %v313_v49 }
  0x2b   : > { %346 = vst [vmem:[#allocation3 + $0x48] sm:$0xff] %v313_v49  ;;  %347 = vst [vmem:[#allocation3 + $0x50] sm:$0xff] %v314_v50  ;;  %v7005_v55 = vld [vmem:[%s9058_s1 + $0x108] sm:$0xff]   ;;  %v7425_v59 = vld [vmem:[%s7385_s8 + $0x40] sm:$0xff]  ;;  %v318_v61 = vmax.f32 %v7421_v57, 0.0 }
  0x2c   : > { %5791 = vmatpush3.bf16.msra.mxu0 %v6992_v24  ;;  %348 = vst [vmem:[#allocation3 + $0x68] sm:$0xff] %v315_v52  ;;  %349 = vst [vmem:[#allocation3 + $0x70] sm:$0xff] %v316_v53  ;;  %v7428_v60 = vld [vmem:[%s7385_s8 + $0x48] sm:$0xff]  ;;  %v319_v62 = vmax.f32 %v7425_v59, 0.0  ;;  %v7006_v0 = vld [vmem:[%s9058_s1 + $0x150] sm:$0xff]   ;;  %v7482_v24 = vpack.c.bf16 %v316_v53, %v315_v52 }
  0x2d   : > { %5903 = vmatpush3.bf16.msra.mxu1 %v6993_v25  ;;  %5792 = vmatprep.subr.bf16.mxu0 %v6994_v26  ;;  %v320_v63 = vmax.f32 %v7428_v60, 0.0  ;;  %350 = vst [vmem:[#allocation3 + $0x88] sm:$0xff] %v317_v58  ;;  %351 = vst [vmem:[#allocation3 + $0x90] sm:$0xff] %v318_v61  ;;  %v7007_v6 = vld [vmem:[%s9058_s1 + $0x110] sm:$0xff]   ;;  %v7453_v8 = vld [vmem:[%s7385_s8 + $0x58] sm:$0xff] }
  0x2e   : > { %5904 = vmatprep.subr.bf16.mxu1 %v6995_v27  ;;  %352 = vst [vmem:[#allocation3 + $0xa8] sm:$0xff] %v319_v62  ;;  %v7450_v7 = vld [vmem:[%s7385_s8 + $0x50] sm:$0xff]  ;;  %v7457_v10 = vld [vmem:[%s7385_s8 + $0x60] sm:$0xff]  ;;  %v7460_v11 = vld [vmem:[%s7385_s8 + $0x68] sm:$0xff]  ;;  %v322_v14 = vmax.f32 %v7453_v8, 0.0 }
  0x2f   : > { %v376_v36 = vld [vmem:[#allocation3 + $0x7] sm:$0xff]  ;;  %353 = vst [vmem:[#allocation3 + $0xb0] sm:$0xff] %v320_v63  ;;  %v321_v9 = vmax.f32 %v7450_v7, 0.0  ;;  %v323_v15 = vmax.f32 %v7457_v10, 0.0  ;;  %v324_v16 = vmax.f32 %v7460_v11, 0.0  ;;  %v7008_v22 = vld [vmem:[%s9058_s1 + $0x158] sm:$0xff]  }
  0x30   : > { %5793 = vmatpush3.bf16.msra.mxu0 %v6996_v28  ;;  %v408_v40 = vpack.c.bf16 %v377_v39, %v376_v36  ;;  %v505_v48 = vld [vmem:[#allocation3 + $0x11] sm:$0xff]  ;;  %355 = vst [vmem:[#allocation3 + $0xd0] sm:$0xff] %v322_v14  ;;  %v7011_v44 = vld [vmem:[%s9058_s1 + $0x120] sm:$0xff]   ;;  %v7545_v50 = vld [vmem:[%s7385_s8 + $0xa8] sm:$0xff] }
  0x31   : > { %5905 = vmatpush3.bf16.msra.mxu1 %v6997_v29  ;;  %5794 = vmatprep.subr.bf16.mxu0 %v6998_v30  ;;  %v568_v1 = vld [vmem:[#allocation3 + $0x27] sm:$0xff]  ;;  %v569_v2 = vld [vmem:[#allocation3 + $0x2f] sm:$0xff]  ;;  %v536_v3 = vpack.c.bf16 %v505_v48, %v504_v47  ;;  %354 = vst [vmem:[#allocation3 + $0xc8] sm:$0xff] %v321_v9  ;;  %356 = vst [vmem:[#allocation3 + $0xe8] sm:$0xff] %v323_v15  ;;  %v332_v52 = vmax.f32 %v7545_v50, 0.0 }
  0x32   : > { %5906 = vmatprep.subr.bf16.mxu1 %v6999_v31  ;;  %v600_v5 = vpack.c.bf16 %v569_v2, %v568_v1  ;;  %v570_v12 = vld [vmem:[#allocation3 + $0x47] sm:$0xff]  ;;  %v571_v13 = vld [vmem:[#allocation3 + $0x4f] sm:$0xff]  ;;  %357 = vst [vmem:[#allocation3 + $0xf0] sm:$0xff] %v324_v16  ;;  %v7009_v26 = vld [vmem:[%s9058_s1 + $0x118] sm:$0xff]  }
  0x33   : > { %v7466_v17 = vpack.c.bf16 %v571_v13, %v570_v12  ;;  %v506_v18 = vld [vmem:[#allocation3 + $0x29] sm:$0xff]  ;;  %v507_v19 = vld [vmem:[#allocation3 + $0x31] sm:$0xff]  ;;  %v7501_v31 = vld [vmem:[%s7385_s8 + $0x80] sm:$0xff]  ;;  %365 = vst [vmem:[#allocation3 + $0x170] sm:$0xff] %v332_v52 }
  0x34   : > { %5795 = vmatpush3.bf16.msra.mxu0 %v7000_v32  ;;  %1866 = vmatprep.mubr.bf16.mxu1 %v600_v5  ;;  %v572_v20 = vld [vmem:[#allocation3 + $0x67] sm:$0xff]  ;;  %v573_v21 = vld [vmem:[#allocation3 + $0x6f] sm:$0xff]  ;;  %v7480_v23 = vpack.c.bf16 %v507_v19, %v506_v18  ;;  %v7494_v28 = vld [vmem:[%s7385_s8 + $0x78] sm:$0xff]  ;;  %v327_v35 = vmax.f32 %v7501_v31, 0.0 }
  0x35   : > { %5907 = vmatpush3.bf16.msra.mxu1 %v7001_v33  ;;  %6004 = vmatprep.subr.bf16.mxu0 %v7002_v41  ;;  %v7484_v25 = vpack.c.bf16 %v573_v21, %v572_v20  ;;  %v7491_v27 = vld [vmem:[%s7385_s8 + $0x70] sm:$0xff]  ;;  %v326_v30 = vmax.f32 %v7494_v28, 0.0  ;;  %v7504_v32 = vld [vmem:[%s7385_s8 + $0x88] sm:$0xff]  ;;  %v7010_v41 = vld [vmem:[%s9058_s1 + $0x160] sm:$0xff]  }
  0x36   : > { %v325_v29 = vmax.f32 %v7491_v27, 0.0  ;;  %v508_v33 = vld [vmem:[#allocation3 + $0x49] sm:$0xff]  ;;  %v509_v34 = vld [vmem:[#allocation3 + $0x51] sm:$0xff]  ;;  %v328_v36 = vmax.f32 %v7504_v32, 0.0  ;;  %360 = vst [vmem:[#allocation3 + $0x128] sm:$0xff] %v327_v35  ;;  %v7542_v49 = vld [vmem:[%s7385_s8 + $0xa0] sm:$0xff] }
  0x37   : > { %1706 = vmatmul.mubr.bf16.vlgmr.msra.gmra.mrb[0].mxu0 %v408_v40  ;;  %v574_v37 = vld [vmem:[#allocation3 + $0x87] sm:$0xff]  ;;  %v575_v38 = vld [vmem:[#allocation3 + $0x8f] sm:$0xff]  ;;  %359 = vst [vmem:[#allocation3 + $0x110] sm:$0xff] %v326_v30  ;;  %v7517_v39 = vpack.c.bf16 %v509_v34, %v508_v33  ;;  %v7523_v40 = vpack.c.bf16 %v318_v61, %v317_v58  ;;  %v7537_v46 = vld [vmem:[%s7385_s8 + $0x98] sm:$0xff]  ;;  %v331_v51 = vmax.f32 %v7542_v49, 0.0 }
  0x38   : > { %6005 = vmatpush3.bf16.msra.mxu0 %v7003_v42  ;;  %1713 = vmatprep.mubr.bf16.mxu0 %v7401_v43  ;;  %358 = vst [vmem:[#allocation3 + $0x108] sm:$0xff] %v325_v29  ;;  %361 = vst [vmem:[#allocation3 + $0x130] sm:$0xff] %v328_v36  ;;  %v7528_v42 = vpack.c.bf16 %v575_v38, %v574_v37  ;;  %v7534_v45 = vld [vmem:[%s7385_s8 + $0x90] sm:$0xff]  ;;  %v330_v48 = vmax.f32 %v7537_v46, 0.0  ;;  %v7012_v53 = vld [vmem:[%s9058_s1 + $0x168] sm:$0xff]   ;;  %v7615_v37 = vpack.c.bf16 %v322_v14, %v321_v9 }
  0x39   : > { %6006 = vmatprep.subr.bf16.mxu0 %v7004_v54  ;;  %1867 = vmatmul.mubr.bf16.vlgmr.msra.gmra.mrb[0].mxu1 %v536_v3  ;;  %v329_v47 = vmax.f32 %v7534_v45, 0.0  ;;  %v7560_v54 = vld [vmem:[%s7385_s8 + $0xb0] sm:$0xff]  ;;  %364 = vst [vmem:[#allocation3 + $0x168] sm:$0xff] %v331_v51  ;;  %v7013_v57 = vld [vmem:[%s9058_s1 + $0x128] sm:$0xff]   ;;  %v7572_v1 = vld [vmem:[%s7385_s8 + $0xb8] sm:$0xff]  ;;  %v7582_v3 = vpack.c.bf16 %v320_v63, %v319_v62  ;;  %v7767_v45 = vpack.c.bf16 %v332_v52, %v331_v51 }
  0x3a   : > { %1874 = vmatprep.mubr.bf16.mxu1 %v7466_v17  ;;  %363 = vst [vmem:[#allocation3 + $0x150] sm:$0xff] %v330_v48  ;;  %v511_v56 = vld [vmem:[#allocation3 + $0x71] sm:$0xff]  ;;  %v333_v58 = vmax.f32 %v7560_v54, 0.0  ;;  %v576_v61 = vld [vmem:[#allocation3 + $0xa7] sm:$0xff] }
  0x3b   : > { %362 = vst [vmem:[#allocation3 + $0x148] sm:$0xff] %v329_v47  ;;  %v240_v12 = vld [vmem:[%s7385_s8 + $0xc8] sm:$0xff]  ;;  %v7014_v20 = vld [vmem:[%s9058_s1 + $0x170] sm:$0xff]   ;;  %v7017_v33 = vld [vmem:[%s9058_s1 + $0x180] sm:$0xff]  }
  0x3c   : > { %6007 = vmatpush3.bf16.msra.mxu0 %v7005_v55  ;;  %v510_v55 = vld [vmem:[#allocation3 + $0x69] sm:$0xff]  ;;  %366 = vst [vmem:[#allocation3 + $0x188] sm:$0xff] %v333_v58  ;;  %v336_v19 = vmax.f32 %v240_v12, 0.0  ;;  %v513_v63 = vld [vmem:[#allocation3 + $0x91] sm:$0xff]  ;;  %v243_v12 = vld [vmem:[%s7385_s8 + $0xe0] sm:$0xff] }
  0x3d   : > { %6008 = vmatprep.subr.bf16.mxu0 %v7006_v0  ;;  %v577_v0 = vld [vmem:[#allocation3 + $0xaf] sm:$0xff]  ;;  %v7576_v2 = vpack.c.bf16 %v511_v56, %v510_v55  ;;  %v578_v21 = vld [vmem:[#allocation3 + $0xc7] sm:$0xff]  ;;  %v7627_v55 = vld [vmem:[%s7385_s8 + $0xd8] sm:$0xff] }
  0x3e   : > { %v7587_v13 = vpack.c.bf16 %v577_v0, %v576_v61  ;;  %v7015_v59 = vld [vmem:[%s9058_s1 + $0x130] sm:$0xff]   ;;  %369 = vst [vmem:[#allocation3 + $0x1b0] sm:$0xff] %v336_v19  ;;  %v7018_v38 = vld [vmem:[%s9058_s1 + $0x1c8] sm:$0xff]   ;;  %v338_v9 = vmax.f32 %v7627_v55, 0.0  ;;  %v7024_v10 = vld [vmem:[%s9058_s1 + $0x178] sm:$0xff]  }
  0x3f   : > { %1714 = vmatmul.mubr.bf16.gmra.mrb[4].mxu0 %v600_v5  ;;  %v334_v5 = vmax.f32 %v7572_v1, 0.0  ;;  %v512_v62 = vld [vmem:[#allocation3 + $0x89] sm:$0xff]  ;;  %v515_v8 = vld [vmem:[#allocation3 + $0xb1] sm:$0xff] }
  0x40   : > { %1721 = vmatprep.mubr.bf16.mxu0 %v7436_v4  ;;  %6009 = vmatpush3.bf16.msra.mxu0 %v7007_v6  ;;  %v239_v6 = vld [vmem:[%s7385_s8 + $0xc0] sm:$0xff]  ;;  %v7609_v34 = vpack.c.bf16 %v513_v63, %v512_v62  ;;  %v514_v7 = vld [vmem:[#allocation3 + $0xa9] sm:$0xff]  ;;  %371 = vst [vmem:[#allocation3 + $0x1d0] sm:$0xff] %v338_v9  ;;  %v519_v28 = vld [vmem:[#allocation3 + $0xf1] sm:$0xff] }
  0x41   : > { %6010 = vmatprep.subr.bf16.mxu0 %v7008_v22  ;;  %1875 = vmatmul.mubr.bf16.gmra.mrb[4].mxu1 %v7480_v23  ;;  %v335_v18 = vmax.f32 %v239_v6, 0.0  ;;  %367 = vst [vmem:[#allocation3 + $0x190] sm:$0xff] %v334_v5  ;;  %v579_v22 = vld [vmem:[#allocation3 + $0xcf] sm:$0xff]  ;;  %v580_v56 = vld [vmem:[#allocation3 + $0xe7] sm:$0xff]  ;;  %v7022_v6 = vld [vmem:[%s9058_s1 + $0x1d8] sm:$0xff]   ;;  %v7781_v49 = vpack.c.bf16 %v334_v5, %v333_v58 }
  0x42   : > { %1882 = vmatprep.mubr.bf16.mxu1 %v7484_v25  ;;  %v7019_v14 = vld [vmem:[%s9058_s1 + $0x188] sm:$0xff]   ;;  %v7020_v61 = vld [vmem:[%s9058_s1 + $0x1d0] sm:$0xff]  }
  0x43   : > { %368 = vst [vmem:[#allocation3 + $0x1a8] sm:$0xff] %v335_v18  ;;  %v7598_v60 = vpack.c.bf16 %v336_v19, %v335_v18  ;;  %v7021_v0 = vld [vmem:[%s9058_s1 + $0x190] sm:$0xff]   ;;  %v7651_v18 = vpack.c.bf16 %v515_v8, %v514_v7  ;;  %v7657_v19 = vpack.c.bf16 %v324_v16, %v323_v15  ;;  %v7025_v15 = vld [vmem:[%s9058_s1 + $0x138] sm:$0xff]   ;;  %v7027_v7 = vld [vmem:[%s9058_s1 + $0x1a0] sm:$0xff]  }
  0x44   : > { %6011 = vmatpush3.bf16.msra.mxu0 %v7009_v26  ;;  %v7016_v26 = vld [vmem:[%s9058_s1 + $0x1c0] sm:$0xff]   ;;  %v516_v11 = vld [vmem:[#allocation3 + $0xc9] sm:$0xff]  ;;  %v527_v52 = vld [vmem:[#allocation3 + $0x171] sm:$0xff] }
  0x45   : > { %6012 = vmatprep.subr.bf16.mxu0 %v7010_v41  ;;  %6116 = vmatprep.subr.bf16.mxu1 %v7016_v26  ;;  %v7621_v41 = vld [vmem:[%s7385_s8 + $0xd0] sm:$0xff]  ;;  %v582_v26 = vld [vmem:[#allocation3 + $0x107] sm:$0xff] }
  0x46   : > { %6117 = vmatpush3.bf16.msra.mxu1 %v7017_v33  ;;  %v583_v33 = vld [vmem:[#allocation3 + $0x10f] sm:$0xff]  ;;  %v586_v31 = vld [vmem:[#allocation3 + $0x147] sm:$0xff] }
  0x47   : > { %1722 = vmatmul.mubr.bf16.gmra.mrb[8].mxu0 %v7466_v17  ;;  %6118 = vmatprep.subr.bf16.mxu1 %v7018_v38  ;;  %v7026_v38 = vld [vmem:[%s9058_s1 + $0x1e0] sm:$0xff]   ;;  %v7028_v8 = vld [vmem:[%s9058_s1 + $0x1e8] sm:$0xff]   ;;  %v533_v55 = vld [vmem:[#allocation3 + $0x1d1] sm:$0xff] }
  0x48   : > { %1729 = vmatprep.mubr.bf16.mxu0 %v7482_v24  ;;  %6013 = vmatpush3.bf16.msra.mxu0 %v7011_v44  ;;  %v7623_v44 = vpack.c.bf16 %v579_v22, %v578_v21  ;;  %v7023_v21 = vld [vmem:[%s9058_s1 + $0x198] sm:$0xff]   ;;  %v518_v27 = vld [vmem:[#allocation3 + $0xe9] sm:$0xff] }
  0x49   : > { %1883 = vmatmul.mubr.bf16.gmra.mrb[8].mxu1 %v7517_v39  ;;  %6014 = vmatprep.subr.bf16.mxu0 %v7012_v53  ;;  %v337_v53 = vmax.f32 %v7621_v41, 0.0  ;;  %v517_v22 = vld [vmem:[#allocation3 + $0xd1] sm:$0xff]  ;;  %v526_v51 = vld [vmem:[#allocation3 + $0x169] sm:$0xff] }
  0x4a   : > { %1890 = vmatprep.mubr.bf16.mxu1 %v7528_v42  ;;  %6119 = vmatpush3.bf16.msra.mxu1 %v7019_v14  ;;  %v7687_v14 = vld [vmem:[%s7385_s8 + $0xf0] sm:$0xff] }
  0x4b   : > { %370 = vst [vmem:[#allocation3 + $0x1c8] sm:$0xff] %v337_v53  ;;  %6120 = vmatprep.subr.bf16.mxu1 %v7020_v61  ;;  %v7698_v61 = vld [vmem:[%s7385_s8 + $0xf8] sm:$0xff]  ;;  %v587_v32 = vld [vmem:[#allocation3 + $0x14f] sm:$0xff] }
  0x4c   : > { %6015 = vmatpush3.bf16.msra.mxu0 %v7013_v57  ;;  %v581_v57 = vld [vmem:[#allocation3 + $0xef] sm:$0xff] }
  0x4d   : > { %6016 = vmatprep.subr.bf16.mxu0 %v7014_v20  ;;  %v244_v20 = vld [vmem:[%s7385_s8 + $0xe8] sm:$0xff]  ;;  %v7660_v62 = vpack.c.bf16 %v581_v57, %v580_v56  ;;  %v7689_v56 = vpack.c.bf16 %v517_v22, %v516_v11  ;;  %v7695_v57 = vpack.c.bf16 %v326_v30, %v325_v29  ;;  %v7030_v29 = vld [vmem:[%s9058_s1 + $0x1f0] sm:$0xff]   ;;  %v7729_v11 = vpack.c.bf16 %v519_v28, %v518_v27 }
  0x4e   : > { %6121 = vmatpush3.bf16.msra.mxu1 %v7021_v0  ;;  %v340_v63 = vmax.f32 %v244_v20, 0.0  ;;  %v341_v0 = vmax.f32 %v7687_v14, 0.0  ;;  %v7029_v20 = vld [vmem:[%s9058_s1 + $0x1a8] sm:$0xff]   ;;  %v529_v1 = vld [vmem:[#allocation3 + $0x191] sm:$0xff] }
  0x4f   : > { %1730 = vmatmul.mubr.bf16.gmra.mrb[12].mxu0 %v7484_v25  ;;  %6122 = vmatprep.subr.bf16.mxu1 %v7022_v6  ;;  %v7701_v6 = vpack.c.bf16 %v583_v33, %v582_v26  ;;  %v584_v30 = vld [vmem:[#allocation3 + $0x127] sm:$0xff]  ;;  %v7033_v26 = vld [vmem:[%s9058_s1 + $0x1b8] sm:$0xff]   ;;  %v589_v28 = vld [vmem:[#allocation3 + $0x16f] sm:$0xff] }
  0x50   : > { %1737 = vmatprep.mubr.bf16.mxu0 %v7523_v40  ;;  %6017 = vmatpush3.bf16.msra.mxu0 %v7015_v59  ;;  %v339_v59 = vmax.f32 %v243_v12, 0.0  ;;  %373 = vst [vmem:[#allocation3 + $0x1f0] sm:$0xff] %v340_v63  ;;  %v342_v12 = vmax.f32 %v7698_v61, 0.0  ;;  %374 = vst [vmem:[#allocation3 + $0x208] sm:$0xff] %v341_v0  ;;  %v520_v33 = vld [vmem:[#allocation3 + $0x109] sm:$0xff] }
  0x51   : > { %1891 = vmatmul.mubr.bf16.gmra.mrb[12].mxu1 %v7576_v2  ;;  %6018 = vmatprep.subr.bf16.mxu0 %v7024_v10  ;;  %v7727_v10 = vld [vmem:[%s9058_s1 + $0x200] sm:$0xff]   ;;  %v528_v58 = vld [vmem:[#allocation3 + $0x189] sm:$0xff] }
  0x52   : > { %1898 = vmatprep.mubr.bf16.mxu1 %v7587_v13  ;;  %372 = vst [vmem:[#allocation3 + $0x1e8] sm:$0xff] %v339_v59  ;;  %v7672_v16 = vpack.c.bf16 %v340_v63, %v339_v59  ;;  %6123 = vmatpush3.bf16.msra.mxu1 %v7023_v21  ;;  %375 = vst [vmem:[#allocation3 + $0x210] sm:$0xff] %v342_v12  ;;  %v585_v59 = vld [vmem:[#allocation3 + $0x12f] sm:$0xff]  ;;  %v7032_v21 = vld [vmem:[%s9058_s1 + $0x1f8] sm:$0xff]  }
  0x53   : > { %6124 = vmatprep.subr.bf16.mxu1 %v7026_v38  ;;  %v7031_v63 = vld [vmem:[%s9058_s1 + $0x1b0] sm:$0xff]   ;;  %v7737_v22 = vpack.c.bf16 %v585_v59, %v584_v30  ;;  %v588_v27 = vld [vmem:[#allocation3 + $0x167] sm:$0xff] }
  0x54   : > { %6019 = vmatpush3.bf16.msra.mxu0 %v7025_v15  ;;  %v7735_v15 = vpack.c.bf16 %v328_v36, %v327_v35  ;;  %v521_v38 = vld [vmem:[#allocation3 + $0x111] sm:$0xff]  ;;  %v7753_v36 = vpack.c.bf16 %v330_v48, %v329_v47  ;;  %v7769_v46 = vpack.c.bf16 %v589_v28, %v588_v27  ;;  %v524_v47 = vld [vmem:[#allocation3 + $0x149] sm:$0xff] }
  0x55   : > { %6760 = vmatprep.subr.bf16.mxu0 %v7727_v10  ;;  %v7747_v35 = vpack.c.bf16 %v521_v38, %v520_v33  ;;  %v525_v48 = vld [vmem:[#allocation3 + $0x151] sm:$0xff]  ;;  %v590_v30 = vld [vmem:[#allocation3 + $0x187] sm:$0xff]  ;;  %v7789_v33 = vpack.c.bf16 %v527_v52, %v526_v51 }
  0x56   : > { %6125 = vmatpush3.bf16.msra.mxu1 %v7027_v7  ;;  %v7755_v7 = vpack.c.bf16 %v587_v32, %v586_v31  ;;  %v591_v59 = vld [vmem:[#allocation3 + $0x18f] sm:$0xff]  ;;  %v594_v5 = vld [vmem:[#allocation3 + $0x1c7] sm:$0xff]  ;;  %v7797_v31 = vpack.c.bf16 %v529_v1, %v528_v58  ;;  %v7803_v32 = vpack.c.bf16 %v338_v9, %v337_v53  ;;  %v7037_v1 = vld [vmem:[%s9058_s1 + $0x218] sm:$0xff]  }
  0x57   : > { %1738 = vmatmul.mubr.bf16.gmra.mrb[16].mxu0 %v7528_v42  ;;  %6126 = vmatprep.subr.bf16.mxu1 %v7028_v8  ;;  %v522_v8 = vld [vmem:[#allocation3 + $0x129] sm:$0xff]  ;;  %v7783_v50 = vpack.c.bf16 %v591_v59, %v590_v30  ;;  %v531_v27 = vld [vmem:[#allocation3 + $0x1b1] sm:$0xff] }
  0x58   : > { %1745 = vmatprep.mubr.bf16.mxu0 %v7582_v3  ;;  %v595_v38 = vld [vmem:[#allocation3 + $0x1cf] sm:$0xff]  ;;  %v598_v9 = vld [vmem:[#allocation3 + $0x207] sm:$0xff] }
  0x59   : > { %1899 = vmatmul.mubr.bf16.gmra.mrb[16].mxu1 %v7609_v34  ;;  %v596_v28 = vld [vmem:[#allocation3 + $0x1e7] sm:$0xff]  ;;  %v599_v30 = vld [vmem:[#allocation3 + $0x20f] sm:$0xff] }
  0x5a   : > { %1906 = vmatprep.mubr.bf16.mxu1 %v7623_v44  ;;  %6127 = vmatpush3.bf16.msra.mxu1 %v7029_v20  ;;  %v523_v20 = vld [vmem:[#allocation3 + $0x131] sm:$0xff]  ;;  %v532_v53 = vld [vmem:[#allocation3 + $0x1c9] sm:$0xff]  ;;  %v7821_v51 = vpack.c.bf16 %v599_v30, %v598_v9 }
  0x5b   : > { %6128 = vmatprep.subr.bf16.mxu1 %v7030_v29  ;;  %v7761_v29 = vpack.c.bf16 %v523_v20, %v522_v8  ;;  %v7805_v8 = vpack.c.bf16 %v595_v38, %v594_v5  ;;  %v530_v20 = vld [vmem:[#allocation3 + $0x1a9] sm:$0xff]  ;;  %v7819_v59 = vpack.c.bf16 %v533_v55, %v532_v53 }
  0x5c   : > { %v534_v52 = vld [vmem:[#allocation3 + $0x1e9] sm:$0xff] }
  0x5d   : > { %v7035_v58 = vld [vmem:[%s9058_s1 + $0x208] sm:$0xff]  }
  0x5e   : > { %6129 = vmatpush3.bf16.msra.mxu1 %v7031_v63  ;;  %v7775_v63 = vpack.c.bf16 %v525_v48, %v524_v47  ;;  %v597_v47 = vld [vmem:[#allocation3 + $0x1ef] sm:$0xff]  ;;  %v7811_v48 = vpack.c.bf16 %v531_v27, %v530_v20 }
  0x5f   : > { %1746 = vmatmul.mubr.bf16.gmra.mrb[20].mxu0 %v7587_v13  ;;  %6130 = vmatprep.subr.bf16.mxu1 %v7032_v21  ;;  %v592_v21 = vld [vmem:[#allocation3 + $0x1a7] sm:$0xff]  ;;  %v7813_v41 = vpack.c.bf16 %v597_v47, %v596_v28  ;;  %v727_v20 = vld [vmem:[#allocation3 + $0x211] sm:$0xff] }
  0x60   : > { %1753 = vmatprep.mubr.bf16.mxu0 %v7615_v37 }
  0x61   : > { %1907 = vmatmul.mubr.bf16.gmra.mrb[20].mxu1 %v7651_v18 }
  0x62   : > { %1914 = vmatprep.mubr.bf16.mxu1 %v7660_v62  ;;  %6131 = vmatpush3.bf16.msra.mxu1 %v7033_v26  ;;  %v593_v26 = vld [vmem:[#allocation3 + $0x1af] sm:$0xff] }
  0x63   : > { %v7791_v54 = vpack.c.bf16 %v593_v26, %v592_v21  ;;  %v535_v21 = vld [vmem:[#allocation3 + $0x1f1] sm:$0xff] }
  0x64   : > { %v7827_v26 = vpack.c.bf16 %v535_v21, %v534_v52  ;;  %v871_v52 = vpack.c.bf16 %v342_v12, %v341_v0 }
  0x67   : > { %1754 = vmatmul.mubr.bf16.gmra.mrb[24].mxu0 %v7623_v44 }
  0x68   : > { %1761 = vmatprep.mubr.bf16.mxu0 %v7657_v19 }
  0x69   : > { %1915 = vmatmul.mubr.bf16.gmra.mrb[24].mxu1 %v7689_v56 }
  0x6a   : > { %1922 = vmatprep.mubr.bf16.mxu1 %v7701_v6 }
  0x6f   : > { %1762 = vmatmul.mubr.bf16.gmra.mrb[28].mxu0 %v7660_v62 }
  0x70   : > { %1769 = vmatprep.mubr.bf16.mxu0 %v7695_v57 }
  0x71   : > { %1923 = vmatmul.mubr.bf16.gmra.mrb[28].mxu1 %v7729_v11 }
  0x72   : > { %1930 = vmatprep.mubr.bf16.mxu1 %v7737_v22 }
  0x77   : > { %1770 = vmatmul.mubr.bf16.gmra.mrb[32].mxu0 %v7701_v6 }
  0x78   : > { %1777 = vmatprep.mubr.bf16.mxu0 %v7735_v15 }
  0x79   : > { %1931 = vmatmul.mubr.bf16.gmra.mrb[32].mxu1 %v7747_v35 }
  0x7a   : > { %1938 = vmatprep.mubr.bf16.mxu1 %v7755_v7 }
  0x7f   : > { %1778 = vmatmul.mubr.bf16.gmra.mrb[36].mxu0 %v7737_v22 }
  0x80   : > { %1785 = vmatprep.mubr.bf16.mxu0 %v7753_v36 }
  0x81   : > { %1939 = vmatmul.mubr.bf16.gmra.mrb[36].mxu1 %v7761_v29 }
  0x82   : > { %1946 = vmatprep.mubr.bf16.mxu1 %v7769_v46 }
  0x87   : > { %1786 = vmatmul.mubr.bf16.gmra.mrb[40].mxu0 %v7755_v7 }
  0x88   : > { %1793 = vmatprep.mubr.bf16.mxu0 %v7767_v45 }
  0x89   : > { %1947 = vmatmul.mubr.bf16.gmra.mrb[40].mxu1 %v7775_v63 }
  0x8a   : > { %1954 = vmatprep.mubr.bf16.mxu1 %v7783_v50 }
  0x8f   : > { %1794 = vmatmul.mubr.bf16.gmra.mrb[44].mxu0 %v7769_v46 }
  0x90   : > { %1801 = vmatprep.mubr.bf16.mxu0 %v7781_v49 }
  0x91   : > { %1955 = vmatmul.mubr.bf16.gmra.mrb[44].mxu1 %v7789_v33 }
  0x92   : > { %1962 = vmatprep.mubr.bf16.mxu1 %v7791_v54 }
  0x97   : > { %1802 = vmatmul.mubr.bf16.gmra.mrb[48].mxu0 %v7783_v50 }
  0x98   : > { %1809 = vmatprep.mubr.bf16.mxu0 %v7598_v60 }
  0x99   : > { %1963 = vmatmul.mubr.bf16.gmra.mrb[48].mxu1 %v7797_v31 }
  0x9a   : > { %1970 = vmatprep.mubr.bf16.mxu1 %v7805_v8 }
  0x9f   : > { %1810 = vmatmul.mubr.bf16.gmra.mrb[52].mxu0 %v7791_v54 }
  0xa0   : > { %1817 = vmatprep.mubr.bf16.mxu0 %v7803_v32 }
  0xa1   : > { %1971 = vmatmul.mubr.bf16.gmra.mrb[52].mxu1 %v7811_v48 }
  0xa2   : > { %1978 = vmatprep.mubr.bf16.mxu1 %v7813_v41 }
  0xa7   : > { %1818 = vmatmul.mubr.bf16.gmra.mrb[56].mxu0 %v7805_v8 }
  0xa8   : > { %1825 = vmatprep.mubr.bf16.mxu0 %v7672_v16 }
  0xa9   : > { %1979 = vmatmul.mubr.bf16.gmra.mrb[56].mxu1 %v7819_v59 }
  0xaa   : > { %1986 = vmatprep.mubr.bf16.mxu1 %v7821_v51 }
  0xaf   : > { %1826 = vmatmul.mubr.bf16.gmra.mrb[60].mxu0 %v7813_v41 }
  0xb0   : > { %2027 = vmatprep.mubr.bf16.mxu0 %v7480_v23  ;;  %v7036_v23 = vld [vmem:[%s9058_s1 + $0x210] sm:$0xff]  }
  0xb1   : > { %1987 = vmatmul.mubr.bf16.gmra.mrb[60].mxu1 %v7827_v26 }
  0xb2   : > { %2188 = vmatprep.mubr.bf16.mxu1 %v7436_v4 }
  0xb7   : > { %2028 = vmatmul.mubr.bf16.vlgmr.msra.gmra.mrb[64].mxu0 %v7401_v43  ;;  %v7038_v43 = vld [vmem:[%s9058_s1 + $0x220] sm:$0xff]  }
  0xb8   : > { %6761 = vmatpush3.bf16.msra.mxu0 %v7727_v10  ;;  %2035 = vmatprep.mubr.bf16.mxu0 %v7517_v39  ;;  %v7039_v39 = vld [vmem:[%s9058_s1 + $0x228] sm:$0xff]  }
  0xb9   : > { %6762 = vmatprep.subr.bf16.mxu0 %v7035_v58  ;;  %2189 = vmatmul.mubr.bf16.vlgmr.msra.gmra.mrb[64].mxu1 %v7466_v17  ;;  %v7041_v17 = vld [vmem:[%s9058_s1 + $0x238] sm:$0xff]  }
  0xba   : > { %2196 = vmatprep.mubr.bf16.mxu1 %v7482_v24 }
  0xbc   : > { %6763 = vmatpush3.bf16.msra.mxu0 %v7035_v58 }
  0xbd   : > { %6764 = vmatprep.subr.bf16.mxu0 %v7036_v23 }
  0xbf   : > { %2036 = vmatmul.mubr.bf16.gmra.mrb[68].mxu0 %v7436_v4  ;;  %v7040_v4 = vld [vmem:[%s9058_s1 + $0x230] sm:$0xff]  }
  0xc0   : > { %2043 = vmatprep.mubr.bf16.mxu0 %v7576_v2  ;;  %6765 = vmatpush3.bf16.msra.mxu0 %v7036_v23 }
  0xc1   : > { %6766 = vmatprep.subr.bf16.mxu0 %v7037_v1  ;;  %2197 = vmatmul.mubr.bf16.gmra.mrb[68].mxu1 %v7484_v25 }
  0xc2   : > { %2204 = vmatprep.mubr.bf16.mxu1 %v7523_v40 }
  0xc4   : > { %6767 = vmatpush3.bf16.msra.mxu0 %v7037_v1 }
  0xc5   : > { %6768 = vmatprep.subr.bf16.mxu0 %v7038_v43 }
  0xc7   : > { %2044 = vmatmul.mubr.bf16.gmra.mrb[72].mxu0 %v7482_v24 }
  0xc8   : > { %2051 = vmatprep.mubr.bf16.mxu0 %v7609_v34  ;;  %6769 = vmatpush3.bf16.msra.mxu0 %v7038_v43  ;;  %v889_v43 = vld [vmem:[#allocation3 + $0x49] sm:$0xff] }
  0xc9   : > { %6770 = vmatprep.subr.bf16.mxu0 %v7039_v39  ;;  %2205 = vmatmul.mubr.bf16.gmra.mrb[72].mxu1 %v7528_v42 }
  0xca   : > { %2212 = vmatprep.mubr.bf16.mxu1 %v7582_v3 }
  0xcc   : > { %6771 = vmatpush3.bf16.msra.mxu0 %v7039_v39  ;;  %v890_v39 = vld [vmem:[#allocation3 + $0x51] sm:$0xff] }
  0xcd   : > { %6772 = vmatprep.subr.bf16.mxu0 %v7040_v4 }
  0xcf   : > { %2052 = vmatmul.mubr.bf16.gmra.mrb[76].mxu0 %v7523_v40 }
  0xd0   : > { %2059 = vmatprep.mubr.bf16.mxu0 %v7651_v18  ;;  %6773 = vmatpush3.bf16.msra.mxu0 %v7040_v4 }
  0xd1   : > { %6774 = vmatprep.subr.bf16.mxu0 %v7041_v17  ;;  %2213 = vmatmul.mubr.bf16.gmra.mrb[76].mxu1 %v7587_v13 }
  0xd2   : > { %2220 = vmatprep.mubr.bf16.mxu1 %v7615_v37 }
  0xd4   : > { %6775 = vmatpush3.bf16.msra.mxu0 %v7041_v17 }
  0xd7   : > { %2060 = vmatmul.mubr.bf16.gmra.mrb[80].mxu0 %v7582_v3 }
  0xd8   : > { %2067 = vmatprep.mubr.bf16.mxu0 %v7689_v56 }
  0xd9   : > { %2221 = vmatmul.mubr.bf16.gmra.mrb[80].mxu1 %v7623_v44 }
  0xda   : > { %2228 = vmatprep.mubr.bf16.mxu1 %v7657_v19 }
  0xdf   : > { %2068 = vmatmul.mubr.bf16.gmra.mrb[84].mxu0 %v7615_v37 }
  0xe0   : > { %2075 = vmatprep.mubr.bf16.mxu0 %v7729_v11 }
  0xe1   : > { %2229 = vmatmul.mubr.bf16.gmra.mrb[84].mxu1 %v7660_v62 }
  0xe2   : > { %2236 = vmatprep.mubr.bf16.mxu1 %v7695_v57 }
  0xe7   : > { %2076 = vmatmul.mubr.bf16.gmra.mrb[88].mxu0 %v7657_v19 }
  0xe8   : > { %2083 = vmatprep.mubr.bf16.mxu0 %v7747_v35 }
  0xe9   : > { %2237 = vmatmul.mubr.bf16.gmra.mrb[88].mxu1 %v7701_v6 }
  0xea   : > { %2244 = vmatprep.mubr.bf16.mxu1 %v7735_v15 }
  0xef   : > { %2084 = vmatmul.mubr.bf16.gmra.mrb[92].mxu0 %v7695_v57 }
  0xf0   : > { %2091 = vmatprep.mubr.bf16.mxu0 %v7761_v29 }
  0xf1   : > { %2245 = vmatmul.mubr.bf16.gmra.mrb[92].mxu1 %v7737_v22 }
  0xf2   : > { %2252 = vmatprep.mubr.bf16.mxu1 %v7753_v36 }
  0xf7   : > { %2092 = vmatmul.mubr.bf16.gmra.mrb[96].mxu0 %v7735_v15 }
  0xf8   : > { %2099 = vmatprep.mubr.bf16.mxu0 %v7775_v63 }
  0xf9   : > { %2253 = vmatmul.mubr.bf16.gmra.mrb[96].mxu1 %v7755_v7 }
  0xfa   : > { %2260 = vmatprep.mubr.bf16.mxu1 %v7767_v45 }
  0xff   : > { %2100 = vmatmul.mubr.bf16.gmra.mrb[100].mxu0 %v7753_v36 }
 0x100   : > { %2107 = vmatprep.mubr.bf16.mxu0 %v7789_v33 }
 0x101   : > { %2261 = vmatmul.mubr.bf16.gmra.mrb[100].mxu1 %v7769_v46 }
 0x102   : > { %2268 = vmatprep.mubr.bf16.mxu1 %v7781_v49 }
 0x107   : > { %2108 = vmatmul.mubr.bf16.gmra.mrb[104].mxu0 %v7767_v45 }
 0x108   : > { %2115 = vmatprep.mubr.bf16.mxu0 %v7797_v31  ;;  %v726_v31 = vld [vmem:[#allocation3 + $0x209] sm:$0xff] }
 0x109   : > { %2269 = vmatmul.mubr.bf16.gmra.mrb[104].mxu1 %v7783_v50  ;;  %v7918_v9 = vpack.c.bf16 %v727_v20, %v726_v31  ;;  %v895_v31 = vld [vmem:[#allocation3 + $0xa9] sm:$0xff]  ;;  %v896_v20 = vld [vmem:[#allocation3 + $0xb1] sm:$0xff] }
 0x10a   : > { %v5796_v24 = vpop.f32.mrb[0].mxu0  ;;  %2276 = vmatprep.mubr.bf16.mxu1 %v7598_v60 }
 0x10b   : > { %v5797_v25 = vpop.f32.mrb[1].mxu0 }
 0x10c   : > { %v5798_v40 = vadd.f32 %v5797_v25, %v5796_v24  ;;  %v5799_v42 = vpop.f32.mrb[2].mxu0  ;;  %v5908_v34 = vpop.f32.mrb[0].mxu1  ;;  %v921_v25 = vpack.c.bf16 %v890_v39, %v889_v43 }
 0x10d   : > { %v5800_v2 = vpop.f32.mrb[3].mxu0  ;;  %v5909_v44 = vpop.f32.mrb[1].mxu1 }
 0x10e   : > { %v5801_v3 = vadd.f32 %v5800_v2, %v5799_v42  ;;  %v5910_v62 = vadd.f32 %v5909_v44, %v5908_v34  ;;  %v5911_v56 = vpop.f32.mrb[2].mxu1  ;;  %v7118_v2 = vld [vmem:[#allocation3 + $0x8] sm:$0xff] }
 0x10f   : > { %2116 = vmatmul.mubr.bf16.gmra.mrb[108].mxu0 %v7781_v49  ;;  %v5912_v6 = vpop.f32.mrb[3].mxu1  ;;  %v791_v44 = vld [vmem:[#allocation3 + $0x227] sm:$0xff] }
 0x110   : > { %2123 = vmatprep.mubr.bf16.mxu0 %v7811_v48  ;;  %v5913_v11 = vadd.f32 %v5912_v6, %v5911_v56  ;;  %v7900_v15 = vadd.f32 %v5910_v62, %v5798_v40  ;;  %v792_v62 = vld [vmem:[#allocation3 + $0x22f] sm:$0xff] }
 0x111   : > { %2277 = vmatmul.mubr.bf16.gmra.mrb[108].mxu1 %v7791_v54  ;;  %v893_v56 = vld [vmem:[#allocation3 + $0x89] sm:$0xff] }
 0x112   : > { %v5802_v13 = vpop.f32.mrb[4].mxu0  ;;  %2284 = vmatprep.mubr.bf16.mxu1 %v7803_v32  ;;  %v7905_v22 = vadd.f32 %v5913_v11, %v5801_v3  ;;  %v872_v3 = vpack.c.bf16 %v7118_v2, %v7118_v2 }
 0x113   : > { %v5803_v37 = vpop.f32.mrb[5].mxu0 }
 0x114   : > { %v5804_v18 = vadd.f32 %v5803_v37, %v5802_v13  ;;  %v5805_v19 = vpop.f32.mrb[6].mxu0  ;;  %v5914_v36 = vpop.f32.mrb[4].mxu1 }
 0x115   : > { %v5806_v57 = vpop.f32.mrb[7].mxu0  ;;  %v5915_v29 = vpop.f32.mrb[5].mxu1 }
 0x116   : > { %v5807_v10 = vadd.f32 %v5806_v57, %v5805_v19  ;;  %v5916_v63 = vadd.f32 %v5915_v29, %v5914_v36  ;;  %v5917_v49 = vpop.f32.mrb[6].mxu1  ;;  %v892_v19 = vld [vmem:[#allocation3 + $0x71] sm:$0xff]  ;;  %v808_v29 = vpack.c.bf16 %v792_v62, %v791_v44 }
 0x117   : > { %2124 = vmatmul.mubr.bf16.gmra.mrb[112].mxu0 %v7598_v60  ;;  %v7042_v60 = vld [vmem:[%s9059_s2] sm:$0xff]   ;;  %v5918_v33 = vpop.f32.mrb[7].mxu1  ;;  %v894_v57 = vld [vmem:[#allocation3 + $0x91] sm:$0xff] }
 0x118   : > { %2131 = vmatprep.mubr.bf16.mxu0 %v7819_v59  ;;  %v5919_v5 = vadd.f32 %v5918_v33, %v5917_v49  ;;  %v7911_v38 = vadd.f32 %v5916_v63, %v5804_v18  ;;  %6808 = vmatprep.subr.bf16.mxu1 %v7042_v60  ;;  %v891_v18 = vld [vmem:[#allocation3 + $0x69] sm:$0xff]  ;;  %v923_v63 = vpack.c.bf16 %v894_v57, %v893_v56 }
 0x119   : > { %2285 = vmatmul.mubr.bf16.gmra.mrb[112].mxu1 %v7805_v8  ;;  %v922_v36 = vpack.c.bf16 %v892_v19, %v891_v18 }
 0x11a   : > { %v5808_v35 = vpop.f32.mrb[8].mxu0  ;;  %2292 = vmatprep.mubr.bf16.mxu1 %v7672_v16  ;;  %v7916_v27 = vadd.f32 %v5919_v5, %v5807_v10  ;;  %6809 = vmatpush3.bf16.msra.mxu1 %v7042_v60 }
 0x11b   : > { %v5809_v7 = vpop.f32.mrb[9].mxu0 }
 0x11c   : > { %v5810_v45 = vadd.f32 %v5809_v7, %v5808_v35  ;;  %v5811_v46 = vpop.f32.mrb[10].mxu0  ;;  %v5920_v47 = vpop.f32.mrb[8].mxu1 }
 0x11d   : > { %v5812_v50 = vpop.f32.mrb[11].mxu0  ;;  %v5921_v53 = vpop.f32.mrb[9].mxu1 }
 0x11e   : > { %v5813_v54 = vadd.f32 %v5812_v50, %v5811_v46  ;;  %v5922_v30 = vadd.f32 %v5921_v53, %v5920_v47  ;;  %v5923_v59 = vpop.f32.mrb[10].mxu1  ;;  %v898_v47 = vld [vmem:[#allocation3 + $0xd1] sm:$0xff] }
 0x11f   : > { %2132 = vmatmul.mubr.bf16.gmra.mrb[116].mxu0 %v7803_v32  ;;  %v5924_v21 = vpop.f32.mrb[11].mxu1 }
 0x120   : > { %2139 = vmatprep.mubr.bf16.mxu0 %v7827_v26  ;;  %v5925_v23 = vadd.f32 %v5924_v21, %v5923_v59  ;;  %v7925_v1 = vadd.f32 %v5922_v30, %v5810_v45  ;;  %v924_v30 = vpack.c.bf16 %v896_v20, %v895_v31 }
 0x121   : > { %2293 = vmatmul.mubr.bf16.gmra.mrb[116].mxu1 %v7813_v41 }
 0x122   : > { %v5814_v28 = vpop.f32.mrb[12].mxu0  ;;  %2300 = vmatprep.mubr.bf16.mxu1 %v871_v52  ;;  %v7929_v4 = vadd.f32 %v5925_v23, %v5813_v54 }
 0x123   : > { %v5815_v48 = vpop.f32.mrb[13].mxu0 }
 0x124   : > { %v5816_v55 = vadd.f32 %v5815_v48, %v5814_v28  ;;  %v5817_v32 = vpop.f32.mrb[14].mxu0  ;;  %v5926_v17 = vpop.f32.mrb[12].mxu1  ;;  %v897_v28 = vld [vmem:[#allocation3 + $0xc9] sm:$0xff] }
 0x125   : > { %v5818_v8 = vpop.f32.mrb[15].mxu0  ;;  %v5927_v0 = vpop.f32.mrb[13].mxu1  ;;  %v925_v21 = vpack.c.bf16 %v898_v47, %v897_v28 }
 0x126   : > { %v5819_v58 = vadd.f32 %v5818_v8, %v5817_v32  ;;  %v5928_v40 = vadd.f32 %v5927_v0, %v5926_v17  ;;  %v899_v0 = vld [vmem:[#allocation3 + $0xe9] sm:$0xff] }
 0x127   : > { %2140 = vmatmul.mubr.bf16.gmra.mrb[120].mxu0 %v7672_v16  ;;  %v5929_v16 = vpop.f32.mrb[14].mxu1 }
 0x128   : > { %2147 = vmatprep.mubr.bf16.mxu0 %v7918_v9  ;;  %v5930_v41 = vpop.f32.mrb[15].mxu1  ;;  %v7931_v37 = vadd.f32 %v5928_v40, %v5816_v55 }
 0x129   : > { %v5931_v34 = vadd.f32 %v5930_v41, %v5929_v16  ;;  %2301 = vmatmul.mubr.bf16.gmra.mrb[120].mxu1 %v7821_v51 }
 0x12a   : > { %v5820_v14 = vpop.f32.mrb[16].mxu0  ;;  %2308 = vmatprep.mubr.bf16.mxu1 %v872_v3 }
 0x12b   : > { %v5821_v61 = vpop.f32.mrb[17].mxu0  ;;  %v7934_v6 = vadd.f32 %v5931_v34, %v5819_v58 }
 0x12c   : > { %v5822_v12 = vadd.f32 %v5821_v61, %v5820_v14  ;;  %v5823_v24 = vpop.f32.mrb[18].mxu0  ;;  %v5932_v11 = vpop.f32.mrb[16].mxu1 }
 0x12d   : > { %v5824_v42 = vpop.f32.mrb[19].mxu0  ;;  %v5933_v7 = vpop.f32.mrb[17].mxu1 }
 0x12e   : > { %v5825_v13 = vadd.f32 %v5824_v42, %v5823_v24  ;;  %v5934_v51 = vadd.f32 %v5933_v7, %v5932_v11  ;;  %v5935_v49 = vpop.f32.mrb[18].mxu1  ;;  %v901_v24 = vld [vmem:[#allocation3 + $0x109] sm:$0xff] }
 0x12f   : > { %2148 = vmatmul.mubr.bf16.gmra.mrb[124].mxu0 %v871_v52  ;;  %v5936_v60 = vpop.f32.mrb[19].mxu1  ;;  %v905_v7 = vld [vmem:[#allocation3 + $0x149] sm:$0xff] }
 0x130   : > { %6776 = vmatprep.mubr.bf16.mxu0 %v921_v25  ;;  %v5937_v54 = vadd.f32 %v5936_v60, %v5935_v49  ;;  %v7936_v5 = vadd.f32 %v5934_v51, %v5822_v12  ;;  %v900_v12 = vld [vmem:[#allocation3 + $0xf1] sm:$0xff] }
 0x131   : > { %2309 = vmatmul.mubr.bf16.gmra.mrb[124].mxu1 %v808_v29  ;;  %v902_v25 = vld [vmem:[#allocation3 + $0x111] sm:$0xff]  ;;  %v926_v3 = vpack.c.bf16 %v900_v12, %v899_v0 }
 0x132   : > { %v5826_v10 = vpop.f32.mrb[20].mxu0  ;;  %v7938_v48 = vadd.f32 %v5937_v54, %v5825_v13  ;;  %v927_v44 = vpack.c.bf16 %v902_v25, %v901_v24  ;;  %v906_v29 = vld [vmem:[#allocation3 + $0x151] sm:$0xff] }
 0x133   : > { %v5827_v35 = vpop.f32.mrb[21].mxu0  ;;  %v929_v54 = vpack.c.bf16 %v906_v29, %v905_v7 }
 0x134   : > { %v5828_v45 = vadd.f32 %v5827_v35, %v5826_v10  ;;  %v5829_v46 = vpop.f32.mrb[22].mxu0  ;;  %v5938_v55 = vpop.f32.mrb[20].mxu1  ;;  %v903_v35 = vld [vmem:[#allocation3 + $0x129] sm:$0xff] }
 0x135   : > { %v5830_v50 = vpop.f32.mrb[23].mxu0  ;;  %v5939_v59 = vpop.f32.mrb[21].mxu1 }
 0x136   : > { %v5831_v33 = vadd.f32 %v5830_v50, %v5829_v46  ;;  %v5940_v58 = vadd.f32 %v5939_v59, %v5938_v55  ;;  %v5941_v23 = vpop.f32.mrb[22].mxu1  ;;  %v908_v59 = vld [vmem:[#allocation3 + $0x171] sm:$0xff] }
 0x137   : > { %6777 = vmatmul.mubr.bf16.vlgmr.msra.gmra.mrb[128].mxu0 %v922_v36  ;;  %v5942_v39 = vpop.f32.mrb[23].mxu1  ;;  %v904_v36 = vld [vmem:[#allocation3 + $0x131] sm:$0xff] }
 0x138   : > { %6780 = vmatprep.mubr.bf16.mxu0 %v923_v63  ;;  %v5943_v17 = vadd.f32 %v5942_v39, %v5941_v23  ;;  %v7940_v61 = vadd.f32 %v5940_v58, %v5828_v45  ;;  %v928_v49 = vpack.c.bf16 %v904_v36, %v903_v35 }
 0x13a   : > { %v5832_v53 = vpop.f32.mrb[24].mxu0  ;;  %v7942_v40 = vadd.f32 %v5943_v17, %v5831_v33 }
 0x13b   : > { %v5833_v32 = vpop.f32.mrb[25].mxu0 }
 0x13c   : > { %v5834_v8 = vadd.f32 %v5833_v32, %v5832_v53  ;;  %v5835_v52 = vpop.f32.mrb[26].mxu0  ;;  %v5944_v42 = vpop.f32.mrb[24].mxu1 }
 0x13d   : > { %v5836_v43 = vpop.f32.mrb[27].mxu0  ;;  %v5945_v41 = vpop.f32.mrb[25].mxu1 }
 0x13e   : > { %v5837_v14 = vadd.f32 %v5836_v43, %v5835_v52  ;;  %v5946_v18 = vadd.f32 %v5945_v41, %v5944_v42  ;;  %v5947_v19 = vpop.f32.mrb[26].mxu1  ;;  %v910_v52 = vld [vmem:[#allocation3 + $0x191] sm:$0xff] }
 0x13f   : > { %6781 = vmatmul.mubr.bf16.gmra.mrb[132].mxu0 %v924_v30  ;;  %v5948_v56 = vpop.f32.mrb[27].mxu1  ;;  %v907_v30 = vld [vmem:[#allocation3 + $0x169] sm:$0xff] }
 0x140   : > { %6784 = vmatprep.mubr.bf16.mxu0 %v925_v21  ;;  %v5949_v10 = vadd.f32 %v5948_v56, %v5947_v19  ;;  %v7944_v11 = vadd.f32 %v5946_v18, %v5834_v8  ;;  %v909_v8 = vld [vmem:[#allocation3 + $0x189] sm:$0xff]  ;;  %v930_v39 = vpack.c.bf16 %v908_v59, %v907_v30  ;;  %v914_v18 = vld [vmem:[#allocation3 + $0x1d1] sm:$0xff] }
 0x141   : > { %v931_v12 = vpack.c.bf16 %v910_v52, %v909_v8 }
 0x142   : > { %v5838_v16 = vpop.f32.mrb[28].mxu0  ;;  %v7946_v45 = vadd.f32 %v5949_v10, %v5837_v14 }
 0x143   : > { %v5839_v2 = vpop.f32.mrb[29].mxu0 }
 0x144   : > { %v5840_v13 = vadd.f32 %v5839_v2, %v5838_v16  ;;  %v5841_v34 = vpop.f32.mrb[30].mxu0  ;;  %v5950_v63 = vpop.f32.mrb[28].mxu1 }
 0x145   : > { %v5842_v62 = vpop.f32.mrb[31].mxu0  ;;  %v5951_v50 = vpop.f32.mrb[29].mxu1 }
 0x146   : > { %v5843_v57 = vadd.f32 %v5842_v62, %v5841_v34  ;;  %v5952_v31 = vadd.f32 %v5951_v50, %v5950_v63  ;;  %v5953_v20 = vpop.f32.mrb[30].mxu1  ;;  %v912_v34 = vld [vmem:[#allocation3 + $0x1b1] sm:$0xff] }
 0x147   : > { %6785 = vmatmul.mubr.bf16.gmra.mrb[136].mxu0 %v926_v3  ;;  %v5954_v47 = vpop.f32.mrb[31].mxu1 }
 0x148   : > { %6788 = vmatprep.mubr.bf16.mxu0 %v927_v44  ;;  %v5955_v55 = vadd.f32 %v5954_v47, %v5953_v20  ;;  %v7948_v32 = vadd.f32 %v5952_v31, %v5840_v13  ;;  %v911_v13 = vld [vmem:[#allocation3 + $0x1a9] sm:$0xff] }
 0x149   : > { %v913_v44 = vld [vmem:[#allocation3 + $0x1c9] sm:$0xff]  ;;  %v932_v10 = vpack.c.bf16 %v912_v34, %v911_v13 }
 0x14a   : > { %v5844_v46 = vpop.f32.mrb[32].mxu0  ;;  %v7950_v21 = vadd.f32 %v5955_v55, %v5843_v57  ;;  %v933_v29 = vpack.c.bf16 %v914_v18, %v913_v44 }
 0x14b   : > { %v5845_v51 = vpop.f32.mrb[33].mxu0 }
 0x14c   : > { %v5846_v60 = vadd.f32 %v5845_v51, %v5844_v46  ;;  %v5847_v33 = vpop.f32.mrb[34].mxu0  ;;  %v5956_v23 = vpop.f32.mrb[32].mxu1 }
 0x14d   : > { %v5848_v28 = vpop.f32.mrb[35].mxu0  ;;  %v5957_v14 = vpop.f32.mrb[33].mxu1 }
 0x14e   : > { %v5849_v53 = vadd.f32 %v5848_v28, %v5847_v33  ;;  %v5958_v24 = vadd.f32 %v5957_v14, %v5956_v23  ;;  %v5959_v25 = vpop.f32.mrb[34].mxu1  ;;  %v919_v14 = vld [vmem:[#allocation3 + $0x229] sm:$0xff] }
 0x14f   : > { %6789 = vmatmul.mubr.bf16.gmra.mrb[140].mxu0 %v928_v49  ;;  %v5960_v42 = vpop.f32.mrb[35].mxu1  ;;  %v7043_v49 = vld [vmem:[%s9059_s2 + $0x8] sm:$0xff]  }
 0x150   : > { %6792 = vmatprep.mubr.bf16.mxu0 %v929_v54  ;;  %v5961_v3 = vadd.f32 %v5960_v42, %v5959_v25  ;;  %v7952_v41 = vadd.f32 %v5958_v24, %v5846_v60  ;;  %6810 = vmatprep.subr.bf16.mxu1 %v7043_v49 }
 0x151   : > { %6811 = vmatpush3.bf16.msra.mxu1 %v7043_v49 }
 0x152   : > { %v5850_v58 = vpop.f32.mrb[36].mxu0  ;;  %v7954_v19 = vadd.f32 %v5961_v3, %v5849_v53 }
 0x153   : > { %v5851_v43 = vpop.f32.mrb[37].mxu0 }
 0x154   : > { %v5852_v17 = vadd.f32 %v5851_v43, %v5850_v58  ;;  %v5853_v0 = vpop.f32.mrb[38].mxu0  ;;  %v5962_v56 = vpop.f32.mrb[36].mxu1 }
 0x155   : > { %v5854_v16 = vpop.f32.mrb[39].mxu0  ;;  %v5963_v35 = vpop.f32.mrb[37].mxu1 }
 0x156   : > { %v5855_v2 = vadd.f32 %v5854_v16, %v5853_v0  ;;  %v5964_v46 = vadd.f32 %v5963_v35, %v5962_v56  ;;  %v5965_v63 = vpop.f32.mrb[38].mxu1 }
 0x157   : > { %6793 = vmatmul.mubr.bf16.gmra.mrb[144].mxu0 %v930_v39  ;;  %v5966_v50 = vpop.f32.mrb[39].mxu1 }
 0x158   : > { %6796 = vmatprep.mubr.bf16.mxu0 %v931_v12  ;;  %v5967_v33 = vadd.f32 %v5966_v50, %v5965_v63  ;;  %v7959_v54 = vadd.f32 %v5964_v46, %v5852_v17  ;;  %v920_v17 = vld [vmem:[#allocation3 + $0x231] sm:$0xff] }
 0x159   : > { %v936_v16 = vpack.c.bf16 %v920_v17, %v919_v14 }
 0x15a   : > { %v5856_v62 = vpop.f32.mrb[40].mxu0  ;;  %v7961_v31 = vadd.f32 %v5967_v33, %v5855_v2 }
 0x15b   : > { %v5857_v57 = vpop.f32.mrb[41].mxu0 }
 0x15c   : > { %v5858_v36 = vadd.f32 %v5857_v57, %v5856_v62  ;;  %v5859_v7 = vpop.f32.mrb[42].mxu0  ;;  %v5968_v28 = vpop.f32.mrb[40].mxu1 }
 0x15d   : > { %v5860_v51 = vpop.f32.mrb[43].mxu0  ;;  %v5969_v53 = vpop.f32.mrb[41].mxu1 }
 0x15e   : > { %v5861_v60 = vadd.f32 %v5860_v51, %v5859_v7  ;;  %v5970_v59 = vadd.f32 %v5969_v53, %v5968_v28  ;;  %v5971_v8 = vpop.f32.mrb[42].mxu1 }
 0x15f   : > { %6797 = vmatmul.mubr.bf16.gmra.mrb[148].mxu0 %v932_v10  ;;  %v5972_v58 = vpop.f32.mrb[43].mxu1 }
 0x160   : > { %6800 = vmatprep.mubr.bf16.mxu0 %v933_v29  ;;  %v5973_v43 = vadd.f32 %v5972_v58, %v5971_v8  ;;  %v7964_v39 = vadd.f32 %v5970_v59, %v5858_v36 }
 0x162   : > { %v5862_v20 = vpop.f32.mrb[44].mxu0  ;;  %v7967_v0 = vadd.f32 %v5973_v43, %v5861_v60 }
 0x163   : > { %v5863_v47 = vpop.f32.mrb[45].mxu0 }
 0x164   : > { %v5864_v55 = vadd.f32 %v5863_v47, %v5862_v20  ;;  %v5865_v30 = vpop.f32.mrb[46].mxu0  ;;  %v5974_v24 = vpop.f32.mrb[44].mxu1 }
 0x165   : > { %v5866_v52 = vpop.f32.mrb[47].mxu0  ;;  %v5975_v42 = vpop.f32.mrb[45].mxu1 }
 0x166   : > { %v5867_v23 = vadd.f32 %v5866_v52, %v5865_v30  ;;  %v5976_v13 = vadd.f32 %v5975_v42, %v5974_v24  ;;  %v5977_v34 = vpop.f32.mrb[46].mxu1 }
 0x167   : > { %6801 = vmatmul.mubr.bf16.gmra.mrb[152].mxu0 %v7827_v26  ;;  %v5978_v18 = vpop.f32.mrb[47].mxu1 }
 0x168   : > { %6804 = vmatprep.mubr.bf16.mxu0 %v7918_v9  ;;  %v5979_v62 = vadd.f32 %v5978_v18, %v5977_v34  ;;  %v7969_v56 = vadd.f32 %v5976_v13, %v5864_v55 }
 0x16a   : > { %v5868_v12 = vpop.f32.mrb[48].mxu0  ;;  %v7971_v9 = vadd.f32 %v5979_v62, %v5867_v23 }
 0x16b   : > { %v5869_v25 = vpop.f32.mrb[49].mxu0 }
 0x16c   : > { %v5870_v2 = vadd.f32 %v5869_v25, %v5868_v12  ;;  %v5871_v3 = vpop.f32.mrb[50].mxu0  ;;  %v5980_v10 = vpop.f32.mrb[48].mxu1 }
 0x16d   : > { %v5872_v44 = vpop.f32.mrb[51].mxu0  ;;  %v5981_v36 = vpop.f32.mrb[49].mxu1 }
 0x16e   : > { %v5873_v26 = vadd.f32 %v5872_v44, %v5871_v3  ;;  %v5982_v46 = vadd.f32 %v5981_v36, %v5980_v10  ;;  %v5983_v63 = vpop.f32.mrb[50].mxu1 }
 0x16f   : > { %6805 = vmatmul.mubr.bf16.gmra.mrb[156].mxu0 %v936_v16  ;;  %v5984_v49 = vpop.f32.mrb[51].mxu1 }
 0x170   : > { %v5985_v60 = vadd.f32 %v5984_v49, %v5983_v63  ;;  %v7973_v33 = vadd.f32 %v5982_v46, %v5870_v2 }
 0x172   : > { %v5874_v57 = vpop.f32.mrb[52].mxu0  ;;  %v7975_v20 = vadd.f32 %v5985_v60, %v5873_v26 }
 0x173   : > { %v5875_v35 = vpop.f32.mrb[53].mxu0 }
 0x174   : > { %v5876_v7 = vadd.f32 %v5875_v35, %v5874_v57  ;;  %v5877_v29 = vpop.f32.mrb[54].mxu0  ;;  %v5986_v47 = vpop.f32.mrb[52].mxu1 }
 0x175   : > { %v5878_v51 = vpop.f32.mrb[55].mxu0  ;;  %v5987_v55 = vpop.f32.mrb[53].mxu1 }
 0x176   : > { %v5879_v50 = vadd.f32 %v5878_v51, %v5877_v29  ;;  %v5988_v8 = vadd.f32 %v5987_v55, %v5986_v47  ;;  %v5989_v52 = vpop.f32.mrb[54].mxu1 }
 0x177   : > { %v5990_v23 = vpop.f32.mrb[55].mxu1 }
 0x178   : > { %v5991_v14 = vadd.f32 %v5990_v23, %v5989_v52  ;;  %v7977_v17 = vadd.f32 %v5988_v8, %v5876_v7 }
 0x17a   : > { %v5880_v28 = vpop.f32.mrb[56].mxu0  ;;  %v7979_v12 = vadd.f32 %v5991_v14, %v5879_v50 }
 0x17b   : > { %v5881_v53 = vpop.f32.mrb[57].mxu0 }
 0x17c   : > { %v5882_v30 = vadd.f32 %v5881_v53, %v5880_v28  ;;  %v5883_v59 = vpop.f32.mrb[58].mxu0  ;;  %v5992_v25 = vpop.f32.mrb[56].mxu1 }
 0x17d   : > { %v5884_v58 = vpop.f32.mrb[59].mxu0  ;;  %v5993_v42 = vpop.f32.mrb[57].mxu1 }
 0x17e   : > { %v5885_v43 = vadd.f32 %v5884_v58, %v5883_v59  ;;  %v5994_v13 = vadd.f32 %v5993_v42, %v5992_v25  ;;  %v5995_v34 = vpop.f32.mrb[58].mxu1 }
 0x17f   : > { %v5996_v18 = vpop.f32.mrb[59].mxu1 }
 0x180   : > { %v5997_v62 = vadd.f32 %v5996_v18, %v5995_v34  ;;  %v7981_v57 = vadd.f32 %v5994_v13, %v5882_v30 }
 0x182   : > { %v5886_v24 = vpop.f32.mrb[60].mxu0  ;;  %v7983_v10 = vadd.f32 %v5997_v62, %v5885_v43 }
 0x183   : > { %v5887_v16 = vpop.f32.mrb[61].mxu0 }
 0x184   : > { %v5888_v2 = vadd.f32 %v5887_v16, %v5886_v24  ;;  %v5889_v3 = vpop.f32.mrb[62].mxu0  ;;  %v5998_v36 = vpop.f32.mrb[60].mxu1 }
 0x185   : > { %v5890_v44 = vpop.f32.mrb[63].mxu0  ;;  %v5999_v29 = vpop.f32.mrb[61].mxu1 }
 0x186   : > { %v5891_v26 = vadd.f32 %v5890_v44, %v5889_v3  ;;  %v6000_v51 = vadd.f32 %v5999_v29, %v5998_v36  ;;  %v6001_v49 = vpop.f32.mrb[62].mxu1 }
 0x187   : > { %v6002_v60 = vpop.f32.mrb[63].mxu1 }
 0x188   : > { %v6003_v53 = vadd.f32 %v6002_v60, %v6001_v49  ;;  %v7986_v55 = vadd.f32 %v6000_v51, %v5888_v2 }
 0x18a   : > { %v6020_v35 = vpop.f32.mrb[64].mxu0  ;;  %v7989_v59 = vadd.f32 %v6003_v53, %v5891_v26 }
 0x18b   : > { %v6021_v7 = vpop.f32.mrb[65].mxu0 }
 0x18c   : > { %v6022_v46 = vadd.f32 %v6021_v7, %v6020_v35  ;;  %v6023_v63 = vpop.f32.mrb[66].mxu0  ;;  %v6132_v52 = vpop.f32.mrb[64].mxu1 }
 0x18d   : > { %v6024_v50 = vpop.f32.mrb[67].mxu0  ;;  %v6133_v23 = vpop.f32.mrb[65].mxu1 }
 0x18e   : > { %v2030_v28 = vadd.f32 %v6022_v46, %v7900_v15  ;;  %v6025_v47 = vadd.f32 %v6024_v50, %v6023_v63  ;;  %v6134_v24 = vadd.f32 %v6133_v23, %v6132_v52  ;;  %v6135_v25 = vpop.f32.mrb[66].mxu1 }
 0x18f   : > { %v6136_v42 = vpop.f32.mrb[67].mxu1 }
 0x190   : > { %v2033_v30 = vadd.f32 %v6025_v47, %v7905_v22  ;;  %v6137_v13 = vadd.f32 %v6136_v42, %v6135_v25  ;;  %v7992_v2 = vadd.f32 %v6134_v24, %v2030_v28 }
 0x192   : > { %v6026_v8 = vpop.f32.mrb[68].mxu0  ;;  %v7995_v34 = vadd.f32 %v6137_v13, %v2033_v30 }
 0x193   : > { %v6027_v58 = vpop.f32.mrb[69].mxu0 }
 0x194   : > { %v6028_v43 = vadd.f32 %v6027_v58, %v6026_v8  ;;  %v6029_v14 = vpop.f32.mrb[70].mxu0  ;;  %v6138_v18 = vpop.f32.mrb[68].mxu1 }
 0x195   : > { %v6030_v16 = vpop.f32.mrb[71].mxu0  ;;  %v6139_v62 = vpop.f32.mrb[69].mxu1 }
 0x196   : > { %v2038_v15 = vadd.f32 %v6028_v43, %v7911_v38  ;;  %v6031_v3 = vadd.f32 %v6030_v16, %v6029_v14  ;;  %v6140_v7 = vadd.f32 %v6139_v62, %v6138_v18  ;;  %v6141_v29 = vpop.f32.mrb[70].mxu1 }
 0x197   : > { %v6142_v63 = vpop.f32.mrb[71].mxu1 }
 0x198   : > { %v2041_v22 = vadd.f32 %v6031_v3, %v7916_v27  ;;  %v6143_v49 = vadd.f32 %v6142_v63, %v6141_v29  ;;  %v7998_v50 = vadd.f32 %v6140_v7, %v2038_v15 }
 0x19a   : > { %v6032_v44 = vpop.f32.mrb[72].mxu0  ;;  %v8001_v60 = vadd.f32 %v6143_v49, %v2041_v22 }
 0x19b   : > { %v6033_v26 = vpop.f32.mrb[73].mxu0 }
 0x19c   : > { %v6034_v35 = vadd.f32 %v6033_v26, %v6032_v44  ;;  %v6035_v36 = vpop.f32.mrb[74].mxu0  ;;  %v6144_v47 = vpop.f32.mrb[72].mxu1 }
 0x19d   : > { %v6036_v46 = vpop.f32.mrb[75].mxu0  ;;  %v6145_v30 = vpop.f32.mrb[73].mxu1 }
 0x19e   : > { %v2046_v38 = vadd.f32 %v6034_v35, %v7925_v1  ;;  %v6037_v51 = vadd.f32 %v6036_v46, %v6035_v36  ;;  %v6146_v58 = vadd.f32 %v6145_v30, %v6144_v47  ;;  %v6147_v23 = vpop.f32.mrb[74].mxu1 }
 0x19f   : > { %v6148_v14 = vpop.f32.mrb[75].mxu1 }
 0x1a0   : > { %v2049_v27 = vadd.f32 %v6037_v51, %v7929_v4  ;;  %v6149_v25 = vadd.f32 %v6148_v14, %v6147_v23  ;;  %v8004_v16 = vadd.f32 %v6146_v58, %v2046_v38 }
 0x1a2   : > { %v6038_v28 = vpop.f32.mrb[76].mxu0  ;;  %v8007_v42 = vadd.f32 %v6149_v25, %v2049_v27 }
 0x1a3   : > { %v6039_v53 = vpop.f32.mrb[77].mxu0 }
 0x1a4   : > { %v6040_v8 = vadd.f32 %v6039_v53, %v6038_v28  ;;  %v6041_v52 = vpop.f32.mrb[78].mxu0  ;;  %v6150_v3 = vpop.f32.mrb[76].mxu1 }
 0x1a5   : > { %v6042_v43 = vpop.f32.mrb[79].mxu0  ;;  %v6151_v22 = vpop.f32.mrb[77].mxu1 }
 0x1a6   : > { %v2054_v1 = vadd.f32 %v6040_v8, %v7931_v37  ;;  %v6043_v24 = vadd.f32 %v6042_v43, %v6041_v52  ;;  %v6152_v26 = vadd.f32 %v6151_v22, %v6150_v3  ;;  %v6153_v62 = vpop.f32.mrb[78].mxu1 }
 0x1a7   : > { %v6154_v36 = vpop.f32.mrb[79].mxu1 }
 0x1a8   : > { %v2057_v4 = vadd.f32 %v6043_v24, %v7934_v6  ;;  %v6155_v29 = vadd.f32 %v6154_v36, %v6153_v62  ;;  %v8010_v46 = vadd.f32 %v6152_v26, %v2054_v1 }
 0x1aa   : > { %v6044_v15 = vpop.f32.mrb[80].mxu0  ;;  %v8013_v63 = vadd.f32 %v6155_v29, %v2057_v4 }
 0x1ab   : > { %v6045_v13 = vpop.f32.mrb[81].mxu0 }
 0x1ac   : > { %v6046_v44 = vadd.f32 %v6045_v13, %v6044_v15  ;;  %v6047_v18 = vpop.f32.mrb[82].mxu0  ;;  %v6156_v51 = vpop.f32.mrb[80].mxu1 }
 0x1ad   : > { %v6048_v35 = vpop.f32.mrb[83].mxu0  ;;  %v6157_v27 = vpop.f32.mrb[81].mxu1 }
 0x1ae   : > { %v2062_v37 = vadd.f32 %v6046_v44, %v7936_v5  ;;  %v6049_v7 = vadd.f32 %v6048_v35, %v6047_v18  ;;  %v6158_v53 = vadd.f32 %v6157_v27, %v6156_v51  ;;  %v6159_v30 = vpop.f32.mrb[82].mxu1 }
 0x1af   : > { %v6160_v52 = vpop.f32.mrb[83].mxu1 }
 0x1b0   : > { %v2065_v6 = vadd.f32 %v6049_v7, %v7938_v48  ;;  %v6161_v23 = vadd.f32 %v6160_v52, %v6159_v30  ;;  %v8016_v43 = vadd.f32 %v6158_v53, %v2062_v37 }
 0x1b2   : > { %v6050_v38 = vpop.f32.mrb[84].mxu0  ;;  %v8019_v14 = vadd.f32 %v6161_v23, %v2065_v6 }
 0x1b3   : > { %v6051_v49 = vpop.f32.mrb[85].mxu0 }
 0x1b4   : > { %v6052_v28 = vadd.f32 %v6051_v49, %v6050_v38  ;;  %v6053_v47 = vpop.f32.mrb[86].mxu0  ;;  %v6162_v24 = vpop.f32.mrb[84].mxu1 }
 0x1b5   : > { %v6054_v8 = vpop.f32.mrb[87].mxu0  ;;  %v6163_v4 = vpop.f32.mrb[85].mxu1 }
 0x1b6   : > { %v2070_v5 = vadd.f32 %v6052_v28, %v7940_v61  ;;  %v6055_v58 = vadd.f32 %v6054_v8, %v6053_v47  ;;  %v6164_v13 = vadd.f32 %v6163_v4, %v6162_v24  ;;  %v6165_v22 = vpop.f32.mrb[86].mxu1 }
 0x1b7   : > { %v6166_v18 = vpop.f32.mrb[87].mxu1 }
 0x1b8   : > { %v2073_v48 = vadd.f32 %v6055_v58, %v7942_v40  ;;  %v6167_v62 = vadd.f32 %v6166_v18, %v6165_v22  ;;  %v8022_v35 = vadd.f32 %v6164_v13, %v2070_v5 }
 0x1ba   : > { %v6056_v1 = vpop.f32.mrb[88].mxu0  ;;  %v8025_v36 = vadd.f32 %v6167_v62, %v2073_v48  ;;  %v7047_v62 = vld [vmem:[%s9058_s1 + $0x8] sm:$0xff]  }
 0x1bb   : > { %v6057_v25 = vpop.f32.mrb[89].mxu0 }
 0x1bc   : > { %v6058_v15 = vadd.f32 %v6057_v25, %v6056_v1  ;;  %v6059_v3 = vpop.f32.mrb[90].mxu0  ;;  %v6168_v7 = vpop.f32.mrb[88].mxu1 }
 0x1bd   : > { %v6060_v44 = vpop.f32.mrb[91].mxu0  ;;  %v6169_v6 = vpop.f32.mrb[89].mxu1 }
 0x1be   : > { %v2078_v61 = vadd.f32 %v6058_v15, %v7944_v11  ;;  %v6061_v26 = vadd.f32 %v6060_v44, %v6059_v3  ;;  %v6170_v49 = vadd.f32 %v6169_v6, %v6168_v7  ;;  %v6171_v27 = vpop.f32.mrb[90].mxu1  ;;  %v7045_v3 = vld [vmem:[%s9058_s1] sm:$0xff]  }
 0x1bf   : > { %v6172_v47 = vpop.f32.mrb[91].mxu1 }
 0x1c0   : > { %v2081_v40 = vadd.f32 %v6061_v26, %v7946_v45  ;;  %v6173_v30 = vadd.f32 %v6172_v47, %v6171_v27  ;;  %v8028_v8 = vadd.f32 %v6170_v49, %v2078_v61  ;;  %v7049_v49 = vld [vmem:[%s9058_s1 + $0x10] sm:$0xff]  }
 0x1c2   : > { %v6062_v37 = vpop.f32.mrb[92].mxu0  ;;  %v8031_v52 = vadd.f32 %v6173_v30, %v2081_v40  ;;  %v7055_v40 = vld [vmem:[%s9058_s1 + $0xc0] sm:$0xff]  }
 0x1c3   : > { %v6063_v29 = vpop.f32.mrb[93].mxu0  ;;  %6382 = vmatprep.subr.bf16.mxu1 %v7055_v40 }
 0x1c4   : > { %v6064_v38 = vadd.f32 %v6063_v29, %v6062_v37  ;;  %v6065_v51 = vpop.f32.mrb[94].mxu0  ;;  %v6174_v58 = vpop.f32.mrb[92].mxu1 }
 0x1c5   : > { %v6066_v28 = vpop.f32.mrb[95].mxu0  ;;  %v6175_v48 = vpop.f32.mrb[93].mxu1 }
 0x1c6   : > { %v2086_v11 = vadd.f32 %v6064_v38, %v7948_v32  ;;  %v6067_v53 = vadd.f32 %v6066_v28, %v6065_v51  ;;  %v6176_v25 = vadd.f32 %v6175_v48, %v6174_v58  ;;  %v6177_v4 = vpop.f32.mrb[94].mxu1  ;;  %v7044_v32 = vld [vmem:[%s9058_s1 + $0x40] sm:$0xff]   ;;  %v7051_v48 = vld [vmem:[%s9058_s1 + $0x18] sm:$0xff]  }
 0x1c7   : > { %v6178_v13 = vpop.f32.mrb[95].mxu1  ;;  %6270 = vmatprep.subr.bf16.mxu0 %v7044_v32 }
 0x1c8   : > { %v2089_v45 = vadd.f32 %v6067_v53, %v7950_v21  ;;  %v7046_v21 = vld [vmem:[%s9058_s1 + $0x48] sm:$0xff]   ;;  %v6179_v18 = vadd.f32 %v6178_v13, %v6177_v4  ;;  %v8043_v61 = vadd.f32 %v6176_v25, %v2086_v11  ;;  %6271 = vmatpush3.bf16.msra.mxu0 %v7045_v3  ;;  %v7050_v11 = vld [vmem:[%s9058_s1 + $0x58] sm:$0xff]  }
 0x1c9   : > { %6272 = vmatprep.subr.bf16.mxu0 %v7046_v21 }
 0x1ca   : > { %v6068_v5 = vpop.f32.mrb[96].mxu0  ;;  %v8052_v37 = vadd.f32 %v6179_v18, %v2089_v45 }
 0x1cb   : > { %v6069_v23 = vpop.f32.mrb[97].mxu0 }
 0x1cc   : > { %v6070_v1 = vadd.f32 %v6069_v23, %v6068_v5  ;;  %v6071_v24 = vpop.f32.mrb[98].mxu0  ;;  %v6180_v29 = vpop.f32.mrb[96].mxu1  ;;  %6273 = vmatpush3.bf16.msra.mxu0 %v7047_v62 }
 0x1cd   : > { %v6072_v15 = vpop.f32.mrb[99].mxu0  ;;  %v6181_v6 = vpop.f32.mrb[97].mxu1 }
 0x1ce   : > { %v2094_v22 = vadd.f32 %v6070_v1, %v7952_v41  ;;  %v6073_v44 = vadd.f32 %v6072_v15, %v6071_v24  ;;  %v7048_v41 = vld [vmem:[%s9058_s1 + $0x50] sm:$0xff]   ;;  %v6182_v27 = vadd.f32 %v6181_v6, %v6180_v29  ;;  %v6183_v28 = vpop.f32.mrb[98].mxu1  ;;  %v7052_v24 = vld [vmem:[%s9058_s1 + $0x60] sm:$0xff]   ;;  %v7056_v29 = vld [vmem:[%s9058_s1 + $0x28] sm:$0xff]  }
 0x1cf   : > { %6274 = vmatprep.subr.bf16.mxu0 %v7048_v41  ;;  %v6184_v53 = vpop.f32.mrb[99].mxu1  ;;  %v7060_v6 = vld [vmem:[%s9058_s1 + $0x70] sm:$0xff]  }
 0x1d0   : > { %v2097_v26 = vadd.f32 %v6073_v44, %v7954_v19  ;;  %v6185_v5 = vadd.f32 %v6184_v53, %v6183_v28  ;;  %v8064_v58 = vadd.f32 %v6182_v27, %v2094_v22  ;;  %6275 = vmatpush3.bf16.msra.mxu0 %v7049_v49  ;;  %v7054_v44 = vld [vmem:[%s9058_s1 + $0x68] sm:$0xff]  }
 0x1d1   : > { %6276 = vmatprep.subr.bf16.mxu0 %v7050_v11 }
 0x1d2   : > { %v6074_v7 = vpop.f32.mrb[100].mxu0  ;;  %v8070_v1 = vadd.f32 %v6185_v5, %v2097_v26 }
 0x1d3   : > { %v6075_v19 = vpop.f32.mrb[101].mxu0 }
 0x1d4   : > { %v6076_v38 = vadd.f32 %v6075_v19, %v6074_v7  ;;  %v6077_v51 = vpop.f32.mrb[102].mxu0  ;;  %6277 = vmatpush3.bf16.msra.mxu0 %v7051_v48 }
 0x1d5   : > { %v6078_v47 = vpop.f32.mrb[103].mxu0  ;;  %6278 = vmatprep.subr.bf16.mxu0 %v7052_v24 }
 0x1d6   : > { %v2102_v30 = vadd.f32 %v6076_v38, %v7959_v54  ;;  %v6079_v45 = vadd.f32 %v6078_v47, %v6077_v51  ;;  %v6186_v54 = vpop.f32.mrb[100].mxu1 }
 0x1d7   : > { %v6187_v15 = vpop.f32.mrb[101].mxu1 }
 0x1d8   : > { %v2105_v23 = vadd.f32 %v6079_v45, %v7961_v31  ;;  %v7053_v31 = vld [vmem:[%s9058_s1 + $0x20] sm:$0xff]   ;;  %v6188_v21 = vadd.f32 %v6187_v15, %v6186_v54  ;;  %v6189_v13 = vpop.f32.mrb[102].mxu1 }
 0x1d9   : > { %v6190_v18 = vpop.f32.mrb[103].mxu1  ;;  %6279 = vmatpush3.bf16.msra.mxu0 %v7053_v31 }
 0x1da   : > { %v6080_v25 = vpop.f32.mrb[104].mxu0  ;;  %v6191_v40 = vadd.f32 %v6190_v18, %v6189_v13  ;;  %v8082_v41 = vadd.f32 %v6188_v21, %v2102_v30  ;;  %6280 = vmatprep.subr.bf16.mxu0 %v7054_v44 }
 0x1db   : > { %v6081_v4 = vpop.f32.mrb[105].mxu0 }
 0x1dc   : > { %v6082_v32 = vadd.f32 %v6081_v4, %v6080_v25  ;;  %v6083_v3 = vpop.f32.mrb[106].mxu0  ;;  %v8088_v19 = vadd.f32 %v6191_v40, %v2105_v23 }
 0x1dd   : > { %v6084_v22 = vpop.f32.mrb[107].mxu0  ;;  %6281 = vmatpush3.bf16.msra.mxu0 %v7056_v29 }
 0x1de   : > { %v2110_v26 = vadd.f32 %v6082_v32, %v7964_v39  ;;  %v6085_v62 = vadd.f32 %v6084_v22, %v6083_v3  ;;  %v6192_v39 = vpop.f32.mrb[104].mxu1  ;;  %6282 = vmatprep.subr.bf16.mxu0 %v7060_v6 }
 0x1df   : > { %v6193_v49 = vpop.f32.mrb[105].mxu1 }
 0x1e0   : > { %v2113_v7 = vadd.f32 %v6085_v62, %v7967_v0  ;;  %v7062_v0 = vld [vmem:[%s9058_s1 + $0x30] sm:$0xff]   ;;  %v6194_v47 = vadd.f32 %v6193_v49, %v6192_v39  ;;  %v6195_v11 = vpop.f32.mrb[106].mxu1 }
 0x1e1   : > { %v6196_v30 = vpop.f32.mrb[107].mxu1  ;;  %6283 = vmatpush3.bf16.msra.mxu0 %v7062_v0 }
 0x1e2   : > { %v6086_v38 = vpop.f32.mrb[108].mxu0  ;;  %v6197_v23 = vadd.f32 %v6196_v30, %v6195_v11  ;;  %v8097_v48 = vadd.f32 %v6194_v47, %v2110_v26 }
 0x1e3   : > { %v6087_v51 = vpop.f32.mrb[109].mxu0 }
 0x1e4   : > { %v6088_v27 = vadd.f32 %v6087_v51, %v6086_v38  ;;  %v6089_v28 = vpop.f32.mrb[110].mxu0  ;;  %v8100_v25 = vadd.f32 %v6197_v23, %v2113_v7  ;;  %v6198_v4 = vpop.f32.mrb[108].mxu1 }
 0x1e5   : > { %v6090_v53 = vpop.f32.mrb[111].mxu0  ;;  %v6199_v32 = vpop.f32.mrb[109].mxu1 }
 0x1e6   : > { %v2118_v45 = vadd.f32 %v6088_v27, %v7969_v56  ;;  %v6091_v5 = vadd.f32 %v6090_v53, %v6089_v28  ;;  %v6200_v21 = vadd.f32 %v6199_v32, %v6198_v4  ;;  %v6201_v13 = vpop.f32.mrb[110].mxu1 }
 0x1e7   : > { %v6202_v44 = vpop.f32.mrb[111].mxu1 }
 0x1e8   : > { %v2121_v24 = vadd.f32 %v6091_v5, %v7971_v9  ;;  %v6203_v26 = vadd.f32 %v6202_v44, %v6201_v13  ;;  %v8103_v62 = vadd.f32 %v6200_v21, %v2118_v45 }
 0x1ea   : > { %v6092_v54 = vpop.f32.mrb[112].mxu0  ;;  %v8106_v40 = vadd.f32 %v6203_v26, %v2121_v24 }
 0x1eb   : > { %v6093_v15 = vpop.f32.mrb[113].mxu0 }
 0x1ec   : > { %v6094_v3 = vadd.f32 %v6093_v15, %v6092_v54  ;;  %v6095_v31 = vpop.f32.mrb[114].mxu0  ;;  %v6204_v29 = vpop.f32.mrb[112].mxu1 }
 0x1ed   : > { %v6096_v22 = vpop.f32.mrb[115].mxu0  ;;  %v6205_v38 = vpop.f32.mrb[113].mxu1 }
 0x1ee   : > { %v2126_v56 = vadd.f32 %v6094_v3, %v7973_v33  ;;  %v6097_v18 = vadd.f32 %v6096_v22, %v6095_v31  ;;  %v6206_v49 = vadd.f32 %v6205_v38, %v6204_v29  ;;  %v6207_v27 = vpop.f32.mrb[114].mxu1 }
 0x1ef   : > { %v6208_v0 = vpop.f32.mrb[115].mxu1 }
 0x1f0   : > { %v2129_v9 = vadd.f32 %v6097_v18, %v7975_v20  ;;  %v6209_v11 = vadd.f32 %v6208_v0, %v6207_v27  ;;  %v8109_v53 = vadd.f32 %v6206_v49, %v2126_v56 }
 0x1f2   : > { %v6098_v7 = vpop.f32.mrb[116].mxu0  ;;  %v8112_v30 = vadd.f32 %v6209_v11, %v2129_v9 }
 0x1f3   : > { %v6099_v6 = vpop.f32.mrb[117].mxu0 }
 0x1f4   : > { %v6100_v39 = vadd.f32 %v6099_v6, %v6098_v7  ;;  %v6101_v51 = vpop.f32.mrb[118].mxu0  ;;  %v6210_v5 = vpop.f32.mrb[116].mxu1 }
 0x1f5   : > { %v6102_v28 = vpop.f32.mrb[119].mxu0  ;;  %v6211_v24 = vpop.f32.mrb[117].mxu1 }
 0x1f6   : > { %v2134_v33 = vadd.f32 %v6100_v39, %v7977_v17  ;;  %v6103_v47 = vadd.f32 %v6102_v28, %v6101_v51  ;;  %v6212_v15 = vadd.f32 %v6211_v24, %v6210_v5  ;;  %v6213_v32 = vpop.f32.mrb[118].mxu1 }
 0x1f7   : > { %v6214_v31 = vpop.f32.mrb[119].mxu1 }
 0x1f8   : > { %v2137_v20 = vadd.f32 %v6103_v47, %v7979_v12  ;;  %v6215_v13 = vadd.f32 %v6214_v31, %v6213_v32  ;;  %v8115_v22 = vadd.f32 %v6212_v15, %v2134_v33 }
 0x1fa   : > { %v6104_v45 = vpop.f32.mrb[120].mxu0  ;;  %v8118_v44 = vadd.f32 %v6215_v13, %v2137_v20 }
 0x1fb   : > { %v6105_v23 = vpop.f32.mrb[121].mxu0 }
 0x1fc   : > { %v6106_v54 = vadd.f32 %v6105_v23, %v6104_v45  ;;  %v6107_v4 = vpop.f32.mrb[122].mxu0  ;;  %v6216_v18 = vpop.f32.mrb[120].mxu1 }
 0x1fd   : > { %v6108_v3 = vpop.f32.mrb[123].mxu0  ;;  %v6217_v9 = vpop.f32.mrb[121].mxu1 }
 0x1fe   : > { %v2142_v17 = vadd.f32 %v6106_v54, %v7981_v57  ;;  %v6109_v21 = vadd.f32 %v6108_v3, %v6107_v4  ;;  %v6218_v6 = vadd.f32 %v6217_v9, %v6216_v18  ;;  %v6219_v38 = vpop.f32.mrb[122].mxu1 }
 0x1ff   : > { %v6220_v51 = vpop.f32.mrb[123].mxu1 }
 0x200   : > { %v2145_v12 = vadd.f32 %v6109_v21, %v7983_v10  ;;  %v6221_v27 = vadd.f32 %v6220_v51, %v6219_v38  ;;  %v8121_v28 = vadd.f32 %v6218_v6, %v2142_v17 }
 0x202   : > { %v6110_v56 = vpop.f32.mrb[124].mxu0  ;;  %v8124_v0 = vadd.f32 %v6221_v27, %v2145_v12 }
 0x203   : > { %v6111_v26 = vpop.f32.mrb[125].mxu0 }
 0x204   : > { %v6112_v7 = vadd.f32 %v6111_v26, %v6110_v56  ;;  %v6113_v29 = vpop.f32.mrb[126].mxu0  ;;  %v6222_v47 = vpop.f32.mrb[124].mxu1  ;;  %v7058_v26 = vld [vmem:[%s9058_s1 + $0xc8] sm:$0xff]  }
 0x205   : > { %v6114_v39 = vpop.f32.mrb[127].mxu0  ;;  %v6223_v45 = vpop.f32.mrb[125].mxu1 }
 0x206   : > { %v2150_v57 = vadd.f32 %v6112_v7, %v7986_v55  ;;  %v6115_v49 = vadd.f32 %v6114_v39, %v6113_v29  ;;  %v6224_v24 = vadd.f32 %v6223_v45, %v6222_v47  ;;  %v6225_v54 = vpop.f32.mrb[126].mxu1 }
 0x207   : > { %v6226_v15 = vpop.f32.mrb[127].mxu1 }
 0x208   : > { %v2153_v10 = vadd.f32 %v6115_v49, %v7989_v59  ;;  %v6227_v59 = vadd.f32 %v6226_v15, %v6225_v54  ;;  %v8130_v17 = vadd.f32 %v6224_v24, %v2150_v57 }
 0x20a   : > { %v6778_v33 = vpop.f32.mrb[128].mxu0  ;;  %v8132_v12 = vadd.f32 %v6227_v59, %v2153_v10 }
 0x20b   : > { %v2360_v11 = vadd.f32 %v6778_v33, %v7998_v50  ;;  %v2351_v20 = vpop.f32.mrb[129].mxu0 }
 0x20c   : > { %v2352_v5 = vadd.f32 %v2351_v20, %v7992_v2  ;;  %v6779_v23 = vpop.f32.mrb[130].mxu0 }
 0x20d   : > { %v2363_v55 = vadd.f32 %v6779_v23, %v8001_v60  ;;  %v2354_v4 = vpop.f32.mrb[131].mxu0  ;;  %v2480_v3 = vmax.f32 %v2360_v11, 0.0  ;;  %v7057_v60 = vld [vmem:[%s9058_s1 + $0x80] sm:$0xff]   ;;  %v7064_v11 = vld [vmem:[%s9058_s1 + $0xd8] sm:$0xff]  }
 0x20e   : > { %v2355_v32 = vadd.f32 %v2354_v4, %v7995_v34  ;;  %v2478_v21 = vmax.f32 %v2352_v5, 0.0 }
 0x20f   : > { %v2481_v31 = vmax.f32 %v2363_v55, 0.0 }
 0x210   : > { %v2479_v50 = vmax.f32 %v2355_v32, 0.0 }
 0x211   : > { %v2511_v13 = vpack.c.bf16 %v2481_v31, %v2480_v3 }
 0x212   : > { %v2510_v2 = vpack.c.bf16 %v2479_v50, %v2478_v21  ;;  %v6782_v56 = vpop.f32.mrb[132].mxu0 }
 0x213   : > { %v2376_v18 = vadd.f32 %v6782_v56, %v8010_v46  ;;  %v2367_v34 = vpop.f32.mrb[133].mxu0  ;;  %v7059_v46 = vld [vmem:[%s9058_s1 + $0x88] sm:$0xff]  }
 0x214   : > { %v2368_v9 = vadd.f32 %v2367_v34, %v8004_v16  ;;  %v6783_v7 = vpop.f32.mrb[134].mxu0  ;;  %6812 = vmatprep.mubr.msk.bf16.mxu1 %vm2542_vm0, %v2510_v2  ;;  %v7061_v16 = vld [vmem:[%s9058_s1 + $0xd0] sm:$0xff]  }
 0x215   : > { %v2379_v29 = vadd.f32 %v6783_v7, %v8013_v63  ;;  %v2370_v6 = vpop.f32.mrb[135].mxu0  ;;  %6813 = vmatmul.mubr.msk.bf16.vlgmr.msra.gmra.mrb[128].mxu1 %vm2542_vm0, %v2511_v13  ;;  %v2484_v39 = vmax.f32 %v2376_v18, 0.0 }
 0x216   : > { %v2371_v38 = vadd.f32 %v2370_v6, %v8007_v42  ;;  %6383 = vmatpush3.bf16.msra.mxu1 %v7057_v60  ;;  %v2482_v57 = vmax.f32 %v2368_v9, 0.0  ;;  %v7063_v42 = vld [vmem:[%s9058_s1 + $0x90] sm:$0xff]  }
 0x217   : > { %v2485_v51 = vmax.f32 %v2379_v29, 0.0  ;;  %6384 = vmatprep.subr.bf16.mxu1 %v7058_v26 }
 0x218   : > { %v2483_v49 = vmax.f32 %v2371_v38, 0.0 }
 0x219   : > { %v2513_v63 = vpack.c.bf16 %v2485_v51, %v2484_v39 }
 0x21a   : > { %v2512_v27 = vpack.c.bf16 %v2483_v49, %v2482_v57  ;;  %v6786_v10 = vpop.f32.mrb[136].mxu0  ;;  %6385 = vmatpush3.bf16.msra.mxu1 %v7059_v46 }
 0x21b   : > { %v2392_v33 = vadd.f32 %v6786_v10, %v8022_v35  ;;  %v2383_v47 = vpop.f32.mrb[137].mxu0  ;;  %6386 = vmatprep.subr.bf16.mxu1 %v7061_v16 }
 0x21c   : > { %v2384_v20 = vadd.f32 %v2383_v47, %v8016_v43  ;;  %v6787_v45 = vpop.f32.mrb[138].mxu0  ;;  %6816 = vmatprep.mubr.msk.bf16.mxu1 %vm2542_vm0, %v2512_v27 }
 0x21d   : > { %v2395_v5 = vadd.f32 %v6787_v45, %v8025_v36  ;;  %v2386_v23 = vpop.f32.mrb[139].mxu0  ;;  %6817 = vmatmul.mubr.msk.bf16.gmra.mrb[132].mxu1 %vm2542_vm0, %v2513_v63  ;;  %v2488_v35 = vmax.f32 %v2392_v33, 0.0 }
 0x21e   : > { %v2387_v24 = vadd.f32 %v2386_v23, %v8019_v14  ;;  %6387 = vmatpush3.bf16.msra.mxu1 %v7063_v42  ;;  %v2486_v55 = vmax.f32 %v2384_v20, 0.0 }
 0x21f   : > { %v2489_v54 = vmax.f32 %v2395_v5, 0.0  ;;  %6388 = vmatprep.subr.bf16.mxu1 %v7064_v11 }
 0x220   : > { %v2487_v4 = vmax.f32 %v2387_v24, 0.0 }
 0x221   : > { %v2515_v15 = vpack.c.bf16 %v2489_v54, %v2488_v35 }
 0x222   : > { %v2514_v32 = vpack.c.bf16 %v2487_v4, %v2486_v55  ;;  %v6790_v59 = vpop.f32.mrb[140].mxu0 }
 0x223   : > { %v2408_v43 = vadd.f32 %v6790_v59, %v8043_v61  ;;  %v2399_v3 = vpop.f32.mrb[141].mxu0 }
 0x224   : > { %v2400_v31 = vadd.f32 %v2399_v3, %v8028_v8  ;;  %v6791_v36 = vpop.f32.mrb[142].mxu0  ;;  %6820 = vmatprep.mubr.msk.bf16.mxu1 %vm2542_vm0, %v2514_v32 }
 0x225   : > { %v2411_v21 = vadd.f32 %v6791_v36, %v8052_v37  ;;  %v2402_v14 = vpop.f32.mrb[143].mxu0  ;;  %6821 = vmatmul.mubr.msk.bf16.gmra.mrb[136].mxu1 %vm2542_vm0, %v2515_v15  ;;  %v2492_v13 = vmax.f32 %v2408_v43, 0.0 }
 0x226   : > { %v2403_v50 = vadd.f32 %v2402_v14, %v8031_v52  ;;  %v2490_v56 = vmax.f32 %v2400_v31, 0.0 }
 0x227   : > { %v2493_v2 = vmax.f32 %v2411_v21, 0.0 }
 0x228   : > { %v2491_v60 = vmax.f32 %v2403_v50, 0.0 }
 0x229   : > { %v2517_v18 = vpack.c.bf16 %v2493_v2, %v2492_v13 }
 0x22a   : > { %v2516_v34 = vpack.c.bf16 %v2491_v60, %v2490_v56  ;;  %v6794_v61 = vpop.f32.mrb[144].mxu0  ;;  %v7069_v56 = vld [vmem:[%s9058_s1 + $0xa0] sm:$0xff]   ;;  %v7070_v60 = vld [vmem:[%s9058_s1 + $0xe8] sm:$0xff]  }
 0x22b   : > { %v2424_v26 = vadd.f32 %v6794_v61, %v8082_v41  ;;  %v2415_v8 = vpop.f32.mrb[145].mxu0  ;;  %v7071_v61 = vld [vmem:[%s9058_s1 + $0xa8] sm:$0xff]  }
 0x22c   : > { %v2416_v9 = vadd.f32 %v2415_v8, %v8064_v58  ;;  %v6795_v7 = vpop.f32.mrb[146].mxu0  ;;  %6824 = vmatprep.mubr.msk.bf16.mxu1 %vm2542_vm0, %v2516_v34  ;;  %v2945_v8 = vld [vmem:[#allocation3 + $0xf] sm:$0xff] }
 0x22d   : > { %v2427_v37 = vadd.f32 %v6795_v7, %v8088_v19  ;;  %v2418_v29 = vpop.f32.mrb[147].mxu0  ;;  %6825 = vmatmul.mubr.msk.bf16.gmra.mrb[140].mxu1 %vm2542_vm0, %v2517_v18  ;;  %v2496_v6 = vmax.f32 %v2424_v26, 0.0  ;;  %v7119_v18 = vld [vmem:[#allocation3 + $0x8] sm:$0xff]  ;;  %v7072_v7 = vld [vmem:[%s9058_s1 + $0xf0] sm:$0xff]  }
 0x22e   : > { %v2419_v52 = vadd.f32 %v2418_v29, %v8070_v1  ;;  %v2494_v46 = vmax.f32 %v2416_v9, 0.0  ;;  %v3040_v34 = vpack.c.bf16 %v7119_v18, %v7119_v18  ;;  %v2944_v26 = vld [vmem:[#allocation3 + $0x7] sm:$0xff]  ;;  %v7074_v29 = vld [vmem:[%s9058_s1 + $0xb0] sm:$0xff]  }
 0x22f   : > { %v2497_v38 = vmax.f32 %v2427_v37, 0.0  ;;  %v2976_v9 = vpack.c.bf16 %v2945_v8, %v2944_v26  ;;  %v7073_v37 = vld [vmem:[%s9058_s1 + $0x140] sm:$0xff]  }
 0x230   : > { %v2495_v39 = vmax.f32 %v2419_v52, 0.0  ;;  %4272 = vmatprep.mubr.bf16.mxu0 %v3040_v34  ;;  %v7075_v52 = vld [vmem:[%s9058_s1 + $0x100] sm:$0xff]  }
 0x231   : > { %v2519_v51 = vpack.c.bf16 %v2497_v38, %v2496_v6  ;;  %v7076_v6 = vld [vmem:[%s9058_s1 + $0xf8] sm:$0xff]  }
 0x232   : > { %v2518_v16 = vpack.c.bf16 %v2495_v39, %v2494_v46  ;;  %v6798_v41 = vpop.f32.mrb[148].mxu0  ;;  %v7077_v38 = vld [vmem:[%s9058_s1 + $0xb8] sm:$0xff]   ;;  %v7078_v46 = vld [vmem:[%s9058_s1 + $0x148] sm:$0xff]  }
 0x233   : > { %v2440_v57 = vadd.f32 %v6798_v41, %v8103_v62  ;;  %v2431_v58 = vpop.f32.mrb[149].mxu0  ;;  %v7079_v39 = vld [vmem:[%s9058_s1 + $0x108] sm:$0xff]   ;;  %v7082_v41 = vld [vmem:[%s9058_s1 + $0x158] sm:$0xff]  }
 0x234   : > { %v2432_v49 = vadd.f32 %v2431_v58, %v8097_v48  ;;  %v6799_v63 = vpop.f32.mrb[150].mxu0  ;;  %6828 = vmatprep.mubr.msk.bf16.mxu1 %vm2542_vm0, %v2518_v16  ;;  %v7081_v16 = vld [vmem:[%s9058_s1 + $0x110] sm:$0xff]   ;;  %v7084_v58 = vld [vmem:[%s9058_s1 + $0x1c0] sm:$0xff]  }
 0x235   : > { %v2443_v19 = vadd.f32 %v6799_v63, %v8106_v40  ;;  %v2434_v27 = vpop.f32.mrb[151].mxu0  ;;  %6829 = vmatmul.mubr.msk.bf16.gmra.mrb[144].mxu1 %vm2542_vm0, %v2519_v51  ;;  %v2500_v10 = vmax.f32 %v2440_v57, 0.0  ;;  %v7080_v51 = vld [vmem:[%s9058_s1 + $0x150] sm:$0xff]   ;;  %v7083_v57 = vld [vmem:[%s9058_s1 + $0x118] sm:$0xff]   ;;  %v7087_v63 = vld [vmem:[%s9058_s1 + $0x120] sm:$0xff]  }
 0x236   : > { %v2435_v1 = vadd.f32 %v2434_v27, %v8100_v25  ;;  %v2498_v33 = vmax.f32 %v2432_v49, 0.0  ;;  %v7086_v49 = vld [vmem:[%s9058_s1 + $0x160] sm:$0xff]   ;;  %v7091_v27 = vld [vmem:[%s9058_s1 + $0x128] sm:$0xff]  }
 0x237   : > { %v2501_v42 = vmax.f32 %v2443_v19, 0.0  ;;  %v7090_v19 = vld [vmem:[%s9058_s1 + $0x168] sm:$0xff]  }
 0x238   : > { %v2499_v47 = vmax.f32 %v2435_v1, 0.0  ;;  %v7094_v1 = vld [vmem:[%s9058_s1 + $0x170] sm:$0xff]  }
 0x239   : > { %v2521_v11 = vpack.c.bf16 %v2501_v42, %v2500_v10  ;;  %v7095_v10 = vld [vmem:[%s9058_s1 + $0x130] sm:$0xff]   ;;  %v7098_v42 = vld [vmem:[%s9058_s1 + $0x178] sm:$0xff]  }
 0x23a   : > { %v2520_v20 = vpack.c.bf16 %v2499_v47, %v2498_v33  ;;  %v6802_v62 = vpop.f32.mrb[152].mxu0  ;;  %v7099_v33 = vld [vmem:[%s9058_s1 + $0x138] sm:$0xff]  }
 0x23b   : > { %v2456_v45 = vadd.f32 %v6802_v62, %v8115_v22  ;;  %v2447_v48 = vpop.f32.mrb[153].mxu0 }
 0x23c   : > { %v2448_v5 = vadd.f32 %v2447_v48, %v8109_v53  ;;  %v6803_v23 = vpop.f32.mrb[154].mxu0  ;;  %6832 = vmatprep.mubr.msk.bf16.mxu1 %vm2542_vm0, %v2520_v20 }
 0x23d   : > { %v2459_v40 = vadd.f32 %v6803_v23, %v8118_v44  ;;  %v2450_v24 = vpop.f32.mrb[155].mxu0  ;;  %6833 = vmatmul.mubr.msk.bf16.gmra.mrb[148].mxu1 %vm2542_vm0, %v2521_v11  ;;  %v2504_v35 = vmax.f32 %v2456_v45, 0.0  ;;  %v7120_v11 = vld [vmem:[%s7385_s8 + $0x10] sm:$0xff]  ;;  %v7121_v45 = vld [vmem:[%s7385_s8] sm:$0xff] }
 0x23e   : > { %v2451_v25 = vadd.f32 %v2450_v24, %v8112_v30  ;;  %v2502_v55 = vmax.f32 %v2448_v5, 0.0 }
 0x23f   : > { %v2505_v54 = vmax.f32 %v2459_v40, 0.0  ;;  %v7122_v40 = vld [vmem:[%s7385_s8 + $0x18] sm:$0xff] }
 0x240   : > { %v2503_v4 = vmax.f32 %v2451_v25, 0.0 }
 0x241   : > { %v2523_v15 = vpack.c.bf16 %v2505_v54, %v2504_v35  ;;  %v7123_v54 = vld [vmem:[%s7385_s8 + $0x8] sm:$0xff] }
 0x242   : > { %v2522_v32 = vpack.c.bf16 %v2503_v4, %v2502_v55  ;;  %v6806_v22 = vpop.f32.mrb[156].mxu0 }
 0x243   : > { %v2472_v59 = vadd.f32 %v6806_v22, %v8130_v17  ;;  %v2463_v53 = vpop.f32.mrb[157].mxu0  ;;  %v7066_v17 = vld [vmem:[%s9058_s1 + $0x78] sm:$0xff]  }
 0x244   : > { %v2464_v43 = vadd.f32 %v2463_v53, %v8121_v28  ;;  %v6807_v3 = vpop.f32.mrb[158].mxu0  ;;  %6836 = vmatprep.mubr.msk.bf16.mxu1 %vm2542_vm0, %v2522_v32  ;;  %v7065_v28 = vld [vmem:[%s9058_s1 + $0x98] sm:$0xff]   ;;  %6284 = vmatprep.subr.bf16.mxu0 %v7066_v17  ;;  %v3072_v17 = vld [vmem:[#allocation3 + $0x9] sm:$0xff] }
 0x245   : > { %v2475_v44 = vadd.f32 %v6807_v3, %v8132_v12  ;;  %v2466_v31 = vpop.f32.mrb[159].mxu0  ;;  %6837 = vmatmul.mubr.msk.bf16.gmra.mrb[152].mxu1 %vm2542_vm0, %v2523_v15  ;;  %v2508_v36 = vmax.f32 %v2472_v59, 0.0  ;;  %v7068_v12 = vld [vmem:[%s9058_s1 + $0x38] sm:$0xff]   ;;  %v7124_v59 = vld [vmem:[%s7385_s8 + $0x30] sm:$0xff]  ;;  %v7125_v3 = vld [vmem:[%s7385_s8 + $0x20] sm:$0xff] }
 0x246   : > { %v2467_v30 = vadd.f32 %v2466_v31, %v8124_v0  ;;  %v2506_v14 = vmax.f32 %v2464_v43, 0.0  ;;  %6389 = vmatpush3.bf16.msra.mxu1 %v7065_v28  ;;  %v7067_v0 = vld [vmem:[%s9058_s1 + $0xe0] sm:$0xff]   ;;  %6285 = vmatpush3.bf16.msra.mxu0 %v7068_v12 }
 0x247   : > { %v2509_v21 = vmax.f32 %v2475_v44, 0.0  ;;  %6390 = vmatprep.subr.bf16.mxu1 %v7067_v0  ;;  %6494 = vmatprep.subr.bf16.mxu0 %v7073_v37  ;;  %v3073_v0 = vld [vmem:[#allocation3 + $0x11] sm:$0xff] }
 0x248   : > { %v2507_v50 = vmax.f32 %v2467_v30, 0.0  ;;  %v3104_v34 = vpack.c.bf16 %v3073_v0, %v3072_v17  ;;  %v7097_v0 = vld [vmem:[%s9058_s1 + $0x198] sm:$0xff]  }
 0x249   : > { %v2525_v13 = vpack.c.bf16 %v2509_v21, %v2508_v36  ;;  %4273 = vmatmul.mubr.bf16.vlgmr.msra.gmra.mrb[160].mxu0 %v2976_v9  ;;  %v7126_v36 = vld [vmem:[%s7385_s8 + $0x38] sm:$0xff]  ;;  %v7085_v9 = vld [vmem:[%s9058_s1 + $0x180] sm:$0xff]  }
 0x24a   : > { %v2524_v2 = vpack.c.bf16 %v2507_v50, %v2506_v14  ;;  %6391 = vmatpush3.bf16.msra.mxu1 %v7069_v56  ;;  %6495 = vmatpush3.bf16.msra.mxu0 %v7075_v52  ;;  %v8309_v50 = vld [vmem:[%s9058_s1 + $0x200] sm:$0xff]  }
 0x24b   : > { %6392 = vmatprep.subr.bf16.mxu1 %v7070_v60  ;;  %6496 = vmatprep.subr.bf16.mxu0 %v7078_v46  ;;  %v7129_v46 = vld [vmem:[%s7385_s8 + $0x40] sm:$0xff] }
 0x24c   : > { %6840 = vmatprep.mubr.msk.bf16.mxu1 %vm2542_vm0, %v2524_v2  ;;  %v7127_v2 = vld [vmem:[%s7385_s8 + $0x28] sm:$0xff] }
 0x24d   : > { %6841 = vmatmul.mubr.msk.bf16.gmra.mrb[156].mxu1 %vm2542_vm0, %v2525_v13 }
 0x24e   : > { %6393 = vmatpush3.bf16.msra.mxu1 %v7071_v61  ;;  %6497 = vmatpush3.bf16.msra.mxu0 %v7079_v39 }
 0x24f   : > { %6394 = vmatprep.subr.bf16.mxu1 %v7072_v7  ;;  %6498 = vmatprep.subr.bf16.mxu0 %v7080_v51  ;;  %v7128_v7 = vld [vmem:[%s7385_s8 + $0x50] sm:$0xff] }
 0x252   : > { %6395 = vmatpush3.bf16.msra.mxu1 %v7074_v29  ;;  %6499 = vmatpush3.bf16.msra.mxu0 %v7081_v16 }
 0x253   : > { %6396 = vmatprep.subr.bf16.mxu1 %v7076_v6  ;;  %6500 = vmatprep.subr.bf16.mxu0 %v7082_v41 }
 0x256   : > { %6397 = vmatpush3.bf16.msra.mxu1 %v7077_v38  ;;  %6501 = vmatpush3.bf16.msra.mxu0 %v7083_v57  ;;  %v7088_v38 = vld [vmem:[%s9058_s1 + $0x1c8] sm:$0xff]   ;;  %v7130_v57 = vld [vmem:[%s7385_s8 + $0x58] sm:$0xff] }
 0x257   : > { %6606 = vmatprep.subr.bf16.mxu1 %v7084_v58  ;;  %6502 = vmatprep.subr.bf16.mxu0 %v7086_v49 }
 0x25a   : > { %6503 = vmatpush3.bf16.msra.mxu0 %v7087_v63 }
 0x25b   : > { %6504 = vmatprep.subr.bf16.mxu0 %v7090_v19  ;;  %v7131_v19 = vld [vmem:[%s7385_s8 + $0x48] sm:$0xff] }
 0x25e   : > { %6505 = vmatpush3.bf16.msra.mxu0 %v7091_v27 }
 0x25f   : > { %6506 = vmatprep.subr.bf16.mxu0 %v7094_v1  ;;  %v7089_v1 = vld [vmem:[%s9058_s1 + $0x188] sm:$0xff]  }
 0x262   : > { %6507 = vmatpush3.bf16.msra.mxu0 %v7095_v10 }
 0x263   : > { %6508 = vmatprep.subr.bf16.mxu0 %v7098_v42  ;;  %v7092_v42 = vld [vmem:[%s9058_s1 + $0x1d0] sm:$0xff]  }
 0x266   : > { %6509 = vmatpush3.bf16.msra.mxu0 %v7099_v33 }
 0x267   : > { %6844 = vmatprep.subr.bf16.mxu0 %v8309_v50 }
 0x2e8   : > { %v6814_v47 = vpop.f32.mrb[128].mxu1 }
 0x2e9   : > { %v8281_v20 = vadd.f32 %v7120_v11, %v6814_v47  ;;  %v2625_v62 = vpop.f32.mrb[129].mxu1 }
 0x2ea   : > { %v8284_v48 = vadd.f32 %v7121_v45, %v2625_v62  ;;  %v6815_v5 = vpop.f32.mrb[130].mxu1 }
 0x2eb   : > { %v2882_v23 = vmax.f32 %v8281_v20, 0.0  ;;  %v8288_v24 = vadd.f32 %v7122_v40, %v6815_v5  ;;  %v2628_v25 = vpop.f32.mrb[131].mxu1  ;;  %v7093_v5 = vld [vmem:[%s9058_s1 + $0x190] sm:$0xff]  }
 0x2ec   : > { %v2880_v35 = vmax.f32 %v8284_v48, 0.0  ;;  %v8292_v55 = vadd.f32 %v7123_v54, %v2628_v25 }
 0x2ed   : > { %2914 = vst [vmem:[#allocation3 + $0x48] sm:$0xff] %v2882_v23  ;;  %v2883_v4 = vmax.f32 %v8288_v24, 0.0 }
 0x2ee   : > { %2912 = vst [vmem:[#allocation3 + $0x28] sm:$0xff] %v2880_v35  ;;  %v2881_v15 = vmax.f32 %v8292_v55, 0.0 }
 0x2ef   : > { %2915 = vst [vmem:[#allocation3 + $0x50] sm:$0xff] %v2883_v4  ;;  %v3042_v52 = vpack.c.bf16 %v2883_v4, %v2882_v23  ;;  %v7132_v23 = vld [vmem:[%s7385_s8 + $0x70] sm:$0xff] }
 0x2f0   : > { %2913 = vst [vmem:[#allocation3 + $0x30] sm:$0xff] %v2881_v15  ;;  %v6818_v32 = vpop.f32.mrb[132].mxu1  ;;  %v3041_v22 = vpack.c.bf16 %v2881_v15, %v2880_v35  ;;  %v7096_v15 = vld [vmem:[%s9058_s1 + $0x1d8] sm:$0xff]  }
 0x2f1   : > { %v8297_v53 = vadd.f32 %v7124_v59, %v6818_v32  ;;  %v2641_v43 = vpop.f32.mrb[133].mxu1  ;;  %v7133_v32 = vld [vmem:[%s7385_s8 + $0x60] sm:$0xff] }
 0x2f2   : > { %v8300_v44 = vadd.f32 %v7125_v3, %v2641_v43  ;;  %v6819_v31 = vpop.f32.mrb[134].mxu1  ;;  %4280 = vmatprep.mubr.bf16.mxu0 %v3041_v22 }
 0x2f3   : > { %v2886_v30 = vmax.f32 %v8297_v53, 0.0  ;;  %v8304_v21 = vadd.f32 %v7126_v36, %v6819_v31  ;;  %v2644_v14 = vpop.f32.mrb[135].mxu1  ;;  %v7134_v31 = vld [vmem:[%s7385_s8 + $0x78] sm:$0xff] }
 0x2f4   : > { %v2884_v13 = vmax.f32 %v8300_v44, 0.0  ;;  %v8313_v28 = vadd.f32 %v7127_v2, %v2644_v14  ;;  %v3138_v6 = vld [vmem:[#allocation3 + $0x47] sm:$0xff] }
 0x2f5   : > { %2918 = vst [vmem:[#allocation3 + $0x88] sm:$0xff] %v2886_v30  ;;  %v2887_v12 = vmax.f32 %v8304_v21, 0.0  ;;  %v3136_v60 = vld [vmem:[#allocation3 + $0x27] sm:$0xff] }
 0x2f6   : > { %2916 = vst [vmem:[#allocation3 + $0x68] sm:$0xff] %v2884_v13  ;;  %v2885_v56 = vmax.f32 %v8313_v28, 0.0  ;;  %v3139_v61 = vld [vmem:[#allocation3 + $0x4f] sm:$0xff] }
 0x2f7   : > { %2919 = vst [vmem:[#allocation3 + $0x90] sm:$0xff] %v2887_v12  ;;  %v3137_v18 = vld [vmem:[#allocation3 + $0x2f] sm:$0xff]  ;;  %v8334_v16 = vpack.c.bf16 %v3139_v61, %v3138_v6 }
 0x2f8   : > { %2917 = vst [vmem:[#allocation3 + $0x70] sm:$0xff] %v2885_v56  ;;  %v6822_v26 = vpop.f32.mrb[136].mxu1  ;;  %v3168_v8 = vpack.c.bf16 %v3137_v18, %v3136_v60  ;;  %v3074_v47 = vld [vmem:[#allocation3 + $0x29] sm:$0xff]  ;;  %v3075_v11 = vld [vmem:[#allocation3 + $0x31] sm:$0xff]  ;;  %v3043_v54 = vpack.c.bf16 %v2885_v56, %v2884_v13  ;;  %v7100_v60 = vld [vmem:[%s9058_s1 + $0x1e0] sm:$0xff]  }
 0x2f9   : > { %v8326_v37 = vadd.f32 %v7128_v7, %v6822_v26  ;;  %v2657_v29 = vpop.f32.mrb[137].mxu1  ;;  %v8368_v35 = vpack.c.bf16 %v3075_v11, %v3074_v47  ;;  %v7135_v2 = vld [vmem:[%s7385_s8 + $0x68] sm:$0xff]  ;;  %v3077_v61 = vld [vmem:[#allocation3 + $0x51] sm:$0xff] }
 0x2fa   : > { %v8332_v39 = vadd.f32 %v7129_v46, %v2657_v29  ;;  %v6823_v51 = vpop.f32.mrb[138].mxu1  ;;  %4433 = vmatprep.mubr.bf16.mxu1 %v3168_v8  ;;  %4281 = vmatmul.mubr.bf16.gmra.mrb[164].mxu0 %v3168_v8  ;;  %v7136_v7 = vld [vmem:[%s7385_s8 + $0x90] sm:$0xff]  ;;  %v7138_v47 = vld [vmem:[%s7385_s8 + $0x98] sm:$0xff] }
 0x2fb   : > { %v2890_v41 = vmax.f32 %v8326_v37, 0.0  ;;  %v8338_v58 = vadd.f32 %v7130_v57, %v6823_v51  ;;  %v2660_v49 = vpop.f32.mrb[139].mxu1  ;;  %4434 = vmatmul.mubr.bf16.vlgmr.msra.gmra.mrb[160].mxu1 %v3104_v34  ;;  %4288 = vmatprep.mubr.bf16.mxu0 %v3042_v52  ;;  %v3076_v34 = vld [vmem:[#allocation3 + $0x49] sm:$0xff]  ;;  %v7137_v57 = vld [vmem:[%s7385_s8 + $0x80] sm:$0xff] }
 0x2fc   : > { %v2888_v63 = vmax.f32 %v8332_v39, 0.0  ;;  %v8342_v27 = vadd.f32 %v7131_v19, %v2660_v49  ;;  %4441 = vmatprep.mubr.bf16.mxu1 %v8334_v16  ;;  %6607 = vmatpush3.bf16.msra.mxu1 %v7085_v9  ;;  %v7101_v9 = vld [vmem:[%s9058_s1 + $0x1a0] sm:$0xff]   ;;  %v8411_v6 = vpack.c.bf16 %v3077_v61, %v3076_v34  ;;  %v7102_v51 = vld [vmem:[%s9058_s1 + $0x1e8] sm:$0xff]  }
 0x2fd   : > { %2922 = vst [vmem:[#allocation3 + $0xc8] sm:$0xff] %v2890_v41  ;;  %v2891_v10 = vmax.f32 %v8338_v58, 0.0  ;;  %6608 = vmatprep.subr.bf16.mxu1 %v7088_v38  ;;  %v3140_v4 = vld [vmem:[#allocation3 + $0x67] sm:$0xff]  ;;  %v3044_v38 = vpack.c.bf16 %v2887_v12, %v2886_v30 }
 0x2fe   : > { %9092 = vst [vmem:[#allocation8_spill] sm:$0xff] %v8342_v27  ;;  %2920 = vst [vmem:[#allocation3 + $0xa8] sm:$0xff] %v2888_v63  ;;  %v8357_v33 = vmax.f32 %v8342_v27, 0.0  ;;  %v3143_v26 = vld [vmem:[#allocation3 + $0x8f] sm:$0xff]  ;;  %v3142_v46 = vld [vmem:[#allocation3 + $0x87] sm:$0xff] }
 0x2ff   : > { %2923 = vst [vmem:[#allocation3 + $0xd0] sm:$0xff] %v2891_v10  ;;  %v3141_v62 = vld [vmem:[#allocation3 + $0x6f] sm:$0xff] }
 0x300   : > { %2921 = vst [vmem:[#allocation3 + $0xb0] sm:$0xff] %v8357_v33  ;;  %v6826_v45 = vpop.f32.mrb[140].mxu1  ;;  %6609 = vmatpush3.bf16.msra.mxu1 %v7089_v1  ;;  %v8377_v43 = vpack.c.bf16 %v3141_v62, %v3140_v4  ;;  %v8424_v1 = vpack.c.bf16 %v3143_v26, %v3142_v46  ;;  %v7139_v62 = vld [vmem:[%s7385_s8 + $0x88] sm:$0xff]  ;;  %v3045_v34 = vpack.c.bf16 %v8357_v33, %v2888_v63  ;;  %v7107_v26 = vld [vmem:[%s9058_s1 + $0x1f8] sm:$0xff]  }
 0x301   : > { %v8366_v40 = vadd.f32 %v7132_v23, %v6826_v45  ;;  %v2673_v25 = vpop.f32.mrb[141].mxu1  ;;  %6610 = vmatprep.subr.bf16.mxu1 %v7092_v42  ;;  %v3078_v4 = vld [vmem:[#allocation3 + $0x69] sm:$0xff]  ;;  %v7142_v46 = vld [vmem:[%s7385_s8 + $0xb8] sm:$0xff] }
 0x302   : > { %v8374_v22 = vadd.f32 %v7133_v32, %v2673_v25  ;;  %v6827_v59 = vpop.f32.mrb[142].mxu1  ;;  %4289 = vmatmul.mubr.bf16.gmra.mrb[168].mxu0 %v8334_v16  ;;  %v7104_v25 = vld [vmem:[%s9058_s1 + $0x1f0] sm:$0xff]  }
 0x303   : > { %9093 = vst [vmem:[#allocation9_spill] sm:$0xff] %v8366_v40  ;;  %v2894_v3 = vmax.f32 %v8366_v40, 0.0  ;;  %v8381_v36 = vadd.f32 %v7134_v31, %v6827_v59  ;;  %v2676_v14 = vpop.f32.mrb[143].mxu1  ;;  %4442 = vmatmul.mubr.bf16.gmra.mrb[164].mxu1 %v8368_v35  ;;  %4296 = vmatprep.mubr.bf16.mxu0 %v3043_v54  ;;  %v7106_v31 = vld [vmem:[%s9058_s1 + $0x1b0] sm:$0xff]  }
 0x304   : > { %9094 = vst [vmem:[#allocation10_spill] sm:$0xff] %v8374_v22  ;;  %v2892_v13 = vmax.f32 %v8374_v22, 0.0  ;;  %v8386_v17 = vadd.f32 %v7135_v2, %v2676_v14  ;;  %4449 = vmatprep.mubr.bf16.mxu1 %v8377_v43  ;;  %6611 = vmatpush3.bf16.msra.mxu1 %v7093_v5  ;;  %v7103_v5 = vld [vmem:[%s9058_s1 + $0x1a8] sm:$0xff]   ;;  %v7140_v14 = vld [vmem:[%s7385_s8 + $0xb0] sm:$0xff] }
 0x305   : > { %9095 = vst [vmem:[#allocation11_spill] sm:$0xff] %v8381_v36  ;;  %2926 = vst [vmem:[#allocation3 + $0x108] sm:$0xff] %v2894_v3  ;;  %v2895_v56 = vmax.f32 %v8381_v36, 0.0  ;;  %6612 = vmatprep.subr.bf16.mxu1 %v7096_v15  ;;  %v3079_v15 = vld [vmem:[#allocation3 + $0x71] sm:$0xff]  ;;  %v3144_v61 = vld [vmem:[#allocation3 + $0xa7] sm:$0xff] }
 0x306   : > { %9096 = vst [vmem:[#allocation12_spill] sm:$0xff] %v8386_v17  ;;  %2924 = vst [vmem:[#allocation3 + $0xe8] sm:$0xff] %v2892_v13  ;;  %v2893_v18 = vmax.f32 %v8386_v17, 0.0 }
 0x307   : > { %2927 = vst [vmem:[#allocation3 + $0x110] sm:$0xff] %v2895_v56  ;;  %v3145_v32 = vld [vmem:[#allocation3 + $0xaf] sm:$0xff] }
 0x308   : > { %2925 = vst [vmem:[#allocation3 + $0xf0] sm:$0xff] %v2893_v18  ;;  %v6830_v8 = vpop.f32.mrb[144].mxu1  ;;  %6613 = vmatpush3.bf16.msra.mxu1 %v7097_v0 }
 0x309   : > { %v8409_v29 = vadd.f32 %v7136_v7, %v6830_v8  ;;  %v2689_v52 = vpop.f32.mrb[145].mxu1  ;;  %6614 = vmatprep.subr.bf16.mxu1 %v7100_v60  ;;  %v8458_v60 = vpack.c.bf16 %v3079_v15, %v3078_v4  ;;  %v7141_v8 = vld [vmem:[%s7385_s8 + $0xa0] sm:$0xff]  ;;  %v3081_v4 = vld [vmem:[#allocation3 + $0x91] sm:$0xff] }
 0x30a   : > { %v8421_v49 = vadd.f32 %v7137_v57, %v2689_v52  ;;  %v6831_v19 = vpop.f32.mrb[146].mxu1  ;;  %4297 = vmatmul.mubr.bf16.gmra.mrb[172].mxu0 %v8377_v43  ;;  %v8470_v52 = vpack.c.bf16 %v3145_v32, %v3144_v61  ;;  %v3147_v15 = vld [vmem:[#allocation3 + $0xcf] sm:$0xff]  ;;  %v3146_v61 = vld [vmem:[#allocation3 + $0xc7] sm:$0xff] }
 0x30b   : > { %9097 = vst [vmem:[#allocation13_spill] sm:$0xff] %v8409_v29  ;;  %v2898_v42 = vmax.f32 %v8409_v29, 0.0  ;;  %v8428_v11 = vadd.f32 %v7138_v47, %v6831_v19  ;;  %v2692_v30 = vpop.f32.mrb[147].mxu1  ;;  %4450 = vmatmul.mubr.bf16.gmra.mrb[168].mxu1 %v8411_v6  ;;  %4304 = vmatprep.mubr.bf16.mxu0 %v3044_v38  ;;  %v7143_v19 = vld [vmem:[%s7385_s8 + $0xa8] sm:$0xff] }
 0x30c   : > { %9098 = vst [vmem:[#allocation14_spill] sm:$0xff] %v8421_v49  ;;  %v2896_v12 = vmax.f32 %v8421_v49, 0.0  ;;  %v8433_v45 = vadd.f32 %v7139_v62, %v2692_v30  ;;  %4457 = vmatprep.mubr.bf16.mxu1 %v8424_v1  ;;  %6615 = vmatpush3.bf16.msra.mxu1 %v7101_v9  ;;  %v7108_v30 = vld [vmem:[%s9058_s1 + $0x1b8] sm:$0xff]  }
 0x30d   : > { %9099 = vst [vmem:[#allocation15_spill] sm:$0xff] %v8428_v11  ;;  %2930 = vst [vmem:[#allocation3 + $0x148] sm:$0xff] %v2898_v42  ;;  %v2899_v23 = vmax.f32 %v8428_v11, 0.0  ;;  %6616 = vmatprep.subr.bf16.mxu1 %v7102_v51 }
 0x30e   : > { %9100 = vst [vmem:[#allocation16_spill] sm:$0xff] %v8433_v45  ;;  %2928 = vst [vmem:[#allocation3 + $0x128] sm:$0xff] %v2896_v12  ;;  %v2897_v54 = vmax.f32 %v8433_v45, 0.0 }
 0x30f   : > { %2931 = vst [vmem:[#allocation3 + $0x150] sm:$0xff] %v2899_v23 }
 0x310   : > { %2929 = vst [vmem:[#allocation3 + $0x130] sm:$0xff] %v2897_v54  ;;  %v6834_v59 = vpop.f32.mrb[148].mxu1  ;;  %6617 = vmatpush3.bf16.msra.mxu1 %v7103_v5 }
 0x311   : > { %v8456_v2 = vadd.f32 %v7140_v14, %v6834_v59  ;;  %v2705_v0 = vpop.f32.mrb[149].mxu1  ;;  %6618 = vmatprep.subr.bf16.mxu1 %v7104_v25  ;;  %v3080_v25 = vld [vmem:[#allocation3 + $0x89] sm:$0xff] }
 0x312   : > { %v8467_v9 = vadd.f32 %v7141_v8, %v2705_v0  ;;  %v6835_v7 = vpop.f32.mrb[150].mxu1  ;;  %4305 = vmatmul.mubr.bf16.gmra.mrb[176].mxu0 %v8424_v1  ;;  %v7144_v59 = vld [vmem:[%s7385_s8 + $0xd0] sm:$0xff]  ;;  %v8498_v0 = vpack.c.bf16 %v3081_v4, %v3080_v25 }
 0x313   : > { %9101 = vst [vmem:[#allocation17_spill] sm:$0xff] %v8456_v2  ;;  %v9066_v38 = vmax.f32 %v8456_v2, 0.0  ;;  %v8474_v51 = vadd.f32 %v7142_v46, %v6835_v7  ;;  %v2708_v63 = vpop.f32.mrb[151].mxu1  ;;  %4458 = vmatmul.mubr.bf16.gmra.mrb[172].mxu1 %v8458_v60  ;;  %4312 = vmatprep.mubr.bf16.mxu0 %v3045_v34  ;;  %v3046_v34 = vpack.c.bf16 %v2891_v10, %v2890_v41  ;;  %v7147_v10 = vld [vmem:[%s7385_s8 + $0xc8] sm:$0xff] }
 0x314   : > { %9102 = vst [vmem:[#allocation18_spill] sm:$0xff] %v8467_v9  ;;  %v2900_v57 = vmax.f32 %v8467_v9, 0.0  ;;  %v8479_v47 = vadd.f32 %v7143_v19, %v2708_v63  ;;  %4465 = vmatprep.mubr.bf16.mxu1 %v8470_v52  ;;  %6619 = vmatpush3.bf16.msra.mxu1 %v7106_v31  ;;  %v8508_v46 = vpack.c.bf16 %v3147_v15, %v3146_v61  ;;  %v7146_v19 = vld [vmem:[%s7385_s8 + $0xd8] sm:$0xff] }
 0x315   : > { %9103 = vst [vmem:[#allocation19_spill] sm:$0xff] %v8474_v51  ;;  %2934 = vst [vmem:[#allocation3 + $0x188] sm:$0xff] %v9066_v38  ;;  %v9064_v62 = vmax.f32 %v8474_v51, 0.0  ;;  %6620 = vmatprep.subr.bf16.mxu1 %v7107_v26  ;;  %v7145_v26 = vld [vmem:[%s7385_s8 + $0xc0] sm:$0xff] }
 0x316   : > { %9104 = vst [vmem:[#allocation20_spill] sm:$0xff] %v8479_v47  ;;  %2932 = vst [vmem:[#allocation3 + $0x168] sm:$0xff] %v2900_v57  ;;  %v2901_v5 = vmax.f32 %v8479_v47, 0.0 }
 0x317   : > { %2935 = vst [vmem:[#allocation3 + $0x190] sm:$0xff] %v9064_v62 }
 0x318   : > { %2933 = vst [vmem:[#allocation3 + $0x170] sm:$0xff] %v2901_v5  ;;  %v6838_v32 = vpop.f32.mrb[152].mxu1  ;;  %6621 = vmatpush3.bf16.msra.mxu1 %v7108_v30 }
 0x319   : > { %v8496_v31 = vadd.f32 %v7144_v59, %v6838_v32  ;;  %v2721_v14 = vpop.f32.mrb[153].mxu1  ;;  %v3082_v59 = vld [vmem:[#allocation3 + $0xa9] sm:$0xff] }
 0x31a   : > { %v8505_v8 = vadd.f32 %v7145_v26, %v2721_v14  ;;  %v6839_v7 = vpop.f32.mrb[154].mxu1  ;;  %4313 = vmatmul.mubr.bf16.gmra.mrb[180].mxu0 %v8470_v52  ;;  %v3083_v14 = vld [vmem:[#allocation3 + $0xb1] sm:$0xff] }
 0x31b   : > { %9105 = vst [vmem:[#allocation21_spill] sm:$0xff] %v8496_v31  ;;  %v9061_v63 = vmax.f32 %v8496_v31, 0.0  ;;  %v8512_v30 = vadd.f32 %v7146_v19, %v6839_v7  ;;  %v2724_v25 = vpop.f32.mrb[155].mxu1  ;;  %4466 = vmatmul.mubr.bf16.gmra.mrb[176].mxu1 %v8498_v0  ;;  %4320 = vmatprep.mubr.bf16.mxu0 %v3046_v34  ;;  %v3149_v34 = vld [vmem:[#allocation3 + $0xef] sm:$0xff] }
 0x31c   : > { %9106 = vst [vmem:[#allocation22_spill] sm:$0xff] %v8505_v8  ;;  %v9063_v41 = vmax.f32 %v8505_v8, 0.0  ;;  %v8517_v4 = vadd.f32 %v7147_v10, %v2724_v25  ;;  %4473 = vmatprep.mubr.bf16.mxu1 %v8508_v46  ;;  %v7148_v26 = vld [vmem:[%s7385_s8 + $0xf0] sm:$0xff]  ;;  %v8533_v25 = vpack.c.bf16 %v3083_v14, %v3082_v59  ;;  %v3047_v10 = vpack.c.bf16 %v2893_v18, %v2892_v13  ;;  %v7151_v18 = vld [vmem:[%s7385_s8 + $0xe8] sm:$0xff] }
 0x31d   : > { %9107 = vst [vmem:[#allocation23_spill] sm:$0xff] %v8512_v30  ;;  %2938 = vst [vmem:[#allocation3 + $0x1c8] sm:$0xff] %v9061_v63  ;;  %v9062_v15 = vmax.f32 %v8512_v30, 0.0  ;;  %v3148_v63 = vld [vmem:[#allocation3 + $0xe7] sm:$0xff] }
 0x31e   : > { %9108 = vst [vmem:[#allocation24_spill] sm:$0xff] %v8517_v4  ;;  %2936 = vst [vmem:[#allocation3 + $0x1a8] sm:$0xff] %v9063_v41  ;;  %v9065_v32 = vmax.f32 %v8517_v4, 0.0 }
 0x31f   : > { %2939 = vst [vmem:[#allocation3 + $0x1d0] sm:$0xff] %v9062_v15  ;;  %v7149_v15 = vld [vmem:[%s7385_s8 + $0xe0] sm:$0xff] }
 0x320   : > { %2937 = vst [vmem:[#allocation3 + $0x1b0] sm:$0xff] %v9065_v32  ;;  %v6842_v61 = vpop.f32.mrb[156].mxu1  ;;  %v8543_v32 = vpack.c.bf16 %v3149_v34, %v3148_v63  ;;  %v3085_v34 = vld [vmem:[#allocation3 + $0xd1] sm:$0xff] }
 0x321   : > { %v8531_v7 = vadd.f32 %v7148_v26, %v6842_v61  ;;  %v2737_v19 = vpop.f32.mrb[157].mxu1  ;;  %v7150_v26 = vld [vmem:[%s7385_s8 + $0xf8] sm:$0xff]  ;;  %s161_s8 = sand.u32 1, %s7207_s13  }
 0x322   : > { %v8540_v41 = vadd.f32 %v7149_v15, %v2737_v19  ;;  %v6843_v62 = vpop.f32.mrb[158].mxu1  ;;  %4321 = vmatmul.mubr.bf16.gmra.mrb[184].mxu0 %v8508_v46  ;;  %v3084_v15 = vld [vmem:[#allocation3 + $0xc9] sm:$0xff]  ;;  %s5590_s4 = sshll.u32 %s161_s8, 8  ;;  %s9016_s16 = scalar_lea.sflag [#allocation6], %s161_s8 }
 0x323   : > { %9109 = vst [vmem:[#allocation25_spill] sm:$0xff] %v8531_v7  ;;  %v2910_v61 = vmax.f32 %v8531_v7, 0.0  ;;  %v8547_v38 = vadd.f32 %v7150_v26, %v6843_v62  ;;  %v2740_v59 = vpop.f32.mrb[159].mxu1  ;;  %4474 = vmatmul.mubr.bf16.gmra.mrb[180].mxu1 %v8533_v25  ;;  %4328 = vmatprep.mubr.bf16.mxu0 %v3047_v10  ;;  %v3151_v19 = vld [vmem:[#allocation3 + $0x10f] sm:$0xff]  ;;  %v8561_v10 = vpack.c.bf16 %v3085_v34, %v3084_v15  ;;  %v3150_v26 = vld [vmem:[#allocation3 + $0x107] sm:$0xff]  ;;  %s8943_s5 = scalar_lea.vmem [#allocation5], %s5590_s4 }
 0x324   : > { %9110 = vst [vmem:[#allocation26_spill] sm:$0xff] %v8540_v41  ;;  %v9068_v13 = vmax.f32 %v8540_v41, 0.0  ;;  %v8552_v14 = vadd.f32 %v7151_v18, %v2740_v59  ;;  %4481 = vmatprep.mubr.bf16.mxu1 %v8543_v32  ;;  %v8568_v59 = vpack.c.bf16 %v3151_v19, %v3150_v26  ;;  %v3086_v18 = vld [vmem:[#allocation3 + $0xe9] sm:$0xff]  ;;  %v3095_v7 = vld [vmem:[#allocation3 + $0x171] sm:$0xff]  ;;  %s5524_s7 = sshll.u32 %s8943_s5, 4  ;;  %s9009_s7 = int_to_ptr.vmem [resolvable:$true] %s5524_s7 }
 0x325   : > { %9111 = vst [vmem:[#allocation27_spill] sm:$0xff] %v8547_v38  ;;  %2942 = vst [vmem:[#allocation3 + $0x208] sm:$0xff] %v2910_v61  ;;  %v2911_v63 = vmax.f32 %v8547_v38, 0.0  ;;  %v3048_v61 = vpack.c.bf16 %v2895_v56, %v2894_v3  ;;  %v3049_v3 = vpack.c.bf16 %v2897_v54, %v2896_v12  ;;  %v3152_v56 = vld [vmem:[#allocation3 + $0x127] sm:$0xff]  ;;  %v3155_v26 = vld [vmem:[#allocation3 + $0x14f] sm:$0xff]  ;;  %v3050_v12 = vpack.c.bf16 %v2899_v23, %v2898_v42  ;;  %s7153_s17 = scalar_lea.vmem %s9009_s7, 4096  ;;  %p7160_p0 = scmp.lt.s32.totalorder %s9009_s7, %s7158_s20 }
 0x326   : > { %9112 = vst [vmem:[#allocation28_spill] sm:$0xff] %v8552_v14  ;;  %2940 = vst [vmem:[#allocation3 + $0x1e8] sm:$0xff] %v9068_v13  ;;  %v9067_v62 = vmax.f32 %v8552_v14, 0.0  ;;  %v3088_v19 = vld [vmem:[#allocation3 + $0x109] sm:$0xff]  ;;  %v3051_v42 = vpack.c.bf16 %v2901_v5, %v2900_v57  ;;  %v9114_v13 = vmax.f32 %v8474_v51, 0.0  ;;  %p7154_p11 = scmp.ne.s32.totalorder %s9009_s7, %s7153_s17  ;;  %p7161_p1 = scmp.lt.s32.totalorder %s7159_s24, %s7153_s17 }
 0x327   : > { %2943 = vst [vmem:[#allocation3 + $0x210] sm:$0xff] %v2911_v63  ;;  %v3087_v63 = vld [vmem:[#allocation3 + $0xf1] sm:$0xff]  ;;  %v3154_v54 = vld [vmem:[#allocation3 + $0x147] sm:$0xff] }
 0x328   : > { %2941 = vst [vmem:[#allocation3 + $0x1f0] sm:$0xff] %v9067_v62  ;;  %v3153_v62 = vld [vmem:[#allocation3 + $0x12f] sm:$0xff]  ;;  %v8572_v15 = vpack.c.bf16 %v3087_v63, %v3086_v18  ;;  %v3156_v23 = vld [vmem:[#allocation3 + $0x167] sm:$0xff]  ;;  %p7155_p12 = pnand %p7154_p11, %p7280_p5  ;;  %p7162_p2 = por %p7161_p1, %p7160_p0 }
 0x329   : > { %v8579_v34 = vpack.c.bf16 %v3153_v62, %v3152_v56  ;;  %v8590_v62 = vpack.c.bf16 %v3155_v26, %v3154_v54  ;;  %v3090_v63 = vld [vmem:[#allocation3 + $0x129] sm:$0xff] }
 0x32a   : > { %4329 = vmatmul.mubr.bf16.gmra.mrb[188].mxu0 %v8543_v32  ;;  %v3157_v56 = vld [vmem:[#allocation3 + $0x16f] sm:$0xff]  ;;  %v3158_v5 = vld [vmem:[#allocation3 + $0x187] sm:$0xff]  ;;  %p7156_p13 = pneg %p7155_p12 }
 0x32b   : > { %4482 = vmatmul.mubr.bf16.gmra.mrb[184].mxu1 %v8561_v10  ;;  %4336 = vmatprep.mubr.bf16.mxu0 %v3048_v61  ;;  %v3089_v61 = vld [vmem:[#allocation3 + $0x111] sm:$0xff]  ;;  %v3092_v26 = vld [vmem:[#allocation3 + $0x149] sm:$0xff] }
 0x32c   : > { %4489 = vmatprep.mubr.bf16.mxu1 %v8568_v59  ;;  %v8583_v18 = vpack.c.bf16 %v3089_v61, %v3088_v19  ;;  %v8601_v61 = vpack.c.bf16 %v3157_v56, %v3156_v23  ;;  %v3159_v54 = vld [vmem:[#allocation3 + $0x18f] sm:$0xff]  ;;  %v3160_v9 = vld [vmem:[#allocation3 + $0x1a7] sm:$0xff]  ;;  %p7163_p3 = pnand %p7162_p2, %p7156_p13 }
 0x32d   : > { %v8612_v56 = vpack.c.bf16 %v3159_v54, %v3158_v5  ;;  %v3161_v51 = vld [vmem:[#allocation3 + $0x1af] sm:$0xff]  ;;  %v9115_v54 = vmax.f32 %v8505_v8, 0.0  ;;  %v9116_v5 = vmax.f32 %v8517_v4, 0.0 }
 0x32e   : > { %v3167_v8 = vld [vmem:[#allocation3 + $0x20f] sm:$0xff] }
 0x32f   : > { %v3165_v4 = vld [vmem:[#allocation3 + $0x1ef] sm:$0xff] }
 0x332   : > { %4337 = vmatmul.mubr.bf16.gmra.mrb[192].mxu0 %v8568_v59 }
 0x333   : > { %4490 = vmatmul.mubr.bf16.gmra.mrb[188].mxu1 %v8572_v15  ;;  %4344 = vmatprep.mubr.bf16.mxu0 %v3049_v3  ;;  %v3091_v3 = vld [vmem:[#allocation3 + $0x131] sm:$0xff] }
 0x334   : > { %4497 = vmatprep.mubr.bf16.mxu1 %v8579_v34  ;;  %v8594_v19 = vpack.c.bf16 %v3091_v3, %v3090_v63  ;;  %v9113_v3 = vmax.f32 %v8456_v2, 0.0  ;;  %v8627_v2 = vpack.c.bf16 %v3161_v51, %v3160_v9  ;;  %v3098_v51 = vld [vmem:[#allocation3 + $0x1a9] sm:$0xff] }
 0x336   : > { %v3052_v57 = vpack.c.bf16 %v9114_v13, %v9113_v3 }
 0x33a   : > { %4345 = vmatmul.mubr.bf16.gmra.mrb[196].mxu0 %v8579_v34 }
 0x33b   : > { %4498 = vmatmul.mubr.bf16.gmra.mrb[192].mxu1 %v8583_v18  ;;  %4352 = vmatprep.mubr.bf16.mxu0 %v3050_v12  ;;  %v3093_v12 = vld [vmem:[#allocation3 + $0x151] sm:$0xff] }
 0x33c   : > { %4505 = vmatprep.mubr.bf16.mxu1 %v8590_v62  ;;  %v8605_v63 = vpack.c.bf16 %v3093_v12, %v3092_v26  ;;  %v3094_v12 = vld [vmem:[#allocation3 + $0x169] sm:$0xff] }
 0x33d   : > { %v8620_v3 = vpack.c.bf16 %v3095_v7, %v3094_v12  ;;  %v9118_v12 = vmax.f32 %v8512_v30, 0.0  ;;  %v9120_v30 = vmax.f32 %v8552_v14, 0.0 }
 0x342   : > { %4353 = vmatmul.mubr.bf16.gmra.mrb[200].mxu0 %v8590_v62 }
 0x343   : > { %4506 = vmatmul.mubr.bf16.gmra.mrb[196].mxu1 %v8594_v19  ;;  %4360 = vmatprep.mubr.bf16.mxu0 %v3051_v42  ;;  %v6286_v42 = vpop.f32.mrb[160].mxu0 }
 0x344   : > { %4513 = vmatprep.mubr.bf16.mxu1 %v8601_v61  ;;  %v6287_v23 = vpop.f32.mrb[161].mxu0 }
 0x345   : > { %v8616_v38 = vadd.f32 %v6287_v23, %v6286_v42  ;;  %v6289_v26 = vpop.f32.mrb[162].mxu0  ;;  %v3096_v42 = vld [vmem:[#allocation3 + $0x189] sm:$0xff] }
 0x346   : > { %v6290_v47 = vpop.f32.mrb[163].mxu0  ;;  %v3163_v23 = vld [vmem:[#allocation3 + $0x1cf] sm:$0xff] }
 0x347   : > { %v8618_v13 = vadd.f32 %v6290_v47, %v6289_v26  ;;  %v3097_v47 = vld [vmem:[#allocation3 + $0x191] sm:$0xff]  ;;  %v9117_v26 = vmax.f32 %v8496_v31, 0.0 }
 0x348   : > { %v8631_v7 = vpack.c.bf16 %v3097_v47, %v3096_v42  ;;  %v9119_v47 = vmax.f32 %v8540_v41, 0.0 }
 0x34a   : > { %4361 = vmatmul.mubr.bf16.gmra.mrb[204].mxu0 %v8601_v61 }
 0x34b   : > { %4514 = vmatmul.mubr.bf16.gmra.mrb[200].mxu1 %v8605_v63  ;;  %4368 = vmatprep.mubr.bf16.mxu0 %v3052_v57  ;;  %v3053_v57 = vpack.c.bf16 %v9116_v5, %v9115_v54  ;;  %v3054_v54 = vpack.c.bf16 %v9118_v12, %v9117_v26  ;;  %v3162_v5 = vld [vmem:[#allocation3 + $0x1c7] sm:$0xff]  ;;  %v3055_v26 = vpack.c.bf16 %v9120_v30, %v9119_v47  ;;  %v3201_v30 = vld [vmem:[#allocation3 + $0x30] sm:$0xff] }
 0x34c   : > { %4521 = vmatprep.mubr.bf16.mxu1 %v8612_v56  ;;  %v8638_v9 = vpack.c.bf16 %v3163_v23, %v3162_v5  ;;  %v3164_v12 = vld [vmem:[#allocation3 + $0x1e7] sm:$0xff]  ;;  %v3101_v5 = vld [vmem:[#allocation3 + $0x1d1] sm:$0xff] }
 0x34d   : > { %v8649_v23 = vpack.c.bf16 %v3165_v4, %v3164_v12  ;;  %v3102_v4 = vld [vmem:[#allocation3 + $0x1e9] sm:$0xff]  ;;  %v3103_v47 = vld [vmem:[#allocation3 + $0x1f1] sm:$0xff] }
 0x34e   : > { %v3393_v12 = vld [vmem:[#allocation3 + $0x50] sm:$0xff]  ;;  %v8661_v31 = vpack.c.bf16 %v3103_v47, %v3102_v4  ;;  %v3396_v47 = vld [vmem:[#allocation3 + $0x88] sm:$0xff] }
 0x352   : > { %4369 = vmatmul.mubr.bf16.gmra.mrb[208].mxu0 %v8612_v56 }
 0x353   : > { %4522 = vmatmul.mubr.bf16.gmra.mrb[204].mxu1 %v8620_v3  ;;  %4376 = vmatprep.mubr.bf16.mxu0 %v3053_v57  ;;  %v3099_v57 = vld [vmem:[#allocation3 + $0x1b1] sm:$0xff] }
 0x354   : > { %4529 = vmatprep.mubr.bf16.mxu1 %v8627_v2  ;;  %v8642_v42 = vpack.c.bf16 %v3099_v57, %v3098_v51  ;;  %v3166_v57 = vld [vmem:[#allocation3 + $0x207] sm:$0xff] }
 0x355   : > { %v8656_v14 = vpack.c.bf16 %v3167_v8, %v3166_v57  ;;  %v7109_v8 = vld [vmem:[%s9058_s1 + $0x208] sm:$0xff]   ;;  %v3395_v57 = vld [vmem:[#allocation3 + $0x70] sm:$0xff] }
 0x35a   : > { %4377 = vmatmul.mubr.bf16.gmra.mrb[212].mxu0 %v8627_v2 }
 0x35b   : > { %4530 = vmatmul.mubr.bf16.gmra.mrb[208].mxu1 %v8631_v7  ;;  %4384 = vmatprep.mubr.bf16.mxu0 %v3054_v54  ;;  %v3100_v54 = vld [vmem:[#allocation3 + $0x1c9] sm:$0xff] }
 0x35c   : > { %4537 = vmatprep.mubr.bf16.mxu1 %v8638_v9  ;;  %v8653_v51 = vpack.c.bf16 %v3101_v5, %v3100_v54  ;;  %v3392_v54 = vld [vmem:[#allocation3 + $0x48] sm:$0xff] }
 0x35d   : > { %v3424_v5 = vpack.c.bf16 %v3393_v12, %v3392_v54  ;;  %v7115_v54 = vld [vmem:[%s9058_s1 + $0x238] sm:$0xff]  }
 0x362   : > { %4385 = vmatmul.mubr.bf16.gmra.mrb[216].mxu0 %v8638_v9 }
 0x363   : > { %4538 = vmatmul.mubr.bf16.gmra.mrb[212].mxu1 %v8642_v42  ;;  %4392 = vmatprep.mubr.bf16.mxu0 %v3055_v26  ;;  %v3200_v26 = vld [vmem:[#allocation3 + $0x28] sm:$0xff] }
 0x364   : > { %4545 = vmatprep.mubr.bf16.mxu1 %v8649_v23  ;;  %v3232_v41 = vpack.c.bf16 %v3201_v30, %v3200_v26  ;;  %v3394_v30 = vld [vmem:[#allocation3 + $0x68] sm:$0xff] }
 0x365   : > { %v3425_v4 = vpack.c.bf16 %v3395_v57, %v3394_v30  ;;  %v7113_v26 = vld [vmem:[%s9058_s1 + $0x228] sm:$0xff]  }
 0x366   : > { %v3402_v30 = vld [vmem:[#allocation3 + $0xe8] sm:$0xff] }
 0x36a   : > { %4393 = vmatmul.mubr.bf16.gmra.mrb[220].mxu0 %v8649_v23 }
 0x36b   : > { %4546 = vmatmul.mubr.bf16.gmra.mrb[216].mxu1 %v8653_v51  ;;  %4594 = vmatprep.mubr.bf16.mxu0 %v8368_v35  ;;  %v7110_v35 = vld [vmem:[%s9058_s1 + $0x210] sm:$0xff]  }
 0x36c   : > { %4553 = vmatprep.mubr.bf16.mxu1 %v8656_v14 }
 0x372   : > { %4595 = vmatmul.mubr.bf16.vlgmr.msra.gmra.mrb[224].mxu0 %v3232_v41  ;;  %v7111_v41 = vld [vmem:[%s9058_s1 + $0x218] sm:$0xff]  }
 0x373   : > { %4554 = vmatmul.mubr.bf16.gmra.mrb[220].mxu1 %v8661_v31  ;;  %4602 = vmatprep.mubr.bf16.mxu0 %v8411_v6  ;;  %v3397_v6 = vld [vmem:[#allocation3 + $0x90] sm:$0xff] }
 0x374   : > { %4755 = vmatprep.mubr.bf16.mxu1 %v3424_v5  ;;  %6845 = vmatpush3.bf16.msra.mxu0 %v8309_v50  ;;  %v7112_v50 = vld [vmem:[%s9058_s1 + $0x220] sm:$0xff]   ;;  %v3426_v12 = vpack.c.bf16 %v3397_v6, %v3396_v47 }
 0x375   : > { %6846 = vmatprep.subr.bf16.mxu0 %v7109_v8 }
 0x378   : > { %6847 = vmatpush3.bf16.msra.mxu0 %v7109_v8 }
 0x379   : > { %6848 = vmatprep.subr.bf16.mxu0 %v7110_v35 }
 0x37a   : > { %4603 = vmatmul.mubr.bf16.gmra.mrb[228].mxu0 %v3424_v5 }
 0x37b   : > { %4756 = vmatmul.mubr.bf16.vlgmr.msra.gmra.mrb[224].mxu1 %v8334_v16  ;;  %4610 = vmatprep.mubr.bf16.mxu0 %v8458_v60  ;;  %v7114_v16 = vld [vmem:[%s9058_s1 + $0x230] sm:$0xff]   ;;  %v3398_v60 = vld [vmem:[#allocation3 + $0xa8] sm:$0xff] }
 0x37c   : > { %4763 = vmatprep.mubr.bf16.mxu1 %v3425_v4  ;;  %6849 = vmatpush3.bf16.msra.mxu0 %v7110_v35  ;;  %v3427_v8 = vpack.c.bf16 %v8357_v33, %v3398_v60  ;;  %v3400_v35 = vld [vmem:[#allocation3 + $0xc8] sm:$0xff]  ;;  %v3403_v33 = vld [vmem:[#allocation3 + $0xf0] sm:$0xff] }
 0x37d   : > { %6850 = vmatprep.subr.bf16.mxu0 %v7111_v41 }
 0x380   : > { %6851 = vmatpush3.bf16.msra.mxu0 %v7111_v41  ;;  %v3404_v41 = vld [vmem:[#allocation3 + $0x108] sm:$0xff] }
 0x381   : > { %6852 = vmatprep.subr.bf16.mxu0 %v7112_v50 }
 0x382   : > { %4611 = vmatmul.mubr.bf16.gmra.mrb[232].mxu0 %v3425_v4 }
 0x383   : > { %4764 = vmatmul.mubr.bf16.gmra.mrb[228].mxu1 %v8377_v43  ;;  %4618 = vmatprep.mubr.bf16.mxu0 %v8498_v0  ;;  %v3209_v43 = vld [vmem:[#allocation3 + $0xb0] sm:$0xff] }
 0x384   : > { %4771 = vmatprep.mubr.bf16.mxu1 %v3426_v12  ;;  %6853 = vmatpush3.bf16.msra.mxu0 %v7112_v50  ;;  %v3401_v0 = vld [vmem:[#allocation3 + $0xd0] sm:$0xff]  ;;  %v3236_v5 = vpack.c.bf16 %v3209_v43, %v3398_v60 }
 0x385   : > { %6854 = vmatprep.subr.bf16.mxu0 %v7113_v26  ;;  %v3428_v57 = vpack.c.bf16 %v3401_v0, %v3400_v35  ;;  %v3417_v43 = vld [vmem:[#allocation3 + $0x1d0] sm:$0xff] }
 0x388   : > { %6855 = vmatpush3.bf16.msra.mxu0 %v7113_v26 }
 0x389   : > { %6856 = vmatprep.subr.bf16.mxu0 %v7114_v16 }
 0x38a   : > { %4619 = vmatmul.mubr.bf16.gmra.mrb[236].mxu0 %v3426_v12 }
 0x38b   : > { %4772 = vmatmul.mubr.bf16.gmra.mrb[232].mxu1 %v8424_v1  ;;  %4626 = vmatprep.mubr.bf16.mxu0 %v8533_v25  ;;  %v3429_v1 = vpack.c.bf16 %v3403_v33, %v3402_v30  ;;  %v3405_v25 = vld [vmem:[#allocation3 + $0x110] sm:$0xff]  ;;  %v7116_v30 = vld [vmem:[%s9059_s2] sm:$0xff]  }
 0x38c   : > { %4779 = vmatprep.mubr.bf16.mxu1 %v3427_v8  ;;  %6857 = vmatpush3.bf16.msra.mxu0 %v7114_v16  ;;  %v3430_v4 = vpack.c.bf16 %v3405_v25, %v3404_v41 }
 0x38d   : > { %6858 = vmatprep.subr.bf16.mxu0 %v7115_v54  ;;  %6892 = vmatprep.subr.bf16.mxu1 %v7116_v30 }
 0x38e   : > { %6893 = vmatpush3.bf16.msra.mxu1 %v7116_v30 }
 0x390   : > { %6859 = vmatpush3.bf16.msra.mxu0 %v7115_v54 }
 0x392   : > { %4627 = vmatmul.mubr.bf16.gmra.mrb[240].mxu0 %v3236_v5 }
 0x393   : > { %4780 = vmatmul.mubr.bf16.gmra.mrb[236].mxu1 %v8470_v52  ;;  %4634 = vmatprep.mubr.bf16.mxu0 %v8561_v10  ;;  %v3407_v52 = vld [vmem:[#allocation3 + $0x130] sm:$0xff]  ;;  %v3406_v10 = vld [vmem:[#allocation3 + $0x128] sm:$0xff] }
 0x394   : > { %4787 = vmatprep.mubr.bf16.mxu1 %v3428_v57  ;;  %v3431_v50 = vpack.c.bf16 %v3407_v52, %v3406_v10 }
 0x39a   : > { %4635 = vmatmul.mubr.bf16.gmra.mrb[244].mxu0 %v3428_v57  ;;  %v3416_v57 = vld [vmem:[#allocation3 + $0x1c8] sm:$0xff] }
 0x39b   : > { %4788 = vmatmul.mubr.bf16.gmra.mrb[240].mxu1 %v8508_v46  ;;  %4642 = vmatprep.mubr.bf16.mxu0 %v8572_v15  ;;  %v3409_v46 = vld [vmem:[#allocation3 + $0x150] sm:$0xff]  ;;  %v3408_v15 = vld [vmem:[#allocation3 + $0x148] sm:$0xff] }
 0x39c   : > { %4795 = vmatprep.mubr.bf16.mxu1 %v3429_v1  ;;  %v3432_v6 = vpack.c.bf16 %v3409_v46, %v3408_v15 }
 0x3a2   : > { %4643 = vmatmul.mubr.bf16.gmra.mrb[248].mxu0 %v3429_v1 }
 0x3a3   : > { %4796 = vmatmul.mubr.bf16.gmra.mrb[244].mxu1 %v8543_v32  ;;  %4650 = vmatprep.mubr.bf16.mxu0 %v8583_v18  ;;  %v3411_v32 = vld [vmem:[#allocation3 + $0x170] sm:$0xff]  ;;  %v3410_v18 = vld [vmem:[#allocation3 + $0x168] sm:$0xff] }
 0x3a4   : > { %4803 = vmatprep.mubr.bf16.mxu1 %v3430_v4  ;;  %v3433_v47 = vpack.c.bf16 %v3411_v32, %v3410_v18  ;;  %v3418_v32 = vld [vmem:[#allocation3 + $0x1e8] sm:$0xff] }
 0x3aa   : > { %4651 = vmatmul.mubr.bf16.gmra.mrb[252].mxu0 %v3430_v4 }
 0x3ab   : > { %4804 = vmatmul.mubr.bf16.gmra.mrb[248].mxu1 %v8568_v59  ;;  %4658 = vmatprep.mubr.bf16.mxu0 %v8594_v19  ;;  %v3413_v59 = vld [vmem:[#allocation3 + $0x190] sm:$0xff]  ;;  %v3412_v19 = vld [vmem:[#allocation3 + $0x188] sm:$0xff] }
 0x3ac   : > { %4811 = vmatprep.mubr.bf16.mxu1 %v3431_v50  ;;  %v3434_v26 = vpack.c.bf16 %v3413_v59, %v3412_v19 }
 0x3b2   : > { %4659 = vmatmul.mubr.bf16.gmra.mrb[0].mxu0 %v3431_v50  ;;  %v3419_v50 = vld [vmem:[#allocation3 + $0x1f0] sm:$0xff] }
 0x3b3   : > { %4812 = vmatmul.mubr.bf16.gmra.mrb[252].mxu1 %v8579_v34  ;;  %4666 = vmatprep.mubr.bf16.mxu0 %v8605_v63  ;;  %v3415_v34 = vld [vmem:[#allocation3 + $0x1b0] sm:$0xff]  ;;  %v3414_v63 = vld [vmem:[#allocation3 + $0x1a8] sm:$0xff] }
 0x3b4   : > { %4819 = vmatprep.mubr.bf16.mxu1 %v3432_v6  ;;  %v3435_v12 = vpack.c.bf16 %v3415_v34, %v3414_v63  ;;  %v3294_v63 = vld [vmem:[#allocation3 + $0x209] sm:$0xff] }
 0x3ba   : > { %4667 = vmatmul.mubr.bf16.gmra.mrb[4].mxu0 %v3432_v6 }
 0x3bb   : > { %4820 = vmatmul.mubr.bf16.gmra.mrb[0].mxu1 %v8590_v62  ;;  %4674 = vmatprep.mubr.bf16.mxu0 %v8620_v3 }
 0x3bc   : > { %4827 = vmatprep.mubr.bf16.mxu1 %v3433_v47 }
 0x3c2   : > { %4675 = vmatmul.mubr.bf16.gmra.mrb[8].mxu0 %v3433_v47  ;;  %v3437_v47 = vpack.c.bf16 %v3419_v50, %v3418_v32 }
 0x3c3   : > { %4828 = vmatmul.mubr.bf16.gmra.mrb[4].mxu1 %v8601_v61  ;;  %4682 = vmatprep.mubr.bf16.mxu0 %v8631_v7 }
 0x3c4   : > { %4835 = vmatprep.mubr.bf16.mxu1 %v3434_v26 }
 0x3ca   : > { %4683 = vmatmul.mubr.bf16.gmra.mrb[12].mxu0 %v3434_v26 }
 0x3cb   : > { %4836 = vmatmul.mubr.bf16.gmra.mrb[8].mxu1 %v8612_v56  ;;  %4690 = vmatprep.mubr.bf16.mxu0 %v8642_v42  ;;  %v3436_v42 = vpack.c.bf16 %v3417_v43, %v3416_v57 }
 0x3cc   : > { %4843 = vmatprep.mubr.bf16.mxu1 %v3435_v12 }
 0x3cd   : > { %v6292_v62 = vpop.f32.mrb[164].mxu0 }
 0x3ce   : > { %v6398_v3 = vpop.f32.mrb[160].mxu1  ;;  %v6293_v16 = vpop.f32.mrb[165].mxu0 }
 0x3cf   : > { %v6294_v60 = vadd.f32 %v6293_v16, %v6292_v62  ;;  %v6399_v54 = vpop.f32.mrb[161].mxu1  ;;  %v6295_v8 = vpop.f32.mrb[166].mxu0 }
 0x3d0   : > { %v6400_v61 = vadd.f32 %v6399_v54, %v6398_v3  ;;  %v6401_v0 = vpop.f32.mrb[162].mxu1  ;;  %v6296_v7 = vpop.f32.mrb[167].mxu0 }
 0x3d1   : > { %v6297_v5 = vadd.f32 %v6296_v7, %v6295_v8  ;;  %v6402_v35 = vpop.f32.mrb[163].mxu1 }
 0x3d2   : > { %v8711_v33 = vadd.f32 %v6400_v61, %v8616_v38  ;;  %v6403_v56 = vadd.f32 %v6402_v35, %v6401_v0  ;;  %4691 = vmatmul.mubr.bf16.gmra.mrb[16].mxu0 %v3435_v12  ;;  %v3295_v12 = vld [vmem:[#allocation3 + $0x211] sm:$0xff] }
 0x3d3   : > { %4844 = vmatmul.mubr.bf16.gmra.mrb[12].mxu1 %v8627_v2  ;;  %4698 = vmatprep.mubr.bf16.mxu0 %v8653_v51 }
 0x3d4   : > { %v8719_v1 = vadd.f32 %v6403_v56, %v8618_v13  ;;  %4851 = vmatprep.mubr.bf16.mxu1 %v3436_v42 }
 0x3d5   : > { %v6298_v25 = vpop.f32.mrb[168].mxu0 }
 0x3d6   : > { %v6404_v41 = vpop.f32.mrb[164].mxu1  ;;  %v6299_v38 = vpop.f32.mrb[169].mxu0 }
 0x3d7   : > { %v6300_v4 = vadd.f32 %v6299_v38, %v6298_v25  ;;  %v6405_v52 = vpop.f32.mrb[165].mxu1  ;;  %v6301_v10 = vpop.f32.mrb[170].mxu0  ;;  %v3456_v25 = vld [vmem:[#allocation3 + $0x49] sm:$0xff] }
 0x3d8   : > { %v6406_v2 = vadd.f32 %v6405_v52, %v6404_v41  ;;  %v6407_v46 = vpop.f32.mrb[166].mxu1  ;;  %v6302_v51 = vpop.f32.mrb[171].mxu0  ;;  %v3457_v41 = vld [vmem:[#allocation3 + $0x51] sm:$0xff] }
 0x3d9   : > { %v6303_v15 = vadd.f32 %v6302_v51, %v6301_v10  ;;  %v6408_v6 = vpop.f32.mrb[167].mxu1  ;;  %v3488_v32 = vpack.c.bf16 %v3457_v41, %v3456_v25 }
 0x3da   : > { %v8721_v18 = vadd.f32 %v6406_v2, %v6294_v60  ;;  %v6409_v13 = vadd.f32 %v6408_v6, %v6407_v46  ;;  %4699 = vmatmul.mubr.bf16.gmra.mrb[20].mxu0 %v3436_v42  ;;  %v3421_v60 = vld [vmem:[#allocation3 + $0x210] sm:$0xff]  ;;  %v7152_v46 = vld [vmem:[#allocation3 + $0x8] sm:$0xff] }
 0x3db   : > { %4852 = vmatmul.mubr.bf16.gmra.mrb[16].mxu1 %v8638_v9  ;;  %4706 = vmatprep.mubr.bf16.mxu0 %v8661_v31  ;;  %v8727_v9 = vpack.c.bf16 %v3295_v12, %v3294_v63  ;;  %v3420_v31 = vld [vmem:[#allocation3 + $0x208] sm:$0xff]  ;;  %v3439_v51 = vpack.c.bf16 %v7152_v46, %v7152_v46  ;;  %v3459_v12 = vld [vmem:[#allocation3 + $0x71] sm:$0xff] }
 0x3dc   : > { %v8725_v59 = vadd.f32 %v6409_v13, %v6297_v5  ;;  %4859 = vmatprep.mubr.bf16.mxu1 %v3437_v47  ;;  %v3438_v35 = vpack.c.bf16 %v3421_v60, %v3420_v31  ;;  %v3458_v63 = vld [vmem:[#allocation3 + $0x69] sm:$0xff] }
 0x3dd   : > { %v6304_v19 = vpop.f32.mrb[172].mxu0  ;;  %v3460_v60 = vld [vmem:[#allocation3 + $0x89] sm:$0xff] }
 0x3de   : > { %v6410_v26 = vpop.f32.mrb[168].mxu1  ;;  %v6305_v34 = vpop.f32.mrb[173].mxu0  ;;  %v3464_v46 = vld [vmem:[#allocation3 + $0xc9] sm:$0xff] }
 0x3df   : > { %v6306_v62 = vadd.f32 %v6305_v34, %v6304_v19  ;;  %v6411_v3 = vpop.f32.mrb[169].mxu1  ;;  %v6307_v16 = vpop.f32.mrb[174].mxu0  ;;  %v3358_v19 = vld [vmem:[#allocation3 + $0x227] sm:$0xff] }
 0x3e0   : > { %v6412_v54 = vadd.f32 %v6411_v3, %v6410_v26  ;;  %v6413_v8 = vpop.f32.mrb[170].mxu1  ;;  %v6308_v43 = vpop.f32.mrb[175].mxu0  ;;  %v3359_v26 = vld [vmem:[#allocation3 + $0x22f] sm:$0xff] }
 0x3e1   : > { %v6309_v61 = vadd.f32 %v6308_v43, %v6307_v16  ;;  %v6414_v0 = vpop.f32.mrb[171].mxu1 }
 0x3e2   : > { %v8729_v7 = vadd.f32 %v6412_v54, %v6300_v4  ;;  %v6415_v5 = vadd.f32 %v6414_v0, %v6413_v8  ;;  %4707 = vmatmul.mubr.bf16.gmra.mrb[24].mxu0 %v3437_v47  ;;  %v3461_v54 = vld [vmem:[#allocation3 + $0x91] sm:$0xff]  ;;  %v3375_v0 = vpack.c.bf16 %v3359_v26, %v3358_v19 }
 0x3e3   : > { %4860 = vmatmul.mubr.bf16.gmra.mrb[20].mxu1 %v8649_v23  ;;  %4714 = vmatprep.mubr.bf16.mxu0 %v8727_v9 }
 0x3e4   : > { %v8733_v57 = vadd.f32 %v6415_v5, %v6303_v15  ;;  %4867 = vmatprep.mubr.bf16.mxu1 %v3438_v35 }
 0x3e5   : > { %v6310_v56 = vpop.f32.mrb[176].mxu0 }
 0x3e6   : > { %v6416_v42 = vpop.f32.mrb[172].mxu1  ;;  %v6311_v30 = vpop.f32.mrb[177].mxu0 }
 0x3e7   : > { %v6312_v38 = vadd.f32 %v6311_v30, %v6310_v56  ;;  %v6417_v52 = vpop.f32.mrb[173].mxu1  ;;  %v6313_v10 = vpop.f32.mrb[178].mxu0 }
 0x3e8   : > { %v6418_v4 = vadd.f32 %v6417_v52, %v6416_v42  ;;  %v6419_v50 = vpop.f32.mrb[174].mxu1  ;;  %v6314_v2 = vpop.f32.mrb[179].mxu0  ;;  %v3490_v42 = vpack.c.bf16 %v3461_v54, %v3460_v60 }
 0x3e9   : > { %v6315_v6 = vadd.f32 %v6314_v2, %v6313_v10  ;;  %v6420_v23 = vpop.f32.mrb[175].mxu1  ;;  %v3462_v10 = vld [vmem:[#allocation3 + $0xa9] sm:$0xff] }
 0x3ea   : > { %v8735_v13 = vadd.f32 %v6418_v4, %v6306_v62  ;;  %v6421_v15 = vadd.f32 %v6420_v23, %v6419_v50  ;;  %4715 = vmatmul.mubr.bf16.gmra.mrb[28].mxu0 %v3438_v35  ;;  %v3489_v35 = vpack.c.bf16 %v3459_v12, %v3458_v63  ;;  %v3463_v4 = vld [vmem:[#allocation3 + $0xb1] sm:$0xff] }
 0x3eb   : > { %4868 = vmatmul.mubr.bf16.gmra.mrb[24].mxu1 %v8656_v14  ;;  %6860 = vmatprep.mubr.bf16.mxu0 %v3488_v32 }
 0x3ec   : > { %v8738_v47 = vadd.f32 %v6421_v15, %v6309_v61  ;;  %4875 = vmatprep.mubr.bf16.mxu1 %v3439_v51  ;;  %v3465_v51 = vld [vmem:[#allocation3 + $0xd1] sm:$0xff] }
 0x3ed   : > { %v6316_v34 = vpop.f32.mrb[180].mxu0 }
 0x3ee   : > { %v6422_v3 = vpop.f32.mrb[176].mxu1  ;;  %v6317_v16 = vpop.f32.mrb[181].mxu0 }
 0x3ef   : > { %v6318_v8 = vadd.f32 %v6317_v16, %v6316_v34  ;;  %v6423_v62 = vpop.f32.mrb[177].mxu1  ;;  %v6319_v43 = vpop.f32.mrb[182].mxu0  ;;  %v3491_v34 = vpack.c.bf16 %v3463_v4, %v3462_v10 }
 0x3f0   : > { %v6424_v31 = vadd.f32 %v6423_v62, %v6422_v3  ;;  %v6425_v5 = vpop.f32.mrb[178].mxu1  ;;  %v6320_v14 = vpop.f32.mrb[183].mxu0  ;;  %v3492_v3 = vpack.c.bf16 %v3465_v51, %v3464_v46  ;;  %v3466_v62 = vld [vmem:[#allocation3 + $0xe9] sm:$0xff] }
 0x3f1   : > { %v6321_v61 = vadd.f32 %v6320_v14, %v6319_v43  ;;  %v6426_v56 = vpop.f32.mrb[179].mxu1  ;;  %v3467_v43 = vld [vmem:[#allocation3 + $0xf1] sm:$0xff] }
 0x3f2   : > { %v8740_v30 = vadd.f32 %v6424_v31, %v6312_v38  ;;  %v6427_v25 = vadd.f32 %v6426_v56, %v6425_v5  ;;  %6861 = vmatmul.mubr.bf16.vlgmr.msra.gmra.mrb[32].mxu0 %v3489_v35  ;;  %v3468_v5 = vld [vmem:[#allocation3 + $0x109] sm:$0xff]  ;;  %v3469_v14 = vld [vmem:[#allocation3 + $0x111] sm:$0xff] }
 0x3f3   : > { %4876 = vmatmul.mubr.bf16.gmra.mrb[28].mxu1 %v3375_v0  ;;  %6864 = vmatprep.mubr.bf16.mxu0 %v3490_v42 }
 0x3f4   : > { %v8742_v41 = vadd.f32 %v6427_v25, %v6315_v6 }
 0x3f5   : > { %v6322_v52 = vpop.f32.mrb[184].mxu0 }
 0x3f6   : > { %v6428_v50 = vpop.f32.mrb[180].mxu1  ;;  %v6323_v2 = vpop.f32.mrb[185].mxu0 }
 0x3f7   : > { %v6324_v23 = vadd.f32 %v6323_v2, %v6322_v52  ;;  %v6429_v32 = vpop.f32.mrb[181].mxu1  ;;  %v6325_v15 = vpop.f32.mrb[186].mxu0  ;;  %v3494_v2 = vpack.c.bf16 %v3469_v14, %v3468_v5 }
 0x3f8   : > { %v6430_v19 = vadd.f32 %v6429_v32, %v6428_v50  ;;  %v6431_v26 = vpop.f32.mrb[182].mxu1  ;;  %v6326_v38 = vpop.f32.mrb[187].mxu0 }
 0x3f9   : > { %v6327_v63 = vadd.f32 %v6326_v38, %v6325_v15  ;;  %v6432_v12 = vpop.f32.mrb[183].mxu1  ;;  %v3470_v15 = vld [vmem:[#allocation3 + $0x129] sm:$0xff] }
 0x3fa   : > { %v8744_v16 = vadd.f32 %v6430_v19, %v6318_v8  ;;  %v6433_v6 = vadd.f32 %v6432_v12, %v6431_v26  ;;  %6865 = vmatmul.mubr.bf16.gmra.mrb[36].mxu0 %v3491_v34  ;;  %v3493_v8 = vpack.c.bf16 %v3467_v43, %v3466_v62  ;;  %v3471_v19 = vld [vmem:[#allocation3 + $0x131] sm:$0xff]  ;;  %v3472_v34 = vld [vmem:[#allocation3 + $0x149] sm:$0xff] }
 0x3fb   : > { %6868 = vmatprep.mubr.bf16.mxu0 %v3492_v3  ;;  %v3473_v12 = vld [vmem:[#allocation3 + $0x151] sm:$0xff] }
 0x3fc   : > { %v8746_v60 = vadd.f32 %v6433_v6, %v6321_v61  ;;  %v3496_v14 = vpack.c.bf16 %v3473_v12, %v3472_v34 }
 0x3fd   : > { %v6328_v54 = vpop.f32.mrb[188].mxu0 }
 0x3fe   : > { %v6434_v0 = vpop.f32.mrb[184].mxu1  ;;  %v6329_v31 = vpop.f32.mrb[189].mxu0 }
 0x3ff   : > { %v6330_v35 = vadd.f32 %v6329_v31, %v6328_v54  ;;  %v6435_v56 = vpop.f32.mrb[185].mxu1  ;;  %v6331_v42 = vpop.f32.mrb[190].mxu0 }
 0x400   : > { %v6436_v25 = vadd.f32 %v6435_v56, %v6434_v0  ;;  %v6437_v52 = vpop.f32.mrb[186].mxu1  ;;  %v6332_v10 = vpop.f32.mrb[191].mxu0 }
 0x401   : > { %v6333_v4 = vadd.f32 %v6332_v10, %v6331_v42  ;;  %v6438_v50 = vpop.f32.mrb[187].mxu1  ;;  %v3475_v10 = vld [vmem:[#allocation3 + $0x171] sm:$0xff] }
 0x402   : > { %v8748_v46 = vadd.f32 %v6436_v25, %v6324_v23  ;;  %v6439_v61 = vadd.f32 %v6438_v50, %v6437_v52  ;;  %6869 = vmatmul.mubr.bf16.gmra.mrb[40].mxu0 %v3493_v8  ;;  %v3495_v23 = vpack.c.bf16 %v3471_v19, %v3470_v15  ;;  %v3474_v52 = vld [vmem:[#allocation3 + $0x169] sm:$0xff] }
 0x403   : > { %6872 = vmatprep.mubr.bf16.mxu0 %v3494_v2  ;;  %v3476_v2 = vld [vmem:[#allocation3 + $0x189] sm:$0xff] }
 0x404   : > { %v8750_v51 = vadd.f32 %v6439_v61, %v6327_v63  ;;  %v3477_v61 = vld [vmem:[#allocation3 + $0x191] sm:$0xff] }
 0x405   : > { %v6334_v32 = vpop.f32.mrb[192].mxu0 }
 0x406   : > { %v6440_v26 = vpop.f32.mrb[188].mxu1  ;;  %v6335_v38 = vpop.f32.mrb[193].mxu0 }
 0x407   : > { %v6336_v3 = vadd.f32 %v6335_v38, %v6334_v32  ;;  %v6441_v6 = vpop.f32.mrb[189].mxu1  ;;  %v6337_v54 = vpop.f32.mrb[194].mxu0 }
 0x408   : > { %v6442_v62 = vadd.f32 %v6441_v6, %v6440_v26  ;;  %v6443_v43 = vpop.f32.mrb[190].mxu1  ;;  %v6338_v0 = vpop.f32.mrb[195].mxu0 }
 0x409   : > { %v6339_v31 = vadd.f32 %v6338_v0, %v6337_v54  ;;  %v6444_v5 = vpop.f32.mrb[191].mxu1  ;;  %v3498_v54 = vpack.c.bf16 %v3477_v61, %v3476_v2 }
 0x40a   : > { %v8752_v56 = vadd.f32 %v6442_v62, %v6330_v35  ;;  %v6445_v63 = vadd.f32 %v6444_v5, %v6443_v43  ;;  %6873 = vmatmul.mubr.bf16.gmra.mrb[44].mxu0 %v3495_v23  ;;  %v3497_v35 = vpack.c.bf16 %v3475_v10, %v3474_v52  ;;  %v7117_v43 = vld [vmem:[%s9059_s2 + $0x8] sm:$0xff]   ;;  %v3481_v10 = vld [vmem:[#allocation3 + $0x1d1] sm:$0xff] }
 0x40b   : > { %6876 = vmatprep.mubr.bf16.mxu0 %v3496_v14  ;;  %v3478_v5 = vld [vmem:[#allocation3 + $0x1a9] sm:$0xff]  ;;  %v3479_v14 = vld [vmem:[#allocation3 + $0x1b1] sm:$0xff]  ;;  %6894 = vmatprep.subr.bf16.mxu1 %v7117_v43 }
 0x40c   : > { %v8754_v42 = vadd.f32 %v6445_v63, %v6333_v4  ;;  %v3480_v52 = vld [vmem:[#allocation3 + $0x1c9] sm:$0xff]  ;;  %6895 = vmatpush3.bf16.msra.mxu1 %v7117_v43  ;;  %v3483_v43 = vld [vmem:[#allocation3 + $0x1f1] sm:$0xff] }
 0x40d   : > { %v6340_v25 = vpop.f32.mrb[196].mxu0 }
 0x40e   : > { %v6446_v8 = vpop.f32.mrb[192].mxu1  ;;  %v6341_v50 = vpop.f32.mrb[197].mxu0 }
 0x40f   : > { %v6342_v32 = vadd.f32 %v6341_v50, %v6340_v25  ;;  %v6447_v26 = vpop.f32.mrb[193].mxu1  ;;  %v6343_v15 = vpop.f32.mrb[198].mxu0 }
 0x410   : > { %v6448_v19 = vadd.f32 %v6447_v26, %v6446_v8  ;;  %v6449_v38 = vpop.f32.mrb[194].mxu1  ;;  %v6344_v34 = vpop.f32.mrb[199].mxu0 }
 0x411   : > { %v6345_v12 = vadd.f32 %v6344_v34, %v6343_v15  ;;  %v6450_v6 = vpop.f32.mrb[195].mxu1  ;;  %v3499_v15 = vpack.c.bf16 %v3479_v14, %v3478_v5 }
 0x412   : > { %v8756_v62 = vadd.f32 %v6448_v19, %v6336_v3  ;;  %v6451_v4 = vadd.f32 %v6450_v6, %v6449_v38  ;;  %6877 = vmatmul.mubr.bf16.gmra.mrb[48].mxu0 %v3497_v35 }
 0x413   : > { %6880 = vmatprep.mubr.bf16.mxu0 %v3498_v54 }
 0x414   : > { %v8761_v0 = vadd.f32 %v6451_v4, %v6339_v31  ;;  %v3500_v31 = vpack.c.bf16 %v3481_v10, %v3480_v52  ;;  %v3482_v4 = vld [vmem:[#allocation3 + $0x1e9] sm:$0xff] }
 0x415   : > { %v6346_v23 = vpop.f32.mrb[200].mxu0 }
 0x416   : > { %v6452_v63 = vpop.f32.mrb[196].mxu1  ;;  %v6347_v25 = vpop.f32.mrb[201].mxu0 }
 0x417   : > { %v6348_v3 = vadd.f32 %v6347_v25, %v6346_v23  ;;  %v6453_v8 = vpop.f32.mrb[197].mxu1  ;;  %v6349_v50 = vpop.f32.mrb[202].mxu0 }
 0x418   : > { %v6454_v2 = vadd.f32 %v6453_v8, %v6452_v63  ;;  %v6455_v61 = vpop.f32.mrb[198].mxu1  ;;  %v6350_v26 = vpop.f32.mrb[203].mxu0 }
 0x419   : > { %v6351_v19 = vadd.f32 %v6350_v26, %v6349_v50  ;;  %v6456_v38 = vpop.f32.mrb[199].mxu1  ;;  %v3501_v50 = vpack.c.bf16 %v3483_v43, %v3482_v4 }
 0x41a   : > { %v8763_v34 = vadd.f32 %v6454_v2, %v6342_v32  ;;  %v6457_v35 = vadd.f32 %v6456_v38, %v6455_v61  ;;  %6881 = vmatmul.mubr.bf16.gmra.mrb[52].mxu0 %v3499_v15  ;;  %v3487_v61 = vld [vmem:[#allocation3 + $0x231] sm:$0xff] }
 0x41b   : > { %6884 = vmatprep.mubr.bf16.mxu0 %v3500_v31 }
 0x41c   : > { %v8765_v6 = vadd.f32 %v6457_v35, %v6345_v12  ;;  %v3486_v12 = vld [vmem:[#allocation3 + $0x229] sm:$0xff] }
 0x41d   : > { %v6352_v54 = vpop.f32.mrb[204].mxu0  ;;  %v3503_v35 = vpack.c.bf16 %v3487_v61, %v3486_v12 }
 0x41e   : > { %v6458_v23 = vpop.f32.mrb[200].mxu1  ;;  %v6353_v25 = vpop.f32.mrb[205].mxu0 }
 0x41f   : > { %v6354_v45 = vadd.f32 %v6353_v25, %v6352_v54  ;;  %v6459_v63 = vpop.f32.mrb[201].mxu1  ;;  %v6355_v8 = vpop.f32.mrb[206].mxu0 }
 0x420   : > { %v6460_v11 = vadd.f32 %v6459_v63, %v6458_v23  ;;  %v6461_v5 = vpop.f32.mrb[202].mxu1  ;;  %v6356_v14 = vpop.f32.mrb[207].mxu0 }
 0x421   : > { %v6357_v52 = vadd.f32 %v6356_v14, %v6355_v8  ;;  %v6462_v32 = vpop.f32.mrb[203].mxu1 }
 0x422   : > { %v8767_v10 = vadd.f32 %v6460_v11, %v6348_v3  ;;  %v6463_v2 = vadd.f32 %v6462_v32, %v6461_v5  ;;  %6885 = vmatmul.mubr.bf16.gmra.mrb[56].mxu0 %v3501_v50 }
 0x423   : > { %6888 = vmatprep.mubr.bf16.mxu0 %v8727_v9 }
 0x424   : > { %v8770_v26 = vadd.f32 %v6463_v2, %v6351_v19 }
 0x425   : > { %v6358_v15 = vpop.f32.mrb[208].mxu0 }
 0x426   : > { %v6464_v38 = vpop.f32.mrb[204].mxu1  ;;  %v6359_v31 = vpop.f32.mrb[209].mxu0 }
 0x427   : > { %v6360_v54 = vadd.f32 %v6359_v31, %v6358_v15  ;;  %v6465_v23 = vpop.f32.mrb[205].mxu1  ;;  %v6361_v25 = vpop.f32.mrb[210].mxu0 }
 0x428   : > { %v6466_v4 = vadd.f32 %v6465_v23, %v6464_v38  ;;  %v6467_v43 = vpop.f32.mrb[206].mxu1  ;;  %v6362_v63 = vpop.f32.mrb[211].mxu0 }
 0x429   : > { %v6363_v11 = vadd.f32 %v6362_v63, %v6361_v25  ;;  %v6468_v3 = vpop.f32.mrb[207].mxu1 }
 0x42a   : > { %v8772_v8 = vadd.f32 %v6466_v4, %v6354_v45  ;;  %v6469_v5 = vadd.f32 %v6468_v3, %v6467_v43  ;;  %6889 = vmatmul.mubr.bf16.gmra.mrb[60].mxu0 %v3503_v35 }
 0x42c   : > { %v8774_v9 = vadd.f32 %v6469_v5, %v6357_v52 }
 0x42d   : > { %v6364_v19 = vpop.f32.mrb[212].mxu0 }
 0x42e   : > { %v6470_v14 = vpop.f32.mrb[208].mxu1  ;;  %v6365_v50 = vpop.f32.mrb[213].mxu0 }
 0x42f   : > { %v6366_v32 = vadd.f32 %v6365_v50, %v6364_v19  ;;  %v6471_v2 = vpop.f32.mrb[209].mxu1  ;;  %v6367_v12 = vpop.f32.mrb[214].mxu0 }
 0x430   : > { %v6472_v61 = vadd.f32 %v6471_v2, %v6470_v14  ;;  %v6473_v15 = vpop.f32.mrb[210].mxu1  ;;  %v6368_v31 = vpop.f32.mrb[215].mxu0 }
 0x431   : > { %v6369_v38 = vadd.f32 %v6368_v31, %v6367_v12  ;;  %v6474_v23 = vpop.f32.mrb[211].mxu1 }
 0x432   : > { %v8776_v49 = vadd.f32 %v6472_v61, %v6360_v54  ;;  %v6475_v25 = vadd.f32 %v6474_v23, %v6473_v15 }
 0x434   : > { %v8778_v45 = vadd.f32 %v6475_v25, %v6363_v11 }
 0x435   : > { %v6370_v4 = vpop.f32.mrb[216].mxu0 }
 0x436   : > { %v6476_v35 = vpop.f32.mrb[212].mxu1  ;;  %v6371_v52 = vpop.f32.mrb[217].mxu0 }
 0x437   : > { %v6372_v43 = vadd.f32 %v6371_v52, %v6370_v4  ;;  %v6477_v63 = vpop.f32.mrb[213].mxu1  ;;  %v6373_v3 = vpop.f32.mrb[218].mxu0 }
 0x438   : > { %v6478_v5 = vadd.f32 %v6477_v63, %v6476_v35  ;;  %v6479_v19 = vpop.f32.mrb[214].mxu1  ;;  %v6374_v50 = vpop.f32.mrb[219].mxu0 }
 0x439   : > { %v6375_v29 = vadd.f32 %v6374_v50, %v6373_v3  ;;  %v6480_v14 = vpop.f32.mrb[215].mxu1 }
 0x43a   : > { %v8780_v2 = vadd.f32 %v6478_v5, %v6366_v32  ;;  %v6481_v12 = vadd.f32 %v6480_v14, %v6479_v19 }
 0x43c   : > { %v8782_v31 = vadd.f32 %v6481_v12, %v6369_v38 }
 0x43d   : > { %v6376_v54 = vpop.f32.mrb[220].mxu0 }
 0x43e   : > { %v6482_v61 = vpop.f32.mrb[216].mxu1  ;;  %v6377_v11 = vpop.f32.mrb[221].mxu0 }
 0x43f   : > { %v6378_v15 = vadd.f32 %v6377_v11, %v6376_v54  ;;  %v6483_v23 = vpop.f32.mrb[217].mxu1  ;;  %v6379_v25 = vpop.f32.mrb[222].mxu0 }
 0x440   : > { %v6484_v17 = vadd.f32 %v6483_v23, %v6482_v61  ;;  %v6485_v4 = vpop.f32.mrb[218].mxu1  ;;  %v6380_v52 = vpop.f32.mrb[223].mxu0 }
 0x441   : > { %v6381_v36 = vadd.f32 %v6380_v52, %v6379_v25  ;;  %v6486_v35 = vpop.f32.mrb[219].mxu1 }
 0x442   : > { %v8784_v63 = vadd.f32 %v6484_v17, %v6372_v43  ;;  %v6487_v3 = vadd.f32 %v6486_v35, %v6485_v4 }
 0x444   : > { %v8786_v50 = vadd.f32 %v6487_v3, %v6375_v29 }
 0x445   : > { %v6510_v32 = vpop.f32.mrb[224].mxu0 }
 0x446   : > { %v6488_v5 = vpop.f32.mrb[220].mxu1  ;;  %v6511_v38 = vpop.f32.mrb[225].mxu0 }
 0x447   : > { %v6489_v19 = vpop.f32.mrb[221].mxu1  ;;  %v6512_v14 = vadd.f32 %v6511_v38, %v6510_v32  ;;  %v6513_v12 = vpop.f32.mrb[226].mxu0 }
 0x448   : > { %v6490_v22 = vadd.f32 %v6489_v19, %v6488_v5  ;;  %v6491_v54 = vpop.f32.mrb[222].mxu1  ;;  %v6514_v11 = vpop.f32.mrb[227].mxu0 }
 0x449   : > { %v4597_v61 = vadd.f32 %v6512_v14, %v8711_v33  ;;  %v6492_v23 = vpop.f32.mrb[223].mxu1  ;;  %v6515_v40 = vadd.f32 %v6514_v11, %v6513_v12 }
 0x44a   : > { %v8789_v25 = vadd.f32 %v6490_v22, %v6378_v15  ;;  %v6493_v17 = vadd.f32 %v6492_v23, %v6491_v54 }
 0x44b   : > { %v4600_v43 = vadd.f32 %v6515_v40, %v8719_v1 }
 0x44c   : > { %v8792_v29 = vadd.f32 %v6493_v17, %v6381_v36 }
 0x44d   : > { %v6516_v4 = vpop.f32.mrb[228].mxu0 }
 0x44e   : > { %v6622_v52 = vpop.f32.mrb[224].mxu1  ;;  %v6517_v35 = vpop.f32.mrb[229].mxu0 }
 0x44f   : > { %v6518_v3 = vadd.f32 %v6517_v35, %v6516_v4  ;;  %v6623_v32 = vpop.f32.mrb[225].mxu1  ;;  %v6519_v38 = vpop.f32.mrb[230].mxu0 }
 0x450   : > { %v6624_v5 = vadd.f32 %v6623_v32, %v6622_v52  ;;  %v6625_v19 = vpop.f32.mrb[226].mxu1  ;;  %v6520_v27 = vpop.f32.mrb[231].mxu0 }
 0x451   : > { %v4605_v33 = vadd.f32 %v6518_v3, %v8721_v18  ;;  %v6521_v14 = vadd.f32 %v6520_v27, %v6519_v38  ;;  %v6626_v12 = vpop.f32.mrb[227].mxu1 }
 0x452   : > { %v6627_v22 = vadd.f32 %v6626_v12, %v6625_v19  ;;  %v8795_v15 = vadd.f32 %v6624_v5, %v4597_v61 }
 0x453   : > { %v4608_v40 = vadd.f32 %v6521_v14, %v8725_v59 }
 0x454   : > { %v8798_v36 = vadd.f32 %v6627_v22, %v4600_v43 }
 0x455   : > { %v6522_v1 = vpop.f32.mrb[232].mxu0 }
 0x456   : > { %v6628_v54 = vpop.f32.mrb[228].mxu1  ;;  %v6523_v11 = vpop.f32.mrb[233].mxu0 }
 0x457   : > { %v6524_v23 = vadd.f32 %v6523_v11, %v6522_v1  ;;  %v6629_v17 = vpop.f32.mrb[229].mxu1  ;;  %v6525_v4 = vpop.f32.mrb[234].mxu0 }
 0x458   : > { %v6630_v52 = vadd.f32 %v6629_v17, %v6628_v54  ;;  %v6631_v35 = vpop.f32.mrb[230].mxu1  ;;  %v6526_v32 = vpop.f32.mrb[235].mxu0 }
 0x459   : > { %v4613_v18 = vadd.f32 %v6524_v23, %v8729_v7  ;;  %v6527_v27 = vadd.f32 %v6526_v32, %v6525_v4  ;;  %v6632_v3 = vpop.f32.mrb[231].mxu1 }
 0x45a   : > { %v6633_v38 = vadd.f32 %v6632_v3, %v6631_v35  ;;  %v8801_v61 = vadd.f32 %v6630_v52, %v4605_v33 }
 0x45b   : > { %v4616_v59 = vadd.f32 %v6527_v27, %v8733_v57 }
 0x45c   : > { %v8804_v43 = vadd.f32 %v6633_v38, %v4608_v40 }
 0x45d   : > { %v6528_v5 = vpop.f32.mrb[236].mxu0 }
 0x45e   : > { %v6634_v19 = vpop.f32.mrb[232].mxu1  ;;  %v6529_v14 = vpop.f32.mrb[237].mxu0 }
 0x45f   : > { %v6530_v12 = vadd.f32 %v6529_v14, %v6528_v5  ;;  %v6635_v22 = vpop.f32.mrb[233].mxu1  ;;  %v6531_v1 = vpop.f32.mrb[238].mxu0 }
 0x460   : > { %v6636_v54 = vadd.f32 %v6635_v22, %v6634_v19  ;;  %v6637_v11 = vpop.f32.mrb[234].mxu1  ;;  %v6532_v17 = vpop.f32.mrb[239].mxu0 }
 0x461   : > { %v4621_v7 = vadd.f32 %v6530_v12, %v8735_v13  ;;  %v6533_v23 = vadd.f32 %v6532_v17, %v6531_v1  ;;  %v6638_v4 = vpop.f32.mrb[235].mxu1 }
 0x462   : > { %v6639_v35 = vadd.f32 %v6638_v4, %v6637_v11  ;;  %v8807_v33 = vadd.f32 %v6636_v54, %v4613_v18 }
 0x463   : > { %v4624_v57 = vadd.f32 %v6533_v23, %v8738_v47 }
 0x464   : > { %v8810_v40 = vadd.f32 %v6639_v35, %v4616_v59 }
 0x465   : > { %v6534_v52 = vpop.f32.mrb[240].mxu0 }
 0x466   : > { %v6640_v32 = vpop.f32.mrb[236].mxu1  ;;  %v6535_v27 = vpop.f32.mrb[241].mxu0 }
 0x467   : > { %v6536_v3 = vadd.f32 %v6535_v27, %v6534_v52  ;;  %v6641_v38 = vpop.f32.mrb[237].mxu1  ;;  %v6537_v5 = vpop.f32.mrb[242].mxu0 }
 0x468   : > { %v6642_v19 = vadd.f32 %v6641_v38, %v6640_v32  ;;  %v6643_v14 = vpop.f32.mrb[238].mxu1  ;;  %v6538_v22 = vpop.f32.mrb[243].mxu0 }
 0x469   : > { %v4629_v13 = vadd.f32 %v6536_v3, %v8740_v30  ;;  %v6539_v12 = vadd.f32 %v6538_v22, %v6537_v5  ;;  %v6644_v1 = vpop.f32.mrb[239].mxu1 }
 0x46a   : > { %v6645_v11 = vadd.f32 %v6644_v1, %v6643_v14  ;;  %v8813_v18 = vadd.f32 %v6642_v19, %v4621_v7 }
 0x46b   : > { %v4632_v47 = vadd.f32 %v6539_v12, %v8742_v41 }
 0x46c   : > { %v8816_v59 = vadd.f32 %v6645_v11, %v4624_v57 }
 0x46d   : > { %v6540_v54 = vpop.f32.mrb[244].mxu0 }
 0x46e   : > { %v6646_v17 = vpop.f32.mrb[240].mxu1  ;;  %v6541_v23 = vpop.f32.mrb[245].mxu0 }
 0x46f   : > { %v6542_v4 = vadd.f32 %v6541_v23, %v6540_v54  ;;  %v6647_v35 = vpop.f32.mrb[241].mxu1  ;;  %v6543_v52 = vpop.f32.mrb[246].mxu0 }
 0x470   : > { %v6648_v32 = vadd.f32 %v6647_v35, %v6646_v17  ;;  %v6649_v27 = vpop.f32.mrb[242].mxu1  ;;  %v6544_v38 = vpop.f32.mrb[247].mxu0 }
 0x471   : > { %v4637_v30 = vadd.f32 %v6542_v4, %v8744_v16  ;;  %v6545_v3 = vadd.f32 %v6544_v38, %v6543_v52  ;;  %v6650_v5 = vpop.f32.mrb[243].mxu1 }
 0x472   : > { %v6651_v14 = vadd.f32 %v6650_v5, %v6649_v27  ;;  %v8819_v7 = vadd.f32 %v6648_v32, %v4629_v13 }
 0x473   : > { %v4640_v41 = vadd.f32 %v6545_v3, %v8746_v60 }
 0x474   : > { %v8822_v57 = vadd.f32 %v6651_v14, %v4632_v47 }
 0x475   : > { %v6546_v19 = vpop.f32.mrb[248].mxu0 }
 0x476   : > { %v6652_v22 = vpop.f32.mrb[244].mxu1  ;;  %v6547_v12 = vpop.f32.mrb[249].mxu0 }
 0x477   : > { %v6548_v1 = vadd.f32 %v6547_v12, %v6546_v19  ;;  %v6653_v11 = vpop.f32.mrb[245].mxu1  ;;  %v6549_v54 = vpop.f32.mrb[250].mxu0 }
 0x478   : > { %v6654_v17 = vadd.f32 %v6653_v11, %v6652_v22  ;;  %v6655_v23 = vpop.f32.mrb[246].mxu1  ;;  %v6550_v35 = vpop.f32.mrb[251].mxu0 }
 0x479   : > { %v4645_v16 = vadd.f32 %v6548_v1, %v8748_v46  ;;  %v6551_v4 = vadd.f32 %v6550_v35, %v6549_v54  ;;  %v6656_v52 = vpop.f32.mrb[247].mxu1 }
 0x47a   : > { %v6657_v27 = vadd.f32 %v6656_v52, %v6655_v23  ;;  %v8825_v13 = vadd.f32 %v6654_v17, %v4637_v30 }
 0x47b   : > { %v4648_v60 = vadd.f32 %v6551_v4, %v8750_v51 }
 0x47c   : > { %v8828_v47 = vadd.f32 %v6657_v27, %v4640_v41 }
 0x47d   : > { %v6552_v32 = vpop.f32.mrb[252].mxu0 }
 0x47e   : > { %v6658_v38 = vpop.f32.mrb[248].mxu1  ;;  %v6553_v3 = vpop.f32.mrb[253].mxu0 }
 0x47f   : > { %v6554_v5 = vadd.f32 %v6553_v3, %v6552_v32  ;;  %v6659_v14 = vpop.f32.mrb[249].mxu1  ;;  %v6555_v19 = vpop.f32.mrb[254].mxu0 }
 0x480   : > { %v6660_v22 = vadd.f32 %v6659_v14, %v6658_v38  ;;  %v6661_v12 = vpop.f32.mrb[250].mxu1  ;;  %v6556_v11 = vpop.f32.mrb[255].mxu0 }
 0x481   : > { %v4653_v46 = vadd.f32 %v6554_v5, %v8752_v56  ;;  %v6557_v1 = vadd.f32 %v6556_v11, %v6555_v19  ;;  %v6662_v54 = vpop.f32.mrb[251].mxu1 }
 0x482   : > { %v6663_v23 = vadd.f32 %v6662_v54, %v6661_v12  ;;  %v8831_v30 = vadd.f32 %v6660_v22, %v4645_v16 }
 0x483   : > { %v4656_v51 = vadd.f32 %v6557_v1, %v8754_v42 }
 0x484   : > { %v8834_v41 = vadd.f32 %v6663_v23, %v4648_v60 }
 0x485   : > { %v6558_v17 = vpop.f32.mrb[0].mxu0 }
 0x486   : > { %v6664_v35 = vpop.f32.mrb[252].mxu1  ;;  %v6559_v4 = vpop.f32.mrb[1].mxu0 }
 0x487   : > { %v6560_v52 = vadd.f32 %v6559_v4, %v6558_v17  ;;  %v6665_v27 = vpop.f32.mrb[253].mxu1  ;;  %v6561_v32 = vpop.f32.mrb[2].mxu0 }
 0x488   : > { %v6666_v38 = vadd.f32 %v6665_v27, %v6664_v35  ;;  %v6667_v3 = vpop.f32.mrb[254].mxu1  ;;  %v6562_v14 = vpop.f32.mrb[3].mxu0 }
 0x489   : > { %v4661_v56 = vadd.f32 %v6560_v52, %v8756_v62  ;;  %v6563_v5 = vadd.f32 %v6562_v14, %v6561_v32  ;;  %v6668_v19 = vpop.f32.mrb[255].mxu1 }
 0x48a   : > { %v6669_v12 = vadd.f32 %v6668_v19, %v6667_v3  ;;  %v8837_v16 = vadd.f32 %v6666_v38, %v4653_v46 }
 0x48b   : > { %v4664_v42 = vadd.f32 %v6563_v5, %v8761_v0 }
 0x48c   : > { %v8840_v60 = vadd.f32 %v6669_v12, %v4656_v51 }
 0x48d   : > { %v6564_v22 = vpop.f32.mrb[4].mxu0 }
 0x48e   : > { %v6670_v11 = vpop.f32.mrb[0].mxu1  ;;  %v6565_v1 = vpop.f32.mrb[5].mxu0 }
 0x48f   : > { %v6566_v54 = vadd.f32 %v6565_v1, %v6564_v22  ;;  %v6671_v23 = vpop.f32.mrb[1].mxu1  ;;  %v6567_v17 = vpop.f32.mrb[6].mxu0 }
 0x490   : > { %v6672_v35 = vadd.f32 %v6671_v23, %v6670_v11  ;;  %v6673_v4 = vpop.f32.mrb[2].mxu1  ;;  %v6568_v27 = vpop.f32.mrb[7].mxu0 }
 0x491   : > { %v4669_v62 = vadd.f32 %v6566_v54, %v8763_v34  ;;  %v6569_v52 = vadd.f32 %v6568_v27, %v6567_v17  ;;  %v6674_v32 = vpop.f32.mrb[3].mxu1 }
 0x492   : > { %v6675_v3 = vadd.f32 %v6674_v32, %v6673_v4  ;;  %v8843_v46 = vadd.f32 %v6672_v35, %v4661_v56 }
 0x493   : > { %v4672_v0 = vadd.f32 %v6569_v52, %v8765_v6 }
 0x494   : > { %v8846_v51 = vadd.f32 %v6675_v3, %v4664_v42 }
 0x495   : > { %v6570_v38 = vpop.f32.mrb[8].mxu0 }
 0x496   : > { %v6676_v14 = vpop.f32.mrb[4].mxu1  ;;  %v6571_v5 = vpop.f32.mrb[9].mxu0 }
 0x497   : > { %v6572_v19 = vadd.f32 %v6571_v5, %v6570_v38  ;;  %v6677_v12 = vpop.f32.mrb[5].mxu1  ;;  %v6573_v22 = vpop.f32.mrb[10].mxu0 }
 0x498   : > { %v6678_v11 = vadd.f32 %v6677_v12, %v6676_v14  ;;  %v6679_v1 = vpop.f32.mrb[6].mxu1  ;;  %v6574_v23 = vpop.f32.mrb[11].mxu0 }
 0x499   : > { %v4677_v34 = vadd.f32 %v6572_v19, %v8767_v10  ;;  %v6575_v54 = vadd.f32 %v6574_v23, %v6573_v22  ;;  %v6680_v17 = vpop.f32.mrb[7].mxu1 }
 0x49a   : > { %v6681_v4 = vadd.f32 %v6680_v17, %v6679_v1  ;;  %v8849_v56 = vadd.f32 %v6678_v11, %v4669_v62 }
 0x49b   : > { %v4680_v6 = vadd.f32 %v6575_v54, %v8770_v26 }
 0x49c   : > { %v8852_v42 = vadd.f32 %v6681_v4, %v4672_v0 }
 0x49d   : > { %v6576_v35 = vpop.f32.mrb[12].mxu0 }
 0x49e   : > { %v6682_v27 = vpop.f32.mrb[8].mxu1  ;;  %v6577_v52 = vpop.f32.mrb[13].mxu0 }
 0x49f   : > { %v6578_v32 = vadd.f32 %v6577_v52, %v6576_v35  ;;  %v6683_v3 = vpop.f32.mrb[9].mxu1  ;;  %v6579_v38 = vpop.f32.mrb[14].mxu0 }
 0x4a0   : > { %v6684_v14 = vadd.f32 %v6683_v3, %v6682_v27  ;;  %v6685_v5 = vpop.f32.mrb[10].mxu1  ;;  %v6580_v12 = vpop.f32.mrb[15].mxu0 }
 0x4a1   : > { %v4685_v10 = vadd.f32 %v6578_v32, %v8772_v8  ;;  %v6581_v19 = vadd.f32 %v6580_v12, %v6579_v38  ;;  %v6686_v22 = vpop.f32.mrb[11].mxu1 }
 0x4a2   : > { %v6687_v1 = vadd.f32 %v6686_v22, %v6685_v5  ;;  %v8855_v62 = vadd.f32 %v6684_v14, %v4677_v34 }
 0x4a3   : > { %v4688_v26 = vadd.f32 %v6581_v19, %v8774_v9 }
 0x4a4   : > { %v8858_v0 = vadd.f32 %v6687_v1, %v4680_v6 }
 0x4a5   : > { %v6582_v11 = vpop.f32.mrb[16].mxu0 }
 0x4a6   : > { %v6688_v23 = vpop.f32.mrb[12].mxu1  ;;  %v6583_v54 = vpop.f32.mrb[17].mxu0 }
 0x4a7   : > { %v6584_v17 = vadd.f32 %v6583_v54, %v6582_v11  ;;  %v6689_v4 = vpop.f32.mrb[13].mxu1  ;;  %v6585_v35 = vpop.f32.mrb[18].mxu0 }
 0x4a8   : > { %v6690_v27 = vadd.f32 %v6689_v4, %v6688_v23  ;;  %v6691_v52 = vpop.f32.mrb[14].mxu1  ;;  %v6586_v3 = vpop.f32.mrb[19].mxu0 }
 0x4a9   : > { %v4693_v8 = vadd.f32 %v6584_v17, %v8776_v49  ;;  %v6587_v32 = vadd.f32 %v6586_v3, %v6585_v35  ;;  %v6692_v38 = vpop.f32.mrb[15].mxu1 }
 0x4aa   : > { %v6693_v5 = vadd.f32 %v6692_v38, %v6691_v52  ;;  %v8861_v34 = vadd.f32 %v6690_v27, %v4685_v10 }
 0x4ab   : > { %v4696_v9 = vadd.f32 %v6587_v32, %v8778_v45 }
 0x4ac   : > { %v8864_v6 = vadd.f32 %v6693_v5, %v4688_v26 }
 0x4ad   : > { %v6588_v14 = vpop.f32.mrb[20].mxu0 }
 0x4ae   : > { %v6694_v12 = vpop.f32.mrb[16].mxu1  ;;  %v6589_v19 = vpop.f32.mrb[21].mxu0 }
 0x4af   : > { %v6590_v22 = vadd.f32 %v6589_v19, %v6588_v14  ;;  %v6695_v1 = vpop.f32.mrb[17].mxu1  ;;  %v6591_v11 = vpop.f32.mrb[22].mxu0 }
 0x4b0   : > { %v6696_v23 = vadd.f32 %v6695_v1, %v6694_v12  ;;  %v6697_v54 = vpop.f32.mrb[18].mxu1  ;;  %v6592_v4 = vpop.f32.mrb[23].mxu0 }
 0x4b1   : > { %v4701_v49 = vadd.f32 %v6590_v22, %v8780_v2  ;;  %v6593_v17 = vadd.f32 %v6592_v4, %v6591_v11  ;;  %v6698_v35 = vpop.f32.mrb[19].mxu1 }
 0x4b2   : > { %v6699_v52 = vadd.f32 %v6698_v35, %v6697_v54  ;;  %v8867_v10 = vadd.f32 %v6696_v23, %v4693_v8 }
 0x4b3   : > { %v4704_v45 = vadd.f32 %v6593_v17, %v8782_v31 }
 0x4b4   : > { %v8870_v26 = vadd.f32 %v6699_v52, %v4696_v9 }
 0x4b5   : > { %v6594_v27 = vpop.f32.mrb[24].mxu0 }
 0x4b6   : > { %v6700_v3 = vpop.f32.mrb[20].mxu1  ;;  %v6595_v32 = vpop.f32.mrb[25].mxu0 }
 0x4b7   : > { %v6596_v38 = vadd.f32 %v6595_v32, %v6594_v27  ;;  %v6701_v5 = vpop.f32.mrb[21].mxu1  ;;  %v6597_v14 = vpop.f32.mrb[26].mxu0 }
 0x4b8   : > { %v6702_v12 = vadd.f32 %v6701_v5, %v6700_v3  ;;  %v6703_v19 = vpop.f32.mrb[22].mxu1  ;;  %v6598_v1 = vpop.f32.mrb[27].mxu0 }
 0x4b9   : > { %v4709_v2 = vadd.f32 %v6596_v38, %v8784_v63  ;;  %v6599_v22 = vadd.f32 %v6598_v1, %v6597_v14  ;;  %v6704_v11 = vpop.f32.mrb[23].mxu1 }
 0x4ba   : > { %v6705_v54 = vadd.f32 %v6704_v11, %v6703_v19  ;;  %v8873_v8 = vadd.f32 %v6702_v12, %v4701_v49 }
 0x4bb   : > { %v4712_v31 = vadd.f32 %v6599_v22, %v8786_v50 }
 0x4bc   : > { %v8876_v9 = vadd.f32 %v6705_v54, %v4704_v45 }
 0x4bd   : > { %v6600_v23 = vpop.f32.mrb[28].mxu0 }
 0x4be   : > { %v6706_v4 = vpop.f32.mrb[24].mxu1  ;;  %v6601_v17 = vpop.f32.mrb[29].mxu0 }
 0x4bf   : > { %v6602_v35 = vadd.f32 %v6601_v17, %v6600_v23  ;;  %v6707_v52 = vpop.f32.mrb[25].mxu1  ;;  %v6603_v27 = vpop.f32.mrb[30].mxu0 }
 0x4c0   : > { %v6708_v3 = vadd.f32 %v6707_v52, %v6706_v4  ;;  %v6709_v32 = vpop.f32.mrb[26].mxu1  ;;  %v6604_v5 = vpop.f32.mrb[31].mxu0 }
 0x4c1   : > { %v4717_v63 = vadd.f32 %v6602_v35, %v8789_v25  ;;  %v6605_v38 = vadd.f32 %v6604_v5, %v6603_v27  ;;  %v6710_v14 = vpop.f32.mrb[27].mxu1 }
 0x4c2   : > { %v6711_v19 = vadd.f32 %v6710_v14, %v6709_v32  ;;  %v8879_v49 = vadd.f32 %v6708_v3, %v4709_v2 }
 0x4c3   : > { %v4720_v50 = vadd.f32 %v6605_v38, %v8792_v29 }
 0x4c4   : > { %v8882_v45 = vadd.f32 %v6711_v19, %v4712_v31 }
 0x4c5   : > { %v6862_v12 = vpop.f32.mrb[32].mxu0 }
 0x4c6   : > { %v6712_v1 = vpop.f32.mrb[28].mxu1  ;;  %v4927_v22 = vadd.f32 %v6862_v12, %v8801_v61  ;;  %v4918_v11 = vpop.f32.mrb[33].mxu0 }
 0x4c7   : > { %v6713_v54 = vpop.f32.mrb[29].mxu1  ;;  %v4919_v23 = vadd.f32 %v4918_v11, %v8795_v15  ;;  %v6863_v4 = vpop.f32.mrb[34].mxu0 }
 0x4c8   : > { %v6714_v17 = vadd.f32 %v6713_v54, %v6712_v1  ;;  %v6715_v25 = vpop.f32.mrb[30].mxu1  ;;  %v4930_v35 = vadd.f32 %v6863_v4, %v8804_v43  ;;  %v4921_v52 = vpop.f32.mrb[35].mxu0  ;;  %v5047_v29 = vmax.f32 %v4927_v22, 0.0 }
 0x4c9   : > { %v6716_v2 = vpop.f32.mrb[31].mxu1  ;;  %v4922_v27 = vadd.f32 %v4921_v52, %v8798_v36  ;;  %v5045_v5 = vmax.f32 %v4919_v23, 0.0 }
 0x4ca   : > { %v5048_v31 = vmax.f32 %v4930_v35, 0.0  ;;  %v6717_v3 = vadd.f32 %v6716_v2, %v6715_v25  ;;  %v8888_v32 = vadd.f32 %v6714_v17, %v4717_v63 }
 0x4cb   : > { %v5046_v61 = vmax.f32 %v4922_v27, 0.0 }
 0x4cc   : > { %v5078_v38 = vpack.c.bf16 %v5048_v31, %v5047_v29  ;;  %v8890_v14 = vadd.f32 %v6717_v3, %v4720_v50 }
 0x4cd   : > { %v5077_v15 = vpack.c.bf16 %v5046_v61, %v5045_v5  ;;  %v6866_v19 = vpop.f32.mrb[36].mxu0 }
 0x4ce   : > { %v4943_v12 = vadd.f32 %v6866_v19, %v8813_v18  ;;  %v4934_v1 = vpop.f32.mrb[37].mxu0 }
 0x4cf   : > { %v4935_v43 = vadd.f32 %v4934_v1, %v8807_v33  ;;  %v6867_v11 = vpop.f32.mrb[38].mxu0  ;;  %6896 = vmatprep.mubr.msk.bf16.mxu1 %vm2542_vm0, %v5077_v15 }
 0x4d0   : > { %v4946_v36 = vadd.f32 %v6867_v11, %v8816_v59  ;;  %v4937_v22 = vpop.f32.mrb[39].mxu0  ;;  %6897 = vmatmul.mubr.msk.bf16.vlgmr.msra.gmra.mrb[32].mxu1 %vm2542_vm0, %v5078_v38  ;;  %v5051_v54 = vmax.f32 %v4943_v12, 0.0 }
 0x4d1   : > { %v4938_v63 = vadd.f32 %v4937_v22, %v8810_v40  ;;  %v5049_v23 = vmax.f32 %v4935_v43, 0.0 }
 0x4d2   : > { %v5052_v50 = vmax.f32 %v4946_v36, 0.0 }
 0x4d3   : > { %v5050_v4 = vmax.f32 %v4938_v63, 0.0 }
 0x4d4   : > { %v5080_v17 = vpack.c.bf16 %v5052_v50, %v5051_v54 }
 0x4d5   : > { %v5079_v25 = vpack.c.bf16 %v5050_v4, %v5049_v23  ;;  %v6870_v18 = vpop.f32.mrb[40].mxu0 }
 0x4d6   : > { %v4959_v35 = vadd.f32 %v6870_v18, %v8825_v13  ;;  %v4950_v33 = vpop.f32.mrb[41].mxu0 }
 0x4d7   : > { %v4951_v52 = vadd.f32 %v4950_v33, %v8819_v7  ;;  %v6871_v2 = vpop.f32.mrb[42].mxu0  ;;  %6900 = vmatprep.mubr.msk.bf16.mxu1 %vm2542_vm0, %v5079_v25 }
 0x4d8   : > { %v4962_v59 = vadd.f32 %v6871_v2, %v8828_v47  ;;  %v4953_v27 = vpop.f32.mrb[43].mxu0  ;;  %6901 = vmatmul.mubr.msk.bf16.gmra.mrb[36].mxu1 %vm2542_vm0, %v5080_v17  ;;  %v5055_v29 = vmax.f32 %v4959_v35, 0.0 }
 0x4d9   : > { %v4954_v40 = vadd.f32 %v4953_v27, %v8822_v57  ;;  %v5053_v3 = vmax.f32 %v4951_v52, 0.0 }
 0x4da   : > { %v5056_v31 = vmax.f32 %v4962_v59, 0.0 }
 0x4db   : > { %v5054_v5 = vmax.f32 %v4954_v40, 0.0 }
 0x4dc   : > { %v5082_v61 = vpack.c.bf16 %v5056_v31, %v5055_v29 }
 0x4dd   : > { %v5081_v38 = vpack.c.bf16 %v5054_v5, %v5053_v3  ;;  %v6874_v13 = vpop.f32.mrb[44].mxu0 }
 0x4de   : > { %v4975_v15 = vadd.f32 %v6874_v13, %v8837_v16  ;;  %v4966_v7 = vpop.f32.mrb[45].mxu0 }
 0x4df   : > { %v4967_v19 = vadd.f32 %v4966_v7, %v8831_v30  ;;  %v6875_v12 = vpop.f32.mrb[46].mxu0  ;;  %6904 = vmatprep.mubr.msk.bf16.mxu1 %vm2542_vm0, %v5081_v38 }
 0x4e0   : > { %v4978_v47 = vadd.f32 %v6875_v12, %v8840_v60  ;;  %v4969_v1 = vpop.f32.mrb[47].mxu0  ;;  %6905 = vmatmul.mubr.msk.bf16.gmra.mrb[40].mxu1 %vm2542_vm0, %v5082_v61  ;;  %v5059_v43 = vmax.f32 %v4975_v15, 0.0 }
 0x4e1   : > { %v4970_v57 = vadd.f32 %v4969_v1, %v8834_v41  ;;  %v5057_v36 = vmax.f32 %v4967_v19, 0.0 }
 0x4e2   : > { %v5060_v11 = vmax.f32 %v4978_v47, 0.0 }
 0x4e3   : > { %v5058_v22 = vmax.f32 %v4970_v57, 0.0 }
 0x4e4   : > { %v5084_v63 = vpack.c.bf16 %v5060_v11, %v5059_v43 }
 0x4e5   : > { %v5083_v54 = vpack.c.bf16 %v5058_v22, %v5057_v36  ;;  %v6878_v16 = vpop.f32.mrb[48].mxu0 }
 0x4e6   : > { %v4991_v50 = vadd.f32 %v6878_v16, %v8849_v56  ;;  %v4982_v30 = vpop.f32.mrb[49].mxu0 }
 0x4e7   : > { %v4983_v23 = vadd.f32 %v4982_v30, %v8843_v46  ;;  %v6879_v4 = vpop.f32.mrb[50].mxu0  ;;  %6908 = vmatprep.mubr.msk.bf16.mxu1 %vm2542_vm0, %v5083_v54 }
 0x4e8   : > { %v4994_v60 = vadd.f32 %v6879_v4, %v8852_v42  ;;  %v4985_v17 = vpop.f32.mrb[51].mxu0  ;;  %6909 = vmatmul.mubr.msk.bf16.gmra.mrb[44].mxu1 %vm2542_vm0, %v5084_v63  ;;  %v5063_v25 = vmax.f32 %v4991_v50, 0.0 }
 0x4e9   : > { %v4986_v41 = vadd.f32 %v4985_v17, %v8846_v51  ;;  %v5061_v35 = vmax.f32 %v4983_v23, 0.0 }
 0x4ea   : > { %v5064_v18 = vmax.f32 %v4994_v60, 0.0 }
 0x4eb   : > { %v5062_v33 = vmax.f32 %v4986_v41, 0.0 }
 0x4ec   : > { %v5086_v52 = vpack.c.bf16 %v5064_v18, %v5063_v25 }
 0x4ed   : > { %v5085_v2 = vpack.c.bf16 %v5062_v33, %v5061_v35  ;;  %v6882_v56 = vpop.f32.mrb[52].mxu0 }
 0x4ee   : > { %v5007_v59 = vadd.f32 %v6882_v56, %v8861_v34  ;;  %v4998_v46 = vpop.f32.mrb[53].mxu0 }
 0x4ef   : > { %v4999_v27 = vadd.f32 %v4998_v46, %v8855_v62  ;;  %v6883_v40 = vpop.f32.mrb[54].mxu0  ;;  %6912 = vmatprep.mubr.msk.bf16.mxu1 %vm2542_vm0, %v5085_v2 }
 0x4f0   : > { %v5010_v42 = vadd.f32 %v6883_v40, %v8864_v6  ;;  %v5001_v29 = vpop.f32.mrb[55].mxu0  ;;  %6913 = vmatmul.mubr.msk.bf16.gmra.mrb[48].mxu1 %vm2542_vm0, %v5086_v52  ;;  %v5067_v31 = vmax.f32 %v5007_v59, 0.0 }
 0x4f1   : > { %v5002_v51 = vadd.f32 %v5001_v29, %v8858_v0  ;;  %v5065_v5 = vmax.f32 %v4999_v27, 0.0 }
 0x4f2   : > { %v5068_v3 = vmax.f32 %v5010_v42, 0.0 }
 0x4f3   : > { %v5066_v61 = vmax.f32 %v5002_v51, 0.0 }
 0x4f4   : > { %v5088_v38 = vpack.c.bf16 %v5068_v3, %v5067_v31 }
 0x4f5   : > { %v5087_v13 = vpack.c.bf16 %v5066_v61, %v5065_v5  ;;  %v6886_v34 = vpop.f32.mrb[56].mxu0 }
 0x4f6   : > { %v5023_v15 = vadd.f32 %v6886_v34, %v8873_v8  ;;  %v5014_v62 = vpop.f32.mrb[57].mxu0  ;;  %v9121_v34 = vld [vmem:[#allocation8_spill] sm:$0xff] }
 0x4f7   : > { %v5015_v7 = vadd.f32 %v5014_v62, %v8867_v10  ;;  %v6887_v19 = vpop.f32.mrb[58].mxu0  ;;  %6916 = vmatprep.mubr.msk.bf16.mxu1 %vm2542_vm0, %v5087_v13 }
 0x4f8   : > { %v5026_v6 = vadd.f32 %v6887_v19, %v8876_v9  ;;  %v5017_v12 = vpop.f32.mrb[59].mxu0  ;;  %6917 = vmatmul.mubr.msk.bf16.gmra.mrb[52].mxu1 %vm2542_vm0, %v5088_v38  ;;  %v5071_v47 = vmax.f32 %v5023_v15, 0.0 }
 0x4f9   : > { %v5018_v0 = vadd.f32 %v5017_v12, %v8870_v26  ;;  %v5069_v57 = vmax.f32 %v5015_v7, 0.0  ;;  %v9123_v12 = vld [vmem:[#allocation10_spill] sm:$0xff] }
 0x4fa   : > { %v5072_v1 = vmax.f32 %v5026_v6, 0.0 }
 0x4fb   : > { %v5070_v43 = vmax.f32 %v5018_v0, 0.0 }
 0x4fc   : > { %v5090_v11 = vpack.c.bf16 %v5072_v1, %v5071_v47  ;;  %v9124_v1 = vld [vmem:[#allocation11_spill] sm:$0xff] }
 0x4fd   : > { %v5089_v36 = vpack.c.bf16 %v5070_v43, %v5069_v57  ;;  %v6890_v8 = vpop.f32.mrb[60].mxu0 }
 0x4fe   : > { %v5039_v22 = vadd.f32 %v6890_v8, %v8888_v32  ;;  %v5030_v10 = vpop.f32.mrb[61].mxu0 }
 0x4ff   : > { %v5031_v63 = vadd.f32 %v5030_v10, %v8879_v49  ;;  %v6891_v9 = vpop.f32.mrb[62].mxu0  ;;  %6920 = vmatprep.mubr.msk.bf16.mxu1 %vm2542_vm0, %v5089_v36  ;;  %v9125_v36 = vld [vmem:[#allocation12_spill] sm:$0xff] }
 0x500   : > { %v5042_v54 = vadd.f32 %v6891_v9, %v8890_v14  ;;  %v5033_v26 = vpop.f32.mrb[63].mxu0  ;;  %6921 = vmatmul.mubr.msk.bf16.gmra.mrb[56].mxu1 %vm2542_vm0, %v5090_v11  ;;  %v5075_v50 = vmax.f32 %v5039_v22, 0.0  ;;  %v9126_v9 = vld [vmem:[#allocation13_spill] sm:$0xff] }
 0x501   : > { %v5034_v16 = vadd.f32 %v5033_v26, %v8882_v45  ;;  %v5073_v23 = vmax.f32 %v5031_v63, 0.0 }
 0x502   : > { %v5076_v30 = vmax.f32 %v5042_v54, 0.0 }
 0x503   : > { %v5074_v4 = vmax.f32 %v5034_v16, 0.0  ;;  %v9127_v16 = vld [vmem:[#allocation14_spill] sm:$0xff] }
 0x504   : > { %v5092_v32 = vpack.c.bf16 %v5076_v30, %v5075_v50 }
 0x505   : > { %v5091_v60 = vpack.c.bf16 %v5074_v4, %v5073_v23  ;;  %v9128_v4 = vld [vmem:[#allocation15_spill] sm:$0xff] }
 0x507   : > { %6924 = vmatprep.mubr.msk.bf16.mxu1 %vm2542_vm0, %v5091_v60 }
 0x508   : > { %6925 = vmatmul.mubr.msk.bf16.gmra.mrb[60].mxu1 %vm2542_vm0, %v5092_v32 }
 0x5a3   : > { %v6898_v49 = vpop.f32.mrb[32].mxu1 }
 0x5a4   : > { %v5352_v14 = vadd.f32 %v6898_v49, %v8281_v20  ;;  %v5191_v17 = vpop.f32.mrb[33].mxu1 }
 0x5a5   : > { %v5350_v41 = vadd.f32 %v5191_v17, %v8284_v48  ;;  %v6899_v45 = vpop.f32.mrb[34].mxu1 }
 0x5a6   : > { %v5448_v25 = vmax.f32 %v5352_v14, 0.0  ;;  %v5353_v18 = vadd.f32 %v6899_v45, %v8288_v24  ;;  %v5194_v35 = vpop.f32.mrb[35].mxu1  ;;  %v9129_v14 = vld [vmem:[#allocation16_spill] sm:$0xff] }
 0x5a7   : > { %v5446_v33 = vmax.f32 %v5350_v41, 0.0  ;;  %v5351_v52 = vadd.f32 %v5194_v35, %v8292_v55 }
 0x5a8   : > { %5480 = vst [vmem:[%s8943_s5 + $0x10] sm:$0xff] %v5448_v25  ;;  %v5449_v20 = vmax.f32 %v5353_v18, 0.0  ;;  %v9130_v18 = vld [vmem:[#allocation17_spill] sm:$0xff] }
 0x5a9   : > { %5478 = vst [vmem:[%s8943_s5] sm:$0xff] %v5446_v33  ;;  %v5447_v48 = vmax.f32 %v5351_v52, 0.0  ;;  %v9131_v52 = vld [vmem:[#allocation18_spill] sm:$0xff] }
 0x5aa   : > { %5481 = vst [vmem:[%s8943_s5 + $0x18] sm:$0xff] %v5449_v20 }
 0x5ab   : > { %5479 = vst [vmem:[%s8943_s5 + $0x8] sm:$0xff] %v5447_v48  ;;  %v6902_v24 = vpop.f32.mrb[36].mxu1 }
 0x5ac   : > { %v5356_v2 = vadd.f32 %v6902_v24, %v8297_v53  ;;  %v5207_v55 = vpop.f32.mrb[37].mxu1 }
 0x5ad   : > { %v5354_v56 = vadd.f32 %v5207_v55, %v8300_v44  ;;  %v6903_v59 = vpop.f32.mrb[38].mxu1 }
 0x5ae   : > { %v5452_v46 = vmax.f32 %v5356_v2, 0.0  ;;  %v5357_v27 = vadd.f32 %v6903_v59, %v8304_v21  ;;  %v5210_v40 = vpop.f32.mrb[39].mxu1  ;;  %v9132_v2 = vld [vmem:[#allocation19_spill] sm:$0xff] }
 0x5af   : > { %v5450_v42 = vmax.f32 %v5354_v56, 0.0  ;;  %v5355_v29 = vadd.f32 %v5210_v40, %v8313_v28 }
 0x5b0   : > { %5484 = vst [vmem:[%s8943_s5 + $0x30] sm:$0xff] %v5452_v46  ;;  %v5453_v51 = vmax.f32 %v5357_v27, 0.0  ;;  %v9133_v46 = vld [vmem:[#allocation20_spill] sm:$0xff] }
 0x5b1   : > { %5482 = vst [vmem:[%s8943_s5 + $0x20] sm:$0xff] %v5450_v42  ;;  %v5451_v31 = vmax.f32 %v5355_v29, 0.0 }
 0x5b2   : > { %5485 = vst [vmem:[%s8943_s5 + $0x38] sm:$0xff] %v5453_v51  ;;  %v9134_v51 = vld [vmem:[#allocation21_spill] sm:$0xff] }
 0x5b3   : > { %5483 = vst [vmem:[%s8943_s5 + $0x28] sm:$0xff] %v5451_v31  ;;  %v6906_v53 = vpop.f32.mrb[40].mxu1 }
 0x5b4   : > { %v5360_v44 = vadd.f32 %v6906_v53, %v8326_v37  ;;  %v5223_v3 = vpop.f32.mrb[41].mxu1 }
 0x5b5   : > { %v5358_v21 = vadd.f32 %v5223_v3, %v8332_v39  ;;  %v6907_v5 = vpop.f32.mrb[42].mxu1  ;;  %v9122_v39 = vld [vmem:[#allocation9_spill] sm:$0xff] }
 0x5b6   : > { %v5456_v61 = vmax.f32 %v5360_v44, 0.0  ;;  %v5361_v28 = vadd.f32 %v6907_v5, %v8338_v58  ;;  %v5226_v38 = vpop.f32.mrb[43].mxu1  ;;  %v9135_v44 = vld [vmem:[#allocation22_spill] sm:$0xff] }
 0x5b7   : > { %v5454_v13 = vmax.f32 %v5358_v21, 0.0  ;;  %v5359_v15 = vadd.f32 %v5226_v38, %v9121_v34  ;;  %v9137_v34 = vld [vmem:[#allocation24_spill] sm:$0xff] }
 0x5b8   : > { %5488 = vst [vmem:[%s8943_s5 + $0x50] sm:$0xff] %v5456_v61  ;;  %v5457_v62 = vmax.f32 %v5361_v28, 0.0  ;;  %v9136_v61 = vld [vmem:[#allocation23_spill] sm:$0xff] }
 0x5b9   : > { %5486 = vst [vmem:[%s8943_s5 + $0x40] sm:$0xff] %v5454_v13  ;;  %v5455_v7 = vmax.f32 %v5359_v15, 0.0 }
 0x5ba   : > { %5489 = vst [vmem:[%s8943_s5 + $0x58] sm:$0xff] %v5457_v62 }
 0x5bb   : > { %5487 = vst [vmem:[%s8943_s5 + $0x48] sm:$0xff] %v5455_v7  ;;  %v6910_v37 = vpop.f32.mrb[44].mxu1 }
 0x5bc   : > { %v5364_v19 = vadd.f32 %v6910_v37, %v9122_v39  ;;  %v5239_v6 = vpop.f32.mrb[45].mxu1  ;;  %v9138_v39 = vld [vmem:[#allocation25_spill] sm:$0xff] }
 0x5bd   : > { %v5362_v58 = vadd.f32 %v5239_v6, %v9123_v12  ;;  %v6911_v0 = vpop.f32.mrb[46].mxu1  ;;  %v9139_v12 = vld [vmem:[#allocation26_spill] sm:$0xff] }
 0x5be   : > { %v5460_v47 = vmax.f32 %v5364_v19, 0.0  ;;  %v5365_v57 = vadd.f32 %v6911_v0, %v9124_v1  ;;  %v5242_v43 = vpop.f32.mrb[47].mxu1  ;;  %v9140_v1 = vld [vmem:[#allocation27_spill] sm:$0xff] }
 0x5bf   : > { %v5458_v11 = vmax.f32 %v5362_v58, 0.0  ;;  %v5363_v8 = vadd.f32 %v5242_v43, %v9125_v36  ;;  %v9141_v36 = vld [vmem:[#allocation28_spill] sm:$0xff] }
 0x5c0   : > { %5492 = vst [vmem:[%s8943_s5 + $0x70] sm:$0xff] %v5460_v47  ;;  %v5461_v22 = vmax.f32 %v5365_v57, 0.0 }
 0x5c1   : > { %5490 = vst [vmem:[%s8943_s5 + $0x60] sm:$0xff] %v5458_v11  ;;  %v5459_v10 = vmax.f32 %v5363_v8, 0.0 }
 0x5c2   : > { %5493 = vst [vmem:[%s8943_s5 + $0x78] sm:$0xff] %v5461_v22 }
 0x5c3   : > { %5491 = vst [vmem:[%s8943_s5 + $0x68] sm:$0xff] %v5459_v10  ;;  %v6914_v63 = vpop.f32.mrb[48].mxu1 }
 0x5c4   : > { %v5368_v54 = vadd.f32 %v6914_v63, %v9126_v9  ;;  %v5255_v26 = vpop.f32.mrb[49].mxu1 }
 0x5c5   : > { %v5366_v50 = vadd.f32 %v5255_v26, %v9127_v16  ;;  %v6915_v30 = vpop.f32.mrb[50].mxu1 }
 0x5c6   : > { %v5464_v23 = vmax.f32 %v5368_v54, 0.0  ;;  %v5369_v32 = vadd.f32 %v6915_v30, %v9128_v4  ;;  %v5258_v60 = vpop.f32.mrb[51].mxu1 }
 0x5c7   : > { %v5462_v49 = vmax.f32 %v5366_v50, 0.0  ;;  %v5367_v17 = vadd.f32 %v5258_v60, %v9129_v14 }
 0x5c8   : > { %5496 = vst [vmem:[%s8943_s5 + $0x90] sm:$0xff] %v5464_v23  ;;  %v5465_v41 = vmax.f32 %v5369_v32, 0.0 }
 0x5c9   : > { %5494 = vst [vmem:[%s8943_s5 + $0x80] sm:$0xff] %v5462_v49  ;;  %v5463_v45 = vmax.f32 %v5367_v17, 0.0 }
 0x5ca   : > { %5497 = vst [vmem:[%s8943_s5 + $0x98] sm:$0xff] %v5465_v41 }
 0x5cb   : > { %5495 = vst [vmem:[%s8943_s5 + $0x88] sm:$0xff] %v5463_v45  ;;  %v6918_v25 = vpop.f32.mrb[52].mxu1 }
 0x5cc   : > { %v5372_v35 = vadd.f32 %v6918_v25, %v9130_v18  ;;  %v5271_v33 = vpop.f32.mrb[53].mxu1 }
 0x5cd   : > { %v5370_v20 = vadd.f32 %v5271_v33, %v9131_v52  ;;  %v6919_v48 = vpop.f32.mrb[54].mxu1 }
 0x5ce   : > { %v5468_v24 = vmax.f32 %v5372_v35, 0.0  ;;  %v5373_v55 = vadd.f32 %v6919_v48, %v9132_v2  ;;  %v5274_v56 = vpop.f32.mrb[55].mxu1 }
 0x5cf   : > { %v5466_v59 = vmax.f32 %v5370_v20, 0.0  ;;  %v5371_v27 = vadd.f32 %v5274_v56, %v9133_v46 }
 0x5d0   : > { %5500 = vst [vmem:[%s8943_s5 + $0xb0] sm:$0xff] %v5468_v24  ;;  %v5469_v40 = vmax.f32 %v5373_v55, 0.0 }
 0x5d1   : > { %5498 = vst [vmem:[%s8943_s5 + $0xa0] sm:$0xff] %v5466_v59  ;;  %v5467_v42 = vmax.f32 %v5371_v27, 0.0 }
 0x5d2   : > { %5501 = vst [vmem:[%s8943_s5 + $0xb8] sm:$0xff] %v5469_v40 }
 0x5d3   : > { %5499 = vst [vmem:[%s8943_s5 + $0xa8] sm:$0xff] %v5467_v42  ;;  %v6922_v29 = vpop.f32.mrb[56].mxu1 }
 0x5d4   : > { %v5376_v31 = vadd.f32 %v6922_v29, %v9134_v51  ;;  %v5287_v53 = vpop.f32.mrb[57].mxu1 }
 0x5d5   : > { %v5374_v3 = vadd.f32 %v5287_v53, %v9135_v44  ;;  %v6923_v21 = vpop.f32.mrb[58].mxu1 }
 0x5d6   : > { %v5472_v5 = vmax.f32 %v5376_v31, 0.0  ;;  %v5377_v28 = vadd.f32 %v6923_v21, %v9136_v61  ;;  %v5290_v38 = vpop.f32.mrb[59].mxu1 }
 0x5d7   : > { %v5470_v13 = vmax.f32 %v5374_v3, 0.0  ;;  %v5375_v15 = vadd.f32 %v5290_v38, %v9137_v34 }
 0x5d8   : > { %5504 = vst [vmem:[%s8943_s5 + $0xd0] sm:$0xff] %v5472_v5  ;;  %v5473_v62 = vmax.f32 %v5377_v28, 0.0 }
 0x5d9   : > { %5502 = vst [vmem:[%s8943_s5 + $0xc0] sm:$0xff] %v5470_v13  ;;  %v5471_v7 = vmax.f32 %v5375_v15, 0.0 }
 0x5da   : > { %5505 = vst [vmem:[%s8943_s5 + $0xd8] sm:$0xff] %v5473_v62 }
 0x5db   : > { %5503 = vst [vmem:[%s8943_s5 + $0xc8] sm:$0xff] %v5471_v7  ;;  %v6926_v37 = vpop.f32.mrb[60].mxu1 }
 0x5dc   : > { %v5380_v19 = vadd.f32 %v6926_v37, %v9138_v39  ;;  %v5303_v6 = vpop.f32.mrb[61].mxu1 }
 0x5dd   : > { %v5378_v58 = vadd.f32 %v5303_v6, %v9139_v12  ;;  %v6927_v0 = vpop.f32.mrb[62].mxu1 }
 0x5de   : > { %v5476_v47 = vmax.f32 %v5380_v19, 0.0  ;;  %v5381_v57 = vadd.f32 %v6927_v0, %v9140_v1  ;;  %v5306_v43 = vpop.f32.mrb[63].mxu1 }
 0x5df   : > { %v5474_v11 = vmax.f32 %v5378_v58, 0.0  ;;  %v5379_v8 = vadd.f32 %v5306_v43, %v9141_v36 }
 0x5e0   : > { %5508 = vst [vmem:[%s8943_s5 + $0xf0] sm:$0xff] %v5476_v47  ;;  %v5477_v22 = vmax.f32 %v5381_v57, 0.0 }
 0x5e1   : > { %5506 = vst [vmem:[%s8943_s5 + $0xe0] sm:$0xff] %v5474_v11  ;;  %v5475_v10 = vmax.f32 %v5379_v8, 0.0 }
 0x5e2   : > { %5509 = vst [vmem:[%s8943_s5 + $0xf8] sm:$0xff] %v5477_v22 }
 0x5e3   : > { %5507 = vst [vmem:[%s8943_s5 + $0xe8] sm:$0xff] %v5475_v10 }
 0x5e4   : > { %7166 = shalt.err (!%p7163_p3)
}
 0x5e5   : > { %s7167_s25 = scalar_lea.hbm %s9007_s11, 4096  ;;  %s7171_s28 = scalar_lea.hbm %s9060_s3, 8192 }
 0x5e6   : > { %p7168_p4 = scmp.ne.s32.totalorder %s9007_s11, %s7167_s25  ;;  %p7172_p9 = scmp.lt.u32.totalorder %s9007_s11, %s9060_s3 }
 0x5e7   : > { %p7173_p10 = scmp.lt.u32.totalorder %s7171_s28, %s7167_s25  ;;  %p7175_p12 = scmp.lt.u32.totalorder %s7167_s25, %s9007_s11 }
 0x5e8   : > { %p7169_p7 = pnand %p7168_p4, %p7280_p5 }
 0x5e9   : > { %p7174_p11 = por %p7173_p10, %p7172_p9 }
 0x5ea   : > { %p7170_p8 = pneg %p7169_p7 }
 0x5eb   : > { %p7176_p13 = por %p7175_p12, %p7174_p11 }
 0x5ed   : > { %p7177_p0 = pnand %p7176_p13, %p7170_p8 }
 0x5ef   : > { %7180 = shalt.err (!%p7177_p0)
}
 0x5f0   : > { %s7220_s8 = smov 128   ;;  %s7221_s4 = smov 8  }
 0x5f1   : > { %6928 = dma.vmem_to_hbm [thread:$0]  (%p7280_p5), %s9009_s7, 4096, %s9007_s11, %s9016_s16, %s7220_s8, %s7220_s8, %s7221_s4  }
 0x5f2 PF: > { %p6934_p1 = scmp.ge.s32.totalorder %s7215_s15, 2  ;;  %s5539_s5 = sand.u32 1, %s7203_s12  }
 0x5f3   : > { %s5540_s6 = scalar_lea.sflag [#allocation6], %s5539_s5 }
 0x5f4   : > { %p6931_p2 = pnand %p6934_p1, %p7284_p6 }
 0x5f6   : > { %7198 = dma.done.wait (!%p6931_p2), %s5540_s6, 4096  }
 0x5f7   : > { %7200 = vsyncadd (!%p6931_p2), %s5540_s6, 4294963200  ;;  %p13_p3 = scmp.ge.s32.totalorder %s7267_s18, 4   ;;  %s9142_s12 = smov %s7207_s13 }
 0x5f8   : > { %s9143_s13 = smov %s7211_s14  ;;  %s9144_s14 = smov %s7278_s21 }
 0x5f9   : > { %s9145_s15 = smov %s7267_s18  ;;  %15 = sbr.rel (!%p13_p3) target bundleno = 3 (0x3), region = 70 }
 0x600   :  { %5545 = vsyncpa [#allocation6], 1 }
 0x601   :  { %5547 = vsyncpa [#allocation6 + $0x1], 1 }

</bundles_post_ra>
